<compile_context>
chip_gen: v7x
topology: tpu7x:2x2x1
jax: 0.10.0
libtpu: 0.0.40
codegen_flags: <defaults>
</compile_context>

<pallas_src>
import numpy as np
import jax
import jax.numpy as jnp
from jax import lax
from jax.experimental import pallas as pl
from jax.experimental.pallas import tpu as pltpu


def make_atom_encoder_kernel(num_feats, pack, offsets, v_total):
    """Kernel factory: F, pack, per-feature offsets and V_total are baked in as
    trace-time constants (zero HBM/SMEM traffic for them)."""
    # Compare-column k = j*num_feats + f targets global one-hot column
    # j*v_total + offsets[f] + value.  The constant part is folded in here.
    col_off = tuple(int(j * v_total + offsets[f])
                    for j in range(pack) for f in range(num_feats))

    def kernel(idx_ref, w_ref, o_ref):
        # idx_ref: (t4, pack*F) int32      -- `pack` consecutive nodes per packed row
        # w_ref:   (pack*V_total, out_w)   -- block-diagonal concat of all tables
        # o_ref:   (t4, out_w) f32         -- lane-dense packed output (out_w % 128 == 0)
        ids = idx_ref[...]
        t4 = ids.shape[0]
        k_total = w_ref.shape[0]
        col = lax.broadcasted_iota(jnp.int32, (t4, k_total), 1)

        # All pack*F features hit disjoint column blocks, so OR == multi-hot sum.
        # (The per-column scalar offset add is on a (t4,) slice -- negligible VALU
        # work next to the (t4, k_total) compares, and known to lower cleanly.)
        mh = None
        for k, off in enumerate(col_off):          # static & small -> fully unrolled
            hit = (ids[:, k] + off)[:, None] == col
            mh = hit if mh is None else (mh | hit)

        # Single convert + single MXU matmul (K = pack*V_total, one K-tile typically).
        o_ref[...] = jnp.dot(mh.astype(w_ref.dtype), w_ref[...],
                             preferred_element_type=jnp.float32)

    return kernel


def _choose_tile(n_packed, tile_n, pack):
    """Packed rows per grid step.  Big tiles amortize the ~600-cycle per-step
    pipeline overhead, but keep the grid >= 2 steps when possible so both v7x
    TensorCores get work (harmless no-op on single-TC v5e/v6e)."""
    t4 = max(8, (max(8, tile_n // pack) // 8) * 8)
    if t4 >= n_packed:
        half = ((pl.cdiv(n_packed, 2) + 7) // 8) * 8   # ceil(n/2), rounded up to 8
        t4 = half if half < n_packed else n_packed
    return t4


def make_atom_encoder(emb_tables, *, tile_n=1024, weights_dtype=jnp.float32):
    """One-time parameter prep; returns a jitted callable x:(N,F) int -> (N, emb_dim) f32
    equal to sum_f Embedding_f(x[:, f]) (PyTorch AtomEncoder.forward)."""
    num_feats = len(emb_tables)
    emb_dim = int(emb_tables[0].shape[1])
    dims = [int(t.shape[0]) for t in emb_tables]
    v_total = int(sum(dims))
    offsets = [0] + list(np.cumsum(dims)[:-1].tolist())

    # Lane-dense packing factor: `pack` consecutive nodes share one 128-lane row.
    pack = 128 // emb_dim if (emb_dim < 128 and 128 % emb_dim == 0) else 1
    out_w = pack * emb_dim
    out_w_pad = ((out_w + 127) // 128) * 128     # full-lane stores (vst, not vst.msk)
    k_total = pack * v_total

    # Block-diagonal weight slab (built once, on host): slot j's concatenated tables
    # occupy rows [j*V_total, (j+1)*V_total) and output cols [j*emb_dim, (j+1)*emb_dim).
    w_cat = np.concatenate([np.asarray(t, np.float32) for t in emb_tables], axis=0)
    w_np = np.zeros((k_total, out_w_pad), np.float32)
    for j in range(pack):
        w_np[j * v_total:(j + 1) * v_total, j * emb_dim:(j + 1) * emb_dim] = w_cat
    w_slab = jnp.asarray(w_np, dtype=weights_dtype)

    kernel = make_atom_encoder_kernel(num_feats, pack, offsets, v_total)

    # Per-chip VMEM budget (v7x: 64 MiB physical vs 128 MiB on v5e/v6e).
    try:
        phys_vmem = int(getattr(pltpu.get_tpu_info(), "vmem_capacity_bytes",
                                64 * 1024 * 1024))
    except Exception:
        phys_vmem = 64 * 1024 * 1024             # conservative (v7x) fallback
    vmem_cap = phys_vmem // 2
    w_itemsize = int(np.dtype(weights_dtype).itemsize)

    def encode(x, w):
        n, f = x.shape
        assert f == num_feats, "feature count mismatch with the embedding tables"

        n_packed0 = pl.cdiv(n, pack)
        t4 = _choose_tile(n_packed0, tile_n, pack)
        # Pad so packed rows fill whole grid tiles: no Pallas-padded (undefined)
        # index rows are ever read; padded rows use index 0 (always valid) and are
        # sliced away below.
        n_packed = pl.cdiv(n_packed0, t4) * t4
        n_pad = n_packed * pack
        x32 = x.astype(jnp.int32)
        if n_pad != n:
            x32 = jnp.pad(x32, ((0, n_pad - n), (0, 0)))
        # Row-major contiguous reshape (free): packed row r holds nodes
        # pack*r .. pack*r + pack - 1, feature order matching col_off in the kernel.
        x_rs = x32.reshape(n_packed, pack * num_feats)

        # VMEM estimate (double-buffered tiles + weight slab + multi-hot temps).
        k_pad = max(((k_total + 127) // 128) * 128, 128)
        est = (2 * t4 * pack * num_feats * 4
               + 2 * t4 * out_w_pad * 4
               + 2 * k_total * out_w_pad * w_itemsize
               + 4 * t4 * k_pad * 4)
        if est > vmem_cap:
            raise ValueError("tile_n too large for this TPU's VMEM; reduce tile_n")
        vmem_limit = None if est <= 12 * 1024 * 1024 else min(vmem_cap, 2 * est)

        out_packed = pl.pallas_call(
            kernel,
            out_shape=jax.ShapeDtypeStruct((n_packed, out_w_pad), jnp.float32),
            grid_spec=pltpu.PrefetchScalarGridSpec(
                num_scalar_prefetch=0,
                grid=(n_packed // t4,),
                in_specs=[
                    pl.BlockSpec((t4, pack * num_feats), lambda i: (i, 0)),
                    # grid-invariant weight slab (tens of KB; stays resident)
                    pl.BlockSpec((k_total, out_w_pad), lambda i: (0, 0)),
                ],
                out_specs=pl.BlockSpec((t4, out_w_pad), lambda i: (i, 0)),
            ),
            compiler_params=pltpu.CompilerParams(
                dimension_semantics=("parallel",),
                vmem_limit_bytes=vmem_limit,
            ),
        )(x_rs, w)

        # Free contiguous unpack: drop zero-padded output lanes, then padded rows.
        return out_packed[:, :out_w].reshape(n_pad, emb_dim)[:n]

    encode_jit = jax.jit(encode)
    return lambda x: encode_jit(x, w_slab)


def xavier_uniform(key, shape):
    fan_in, fan_out = shape
    bound = float(np.sqrt(6.0 / (fan_in + fan_out)))
    return jax.random.uniform(key, shape, jnp.float32, -bound, bound)


if __name__ == "__main__":
    full_atom_feature_dims = [5, 7, 3, 9]      # vocab size per atom feature
    num_feats = len(full_atom_feature_dims)
    emb_dim = 32
    # 2000 nodes -> 500 packed rows -> tile 256 -> 2 grid steps (both v7x TCs fed).
    n_nodes = 2000

    key = jax.random.PRNGKey(0)
    keys = jax.random.split(key, num_feats + 1)
    emb_tables = [xavier_uniform(keys[i], (full_atom_feature_dims[i], emb_dim))
                  for i in range(num_feats)]
    cols = [jax.random.randint(jax.random.fold_in(keys[-1], i), (n_nodes, 1), 0, d)
            for i, d in enumerate(full_atom_feature_dims)]
    x = jnp.concatenate(cols, axis=1).astype(jnp.int32)      # (N, F)

    encoder = make_atom_encoder(emb_tables, tile_n=1024)
    out = jax.block_until_ready(encoder(x))

    # Pure-JAX reference: sum of embedding lookups.
    ref = jnp.zeros((n_nodes, emb_dim), jnp.float32)
    for i in range(num_feats):
        ref = ref + jnp.take(emb_tables[i], x[:, i], axis=0)
    np.testing.assert_allclose(np.asarray(out), np.asarray(ref), rtol=1e-5, atol=1e-5)

    # Naturally lane-dense path (emb_dim % 128 == 0 -> pack == 1) + grid>=2 clamp.
    emb_dim2 = 128
    tables2 = [xavier_uniform(jax.random.fold_in(keys[i], 7),
                              (full_atom_feature_dims[i], emb_dim2))
               for i in range(num_feats)]
    enc2 = make_atom_encoder(tables2)
    out2 = jax.block_until_ready(enc2(x[:96]))
    ref2 = jnp.zeros((96, emb_dim2), jnp.float32)
    for i in range(num_feats):
        ref2 = ref2 + jnp.take(tables2[i], x[:96, i], axis=0)
    np.testing.assert_allclose(np.asarray(out2), np.asarray(ref2), rtol=1e-5, atol=1e-5)

    # Awkward emb_dim (48): pack == 1, output lanes zero-padded to 128 (full vst).
    emb_dim3 = 48
    tables3 = [xavier_uniform(jax.random.fold_in(keys[i], 11),
                              (full_atom_feature_dims[i], emb_dim3))
               for i in range(num_feats)]
    enc3 = make_atom_encoder(tables3)
    out3 = jax.block_until_ready(enc3(x[:40]))
    ref3 = jnp.zeros((40, emb_dim3), jnp.float32)
    for i in range(num_feats):
        ref3 = ref3 + jnp.take(tables3[i], x[:40, i], axis=0)
    np.testing.assert_allclose(np.asarray(out3), np.asarray(ref3), rtol=1e-5, atol=1e-5)

    print("KERNEL_OK")
</pallas_src>

<mosaic_0001>
module attributes {stable_mosaic.version = 11 : i64} {
  func.func @kernel(%arg0: i32, %arg1: memref<256x16xi32, #tpu.memory_space<vmem>>, %arg2: memref<96x128xf32, #tpu.memory_space<vmem>>, %arg3: memref<256x128xf32, #tpu.memory_space<vmem>>) attributes {dimension_semantics = [#tpu.dimension_semantics<parallel>], iteration_bounds = array<i64: 2>, scalar_prefetch = 0 : i64, scratch_operands = 0 : i64, tpu.core_type = #tpu.core_type<tc>, window_params = [{transform_indices = @transform_0, window_bounds = array<i64: 256, 16>}, {pipeline_mode = #tpu.pipeline_mode<synchronous>, transform_indices = @transform_1, window_bounds = array<i64: 96, 128>}, {transform_indices = @transform_2, window_bounds = array<i64: 256, 128>}]} {
    %c0 = arith.constant 0 : index
    %c0_0 = arith.constant 0 : index
    %0 = vector.load %arg1[%c0, %c0_0] : memref<256x16xi32, #tpu.memory_space<vmem>>, vector<256x16xi32>
    %1 = tpu.iota {dimensions = array<i32: 1>} : vector<256x96xi32>
    %2 = vector.extract_strided_slice %0 {offsets = [0, 0], sizes = [256, 1], strides = [1, 1]} : vector<256x16xi32> to vector<256x1xi32>
    %3 = vector.shape_cast %2 : vector<256x1xi32> to vector<256xi32>
    %c0_i32 = arith.constant 0 : i32
    %4 = vector.broadcast %c0_i32 : i32 to vector<256xi32>
    %5 = arith.addi %3, %4 : vector<256xi32>
    %6 = vector.shape_cast %5 : vector<256xi32> to vector<256x1xi32>
    %7 = vector.broadcast %6 : vector<256x1xi32> to vector<256x96xi32>
    %8 = arith.cmpi eq, %7, %1 : vector<256x96xi32>
    %9 = vector.extract_strided_slice %0 {offsets = [0, 1], sizes = [256, 1], strides = [1, 1]} : vector<256x16xi32> to vector<256x1xi32>
    %10 = vector.shape_cast %9 : vector<256x1xi32> to vector<256xi32>
    %c5_i32 = arith.constant 5 : i32
    %11 = vector.broadcast %c5_i32 : i32 to vector<256xi32>
    %12 = arith.addi %10, %11 : vector<256xi32>
    %13 = vector.shape_cast %12 : vector<256xi32> to vector<256x1xi32>
    %14 = vector.broadcast %13 : vector<256x1xi32> to vector<256x96xi32>
    %15 = arith.cmpi eq, %14, %1 : vector<256x96xi32>
    %16 = arith.ori %8, %15 : vector<256x96xi1>
    %17 = vector.extract_strided_slice %0 {offsets = [0, 2], sizes = [256, 1], strides = [1, 1]} : vector<256x16xi32> to vector<256x1xi32>
    %18 = vector.shape_cast %17 : vector<256x1xi32> to vector<256xi32>
    %c12_i32 = arith.constant 12 : i32
    %19 = vector.broadcast %c12_i32 : i32 to vector<256xi32>
    %20 = arith.addi %18, %19 : vector<256xi32>
    %21 = vector.shape_cast %20 : vector<256xi32> to vector<256x1xi32>
    %22 = vector.broadcast %21 : vector<256x1xi32> to vector<256x96xi32>
    %23 = arith.cmpi eq, %22, %1 : vector<256x96xi32>
    %24 = arith.ori %16, %23 : vector<256x96xi1>
    %25 = vector.extract_strided_slice %0 {offsets = [0, 3], sizes = [256, 1], strides = [1, 1]} : vector<256x16xi32> to vector<256x1xi32>
    %26 = vector.shape_cast %25 : vector<256x1xi32> to vector<256xi32>
    %c15_i32 = arith.constant 15 : i32
    %27 = vector.broadcast %c15_i32 : i32 to vector<256xi32>
    %28 = arith.addi %26, %27 : vector<256xi32>
    %29 = vector.shape_cast %28 : vector<256xi32> to vector<256x1xi32>
    %30 = vector.broadcast %29 : vector<256x1xi32> to vector<256x96xi32>
    %31 = arith.cmpi eq, %30, %1 : vector<256x96xi32>
    %32 = arith.ori %24, %31 : vector<256x96xi1>
    %33 = vector.extract_strided_slice %0 {offsets = [0, 4], sizes = [256, 1], strides = [1, 1]} : vector<256x16xi32> to vector<256x1xi32>
    %34 = vector.shape_cast %33 : vector<256x1xi32> to vector<256xi32>
    %c24_i32 = arith.constant 24 : i32
    %35 = vector.broadcast %c24_i32 : i32 to vector<256xi32>
    %36 = arith.addi %34, %35 : vector<256xi32>
    %37 = vector.shape_cast %36 : vector<256xi32> to vector<256x1xi32>
    %38 = vector.broadcast %37 : vector<256x1xi32> to vector<256x96xi32>
    %39 = arith.cmpi eq, %38, %1 : vector<256x96xi32>
    %40 = arith.ori %32, %39 : vector<256x96xi1>
    %41 = vector.extract_strided_slice %0 {offsets = [0, 5], sizes = [256, 1], strides = [1, 1]} : vector<256x16xi32> to vector<256x1xi32>
    %42 = vector.shape_cast %41 : vector<256x1xi32> to vector<256xi32>
    %c29_i32 = arith.constant 29 : i32
    %43 = vector.broadcast %c29_i32 : i32 to vector<256xi32>
    %44 = arith.addi %42, %43 : vector<256xi32>
    %45 = vector.shape_cast %44 : vector<256xi32> to vector<256x1xi32>
    %46 = vector.broadcast %45 : vector<256x1xi32> to vector<256x96xi32>
    %47 = arith.cmpi eq, %46, %1 : vector<256x96xi32>
    %48 = arith.ori %40, %47 : vector<256x96xi1>
    %49 = vector.extract_strided_slice %0 {offsets = [0, 6], sizes = [256, 1], strides = [1, 1]} : vector<256x16xi32> to vector<256x1xi32>
    %50 = vector.shape_cast %49 : vector<256x1xi32> to vector<256xi32>
    %c36_i32 = arith.constant 36 : i32
    %51 = vector.broadcast %c36_i32 : i32 to vector<256xi32>
    %52 = arith.addi %50, %51 : vector<256xi32>
    %53 = vector.shape_cast %52 : vector<256xi32> to vector<256x1xi32>
    %54 = vector.broadcast %53 : vector<256x1xi32> to vector<256x96xi32>
    %55 = arith.cmpi eq, %54, %1 : vector<256x96xi32>
    %56 = arith.ori %48, %55 : vector<256x96xi1>
    %57 = vector.extract_strided_slice %0 {offsets = [0, 7], sizes = [256, 1], strides = [1, 1]} : vector<256x16xi32> to vector<256x1xi32>
    %58 = vector.shape_cast %57 : vector<256x1xi32> to vector<256xi32>
    %c39_i32 = arith.constant 39 : i32
    %59 = vector.broadcast %c39_i32 : i32 to vector<256xi32>
    %60 = arith.addi %58, %59 : vector<256xi32>
    %61 = vector.shape_cast %60 : vector<256xi32> to vector<256x1xi32>
    %62 = vector.broadcast %61 : vector<256x1xi32> to vector<256x96xi32>
    %63 = arith.cmpi eq, %62, %1 : vector<256x96xi32>
    %64 = arith.ori %56, %63 : vector<256x96xi1>
    %65 = vector.extract_strided_slice %0 {offsets = [0, 8], sizes = [256, 1], strides = [1, 1]} : vector<256x16xi32> to vector<256x1xi32>
    %66 = vector.shape_cast %65 : vector<256x1xi32> to vector<256xi32>
    %c48_i32 = arith.constant 48 : i32
    %67 = vector.broadcast %c48_i32 : i32 to vector<256xi32>
    %68 = arith.addi %66, %67 : vector<256xi32>
    %69 = vector.shape_cast %68 : vector<256xi32> to vector<256x1xi32>
    %70 = vector.broadcast %69 : vector<256x1xi32> to vector<256x96xi32>
    %71 = arith.cmpi eq, %70, %1 : vector<256x96xi32>
    %72 = arith.ori %64, %71 : vector<256x96xi1>
    %73 = vector.extract_strided_slice %0 {offsets = [0, 9], sizes = [256, 1], strides = [1, 1]} : vector<256x16xi32> to vector<256x1xi32>
    %74 = vector.shape_cast %73 : vector<256x1xi32> to vector<256xi32>
    %c53_i32 = arith.constant 53 : i32
    %75 = vector.broadcast %c53_i32 : i32 to vector<256xi32>
    %76 = arith.addi %74, %75 : vector<256xi32>
    %77 = vector.shape_cast %76 : vector<256xi32> to vector<256x1xi32>
    %78 = vector.broadcast %77 : vector<256x1xi32> to vector<256x96xi32>
    %79 = arith.cmpi eq, %78, %1 : vector<256x96xi32>
    %80 = arith.ori %72, %79 : vector<256x96xi1>
    %81 = vector.extract_strided_slice %0 {offsets = [0, 10], sizes = [256, 1], strides = [1, 1]} : vector<256x16xi32> to vector<256x1xi32>
    %82 = vector.shape_cast %81 : vector<256x1xi32> to vector<256xi32>
    %c60_i32 = arith.constant 60 : i32
    %83 = vector.broadcast %c60_i32 : i32 to vector<256xi32>
    %84 = arith.addi %82, %83 : vector<256xi32>
    %85 = vector.shape_cast %84 : vector<256xi32> to vector<256x1xi32>
    %86 = vector.broadcast %85 : vector<256x1xi32> to vector<256x96xi32>
    %87 = arith.cmpi eq, %86, %1 : vector<256x96xi32>
    %88 = arith.ori %80, %87 : vector<256x96xi1>
    %89 = vector.extract_strided_slice %0 {offsets = [0, 11], sizes = [256, 1], strides = [1, 1]} : vector<256x16xi32> to vector<256x1xi32>
    %90 = vector.shape_cast %89 : vector<256x1xi32> to vector<256xi32>
    %c63_i32 = arith.constant 63 : i32
    %91 = vector.broadcast %c63_i32 : i32 to vector<256xi32>
    %92 = arith.addi %90, %91 : vector<256xi32>
    %93 = vector.shape_cast %92 : vector<256xi32> to vector<256x1xi32>
    %94 = vector.broadcast %93 : vector<256x1xi32> to vector<256x96xi32>
    %95 = arith.cmpi eq, %94, %1 : vector<256x96xi32>
    %96 = arith.ori %88, %95 : vector<256x96xi1>
    %97 = vector.extract_strided_slice %0 {offsets = [0, 12], sizes = [256, 1], strides = [1, 1]} : vector<256x16xi32> to vector<256x1xi32>
    %98 = vector.shape_cast %97 : vector<256x1xi32> to vector<256xi32>
    %c72_i32 = arith.constant 72 : i32
    %99 = vector.broadcast %c72_i32 : i32 to vector<256xi32>
    %100 = arith.addi %98, %99 : vector<256xi32>
    %101 = vector.shape_cast %100 : vector<256xi32> to vector<256x1xi32>
    %102 = vector.broadcast %101 : vector<256x1xi32> to vector<256x96xi32>
    %103 = arith.cmpi eq, %102, %1 : vector<256x96xi32>
    %104 = arith.ori %96, %103 : vector<256x96xi1>
    %105 = vector.extract_strided_slice %0 {offsets = [0, 13], sizes = [256, 1], strides = [1, 1]} : vector<256x16xi32> to vector<256x1xi32>
    %106 = vector.shape_cast %105 : vector<256x1xi32> to vector<256xi32>
    %c77_i32 = arith.constant 77 : i32
    %107 = vector.broadcast %c77_i32 : i32 to vector<256xi32>
    %108 = arith.addi %106, %107 : vector<256xi32>
    %109 = vector.shape_cast %108 : vector<256xi32> to vector<256x1xi32>
    %110 = vector.broadcast %109 : vector<256x1xi32> to vector<256x96xi32>
    %111 = arith.cmpi eq, %110, %1 : vector<256x96xi32>
    %112 = arith.ori %104, %111 : vector<256x96xi1>
    %113 = vector.extract_strided_slice %0 {offsets = [0, 14], sizes = [256, 1], strides = [1, 1]} : vector<256x16xi32> to vector<256x1xi32>
    %114 = vector.shape_cast %113 : vector<256x1xi32> to vector<256xi32>
    %c84_i32 = arith.constant 84 : i32
    %115 = vector.broadcast %c84_i32 : i32 to vector<256xi32>
    %116 = arith.addi %114, %115 : vector<256xi32>
    %117 = vector.shape_cast %116 : vector<256xi32> to vector<256x1xi32>
    %118 = vector.broadcast %117 : vector<256x1xi32> to vector<256x96xi32>
    %119 = arith.cmpi eq, %118, %1 : vector<256x96xi32>
    %120 = arith.ori %112, %119 : vector<256x96xi1>
    %121 = vector.extract_strided_slice %0 {offsets = [0, 15], sizes = [256, 1], strides = [1, 1]} : vector<256x16xi32> to vector<256x1xi32>
    %122 = vector.shape_cast %121 : vector<256x1xi32> to vector<256xi32>
    %c87_i32 = arith.constant 87 : i32
    %123 = vector.broadcast %c87_i32 : i32 to vector<256xi32>
    %124 = arith.addi %122, %123 : vector<256xi32>
    %125 = vector.shape_cast %124 : vector<256xi32> to vector<256x1xi32>
    %126 = vector.broadcast %125 : vector<256x1xi32> to vector<256x96xi32>
    %127 = arith.cmpi eq, %126, %1 : vector<256x96xi32>
    %128 = arith.ori %120, %127 : vector<256x96xi1>
    %129 = arith.extui %128 : vector<256x96xi1> to vector<256x96xi32>
    %130 = arith.sitofp %129 : vector<256x96xi32> to vector<256x96xf32>
    %c0_1 = arith.constant 0 : index
    %c0_2 = arith.constant 0 : index
    %131 = vector.load %arg2[%c0_1, %c0_2] : memref<96x128xf32, #tpu.memory_space<vmem>>, vector<96x128xf32>
    %cst = arith.constant dense<0.000000e+00> : vector<256x128xf32>
    %132 = tpu.matmul %130, %131, %cst {dimension_numbers = #tpu.dot_dimension_numbers<[1], [0], [0], [1], [0, 0, 1, 1], [], []>} : vector<256x96xf32>, vector<96x128xf32>, vector<256x128xf32> -> vector<256x128xf32>
    %c0_3 = arith.constant 0 : index
    %c0_4 = arith.constant 0 : index
    %133 = vector.load %arg3[%c0_3, %c0_4] : memref<256x128xf32, #tpu.memory_space<vmem>>, vector<256x128xf32>
    tpu.vector_store %arg3[%c0_3, %c0_4], %132 {strides = array<i32>} : memref<256x128xf32, #tpu.memory_space<vmem>>, vector<256x128xf32>,
    return
  }
  func.func @transform_0(%arg0: i32) -> (i32, i32) {
    %c0_i32 = arith.constant 0 : i32
    %c0_i32_0 = arith.constant 0 : i32
    return %arg0, %c0_i32 : i32, i32
  }
  func.func @transform_1(%arg0: i32) -> (i32, i32) {
    %c0_i32 = arith.constant 0 : i32
    %c0_i32_0 = arith.constant 0 : i32
    %c0_i32_1 = arith.constant 0 : i32
    return %c0_i32, %c0_i32_0 : i32, i32
  }
  func.func @transform_2(%arg0: i32) -> (i32, i32) {
    %c0_i32 = arith.constant 0 : i32
    %c0_i32_0 = arith.constant 0 : i32
    return %arg0, %c0_i32 : i32, i32
  }
}

</mosaic_0001>

<bundles_post_ra>
// kernel: encode.1
= control target key start
LH: loop header
LB: loop body
LE: loop exit
PB: predicated region body
PF: predicated region fallthrough
CT: control target
= control target key end

     0   :  { %s4101_s9 = smov 0   ;;  %s8918_s0 = inlined_call_operand.vmem [shape: s32[512,16], index: 0, kind: input, shape index: {}]   ;;  %s8919_s1 = inlined_call_operand.vmem [shape: f32[96,128], index: 1, kind: input, shape index: {}]   ;;  %s8920_s2 = inlined_call_operand.vmem [shape: f32[512,128], index: 2, kind: output, shape index: {}]  }
   0x1 LB: > { %s3675_s10 = sadd.s32 4294967295, %s4067_s9   ;;  %p3679_p0 = scmp.ge.s32.totalorder %s4067_s9, 1  ;;  %s4067_s9 = sphi %s4101_s9, %s12_s9  }
   0x2   : > { %p113_p1 = scmp.lt.s32.totalorder %s4067_s9, 3 }
   0x4   : > { %p114_p2 = pnand %p3679_p0, %p113_p1 }
   0x6   : > { %117 = sbr.rel (%p114_p2) target bundleno = 1664 (0x680), region = 28 }
   0xd   : > { %s3680_s11 = sshll.u32 %s3675_s10, 5  ;;  %v4069_v0 = vmov 0   ;;  %v4070_v35 = vmov 1  }
   0xe   : > { %3928 = vset.pattern.permute.xlu1 %v4069_v0  ;;  %3927 = vset.pattern.permute.xlu0 %v4069_v0  ;;  %p136_p3 = scmp.lt.s32.totalorder %s3680_s11, 63 }
  0x10   : > { %s10608_s11 = smov (!%p136_p3, %s3680_s11), 63 }
  0x11   : > { %s3681_s12 = sshll.u32 %s10608_s11, 3 }
  0x12   : > { %s4117_s15 = scalar_lea.vmem %s8918_s0, %s3681_s12  ;;  %s8881_s17 = scalar_lea.vmem %s8920_s2, %s3681_s12 }
  0x13   : > { %v4120_v1 = vld [vmem:[%s4117_s15 + $0x10] sm:$0xff]  ;;  %v4123_v2 = vld [vmem:[%s4117_s15] sm:$0xff]  ;;  %v4128_v3 = vld [vmem:[%s4117_s15 + $0x18] sm:$0xff] }
  0x14   : > { %188 = vperm.xlu1 %3928, %v4120_v1   ;;  %182 = vperm.xlu0 %3927, %v4123_v2   ;;  %v4131_v4 = vld [vmem:[%s4117_s15 + $0x8] sm:$0xff]  ;;  %v4139_v6 = vld [vmem:[%s4117_s15 + $0x20] sm:$0xff]  ;;  %v4144_v7 = vld [vmem:[%s4117_s15 + $0x38] sm:$0xff]  ;;  %v309_v34 = vadd.s32 5, %v4123_v2  ;;  %v311_v36 = vadd.s32 5, %v4120_v1  ;;  %v312_v37 = vadd.s32 5, %v4128_v3 }
  0x15   : > { %v4136_v5 = vld [vmem:[%s4117_s15 + $0x28] sm:$0xff]  ;;  %v4147_v8 = vld [vmem:[%s4117_s15 + $0x30] sm:$0xff]  ;;  %v4155_v10 = vld [vmem:[%s4117_s15 + $0x40] sm:$0xff]  ;;  %v310_v33 = vadd.s32 5, %v4131_v4  ;;  %v313_v38 = vadd.s32 5, %v4139_v6  ;;  %v316_v41 = vadd.s32 5, %v4144_v7 }
  0x16   : > { %v4152_v9 = vld [vmem:[%s4117_s15 + $0x48] sm:$0xff]  ;;  %v4160_v11 = vld [vmem:[%s4117_s15 + $0x58] sm:$0xff]  ;;  %v4163_v12 = vld [vmem:[%s4117_s15 + $0x50] sm:$0xff]  ;;  %v314_v39 = vadd.s32 5, %v4136_v5  ;;  %v315_v40 = vadd.s32 5, %v4147_v8  ;;  %v317_v42 = vadd.s32 5, %v4155_v10 }
  0x17   : > { %v4168_v13 = vld [vmem:[%s4117_s15 + $0x68] sm:$0xff]  ;;  %v4171_v14 = vld [vmem:[%s4117_s15 + $0x60] sm:$0xff]  ;;  %v4176_v15 = vld [vmem:[%s4117_s15 + $0x78] sm:$0xff]  ;;  %v318_v43 = vadd.s32 5, %v4152_v9  ;;  %v319_v44 = vadd.s32 5, %v4163_v12  ;;  %v320_v45 = vadd.s32 5, %v4160_v11 }
  0x18   : > { %191 = vperm.xlu1 %3928, %v4128_v3   ;;  %185 = vperm.xlu0 %3927, %v4131_v4   ;;  %v4179_v16 = vld [vmem:[%s4117_s15 + $0x70] sm:$0xff]  ;;  %v4184_v17 = vld [vmem:[%s4117_s15 + $0x88] sm:$0xff]  ;;  %v4187_v18 = vld [vmem:[%s4117_s15 + $0x80] sm:$0xff]  ;;  %v321_v46 = vadd.s32 5, %v4171_v14  ;;  %v322_v47 = vadd.s32 5, %v4168_v13  ;;  %v324_v49 = vadd.s32 5, %v4176_v15 }
  0x19   : > { %v4192_v19 = vld [vmem:[%s4117_s15 + $0x98] sm:$0xff]  ;;  %v4195_v20 = vld [vmem:[%s4117_s15 + $0x90] sm:$0xff]  ;;  %v4200_v21 = vld [vmem:[%s4117_s15 + $0xa8] sm:$0xff]  ;;  %v323_v48 = vadd.s32 5, %v4179_v16  ;;  %v325_v50 = vadd.s32 5, %v4187_v18  ;;  %v326_v51 = vadd.s32 5, %v4184_v17 }
  0x1a   : > { %v4203_v22 = vld [vmem:[%s4117_s15 + $0xa0] sm:$0xff]  ;;  %v4208_v23 = vld [vmem:[%s4117_s15 + $0xb8] sm:$0xff]  ;;  %v4211_v24 = vld [vmem:[%s4117_s15 + $0xb0] sm:$0xff]  ;;  %v327_v52 = vadd.s32 5, %v4195_v20  ;;  %v328_v53 = vadd.s32 5, %v4192_v19  ;;  %v330_v55 = vadd.s32 5, %v4200_v21 }
  0x1b   : > { %v4216_v25 = vld [vmem:[%s4117_s15 + $0xc8] sm:$0xff]  ;;  %v4219_v26 = vld [vmem:[%s4117_s15 + $0xc0] sm:$0xff]  ;;  %v4224_v27 = vld [vmem:[%s4117_s15 + $0xd8] sm:$0xff]  ;;  %v329_v54 = vadd.s32 5, %v4203_v22  ;;  %v331_v56 = vadd.s32 5, %v4211_v24  ;;  %v332_v57 = vadd.s32 5, %v4208_v23 }
  0x1c   : > { %197 = vperm.xlu1 %3928, %v4136_v5   ;;  %194 = vperm.xlu0 %3927, %v4139_v6   ;;  %v4227_v28 = vld [vmem:[%s4117_s15 + $0xd0] sm:$0xff]  ;;  %v4232_v29 = vld [vmem:[%s4117_s15 + $0xe8] sm:$0xff]  ;;  %v4235_v30 = vld [vmem:[%s4117_s15 + $0xe0] sm:$0xff]  ;;  %v333_v58 = vadd.s32 5, %v4219_v26  ;;  %v334_v59 = vadd.s32 5, %v4216_v25  ;;  %v336_v61 = vadd.s32 5, %v4224_v27 }
  0x1d   : > { %v4240_v31 = vld [vmem:[%s4117_s15 + $0xf8] sm:$0xff]  ;;  %v4243_v32 = vld [vmem:[%s4117_s15 + $0xf0] sm:$0xff]  ;;  %v335_v60 = vadd.s32 5, %v4227_v28  ;;  %v337_v62 = vadd.s32 5, %v4235_v30  ;;  %v338_v63 = vadd.s32 5, %v4232_v29 }
  0x1e   : > { %v339_v0 = vadd.s32 5, %v4243_v32 }
  0x20   : > { %203 = vperm.xlu1 %3928, %v4144_v7   ;;  %200 = vperm.xlu0 %3927, %v4147_v8  }
  0x24   : > { %209 = vperm.xlu1 %3928, %v4152_v9   ;;  %206 = vperm.xlu0 %3927, %v4155_v10  }
  0x28   : > { %215 = vperm.xlu1 %3928, %v4160_v11   ;;  %212 = vperm.xlu0 %3927, %v4163_v12  }
  0x2c   : > { %221 = vperm.xlu1 %3928, %v4168_v13   ;;  %218 = vperm.xlu0 %3927, %v4171_v14  }
  0x30   : > { %227 = vperm.xlu1 %3928, %v4176_v15   ;;  %224 = vperm.xlu0 %3927, %v4179_v16  }
  0x34   : > { %233 = vperm.xlu1 %3928, %v4184_v17   ;;  %230 = vperm.xlu0 %3927, %v4187_v18  }
  0x38   : > { %239 = vperm.xlu1 %3928, %v4192_v19   ;;  %236 = vperm.xlu0 %3927, %v4195_v20  }
  0x3c   : > { %245 = vperm.xlu1 %3928, %v4200_v21   ;;  %242 = vperm.xlu0 %3927, %v4203_v22  }
  0x40   : > { %251 = vperm.xlu1 %3928, %v4208_v23   ;;  %248 = vperm.xlu0 %3927, %v4211_v24  }
  0x44   : > { %257 = vperm.xlu1 %3928, %v4216_v25   ;;  %254 = vperm.xlu0 %3927, %v4219_v26  }
  0x48   : > { %263 = vperm.xlu1 %3928, %v4224_v27   ;;  %260 = vperm.xlu0 %3927, %v4227_v28  }
  0x4c   : > { %269 = vperm.xlu1 %3928, %v4232_v29   ;;  %266 = vperm.xlu0 %3927, %v4235_v30  }
  0x50   : > { %275 = vperm.xlu1 %3928, %v4240_v31   ;;  %272 = vperm.xlu0 %3927, %v4243_v32  }
  0x54   : > { %3930 = vset.pattern.permute.xlu1 %v4070_v35  ;;  %3929 = vset.pattern.permute.xlu0 %v4070_v35  ;;  %v502_v35 = vadd.s32 12, %v4131_v4 }
  0x55   : > { %345 = vperm.xlu1 %3930, %v310_v33   ;;  %342 = vperm.xlu0 %3929, %v309_v34   ;;  %v340_v33 = vadd.s32 5, %v4240_v31  ;;  %v501_v34 = vadd.s32 12, %v4123_v2 }
  0x59   : > { %348 = vperm.xlu1 %3930, %v311_v36   ;;  %351 = vperm.xlu0 %3929, %v312_v37  }
  0x5d   : > { %354 = vperm.xlu1 %3930, %v313_v38   ;;  %357 = vperm.xlu0 %3929, %v314_v39   ;;  %v4071_v38 = vmov 2   ;;  %v503_v39 = vadd.s32 12, %v4120_v1 }
  0x61   : > { %360 = vperm.xlu1 %3930, %v315_v40   ;;  %363 = vperm.xlu0 %3929, %v316_v41   ;;  %v505_v40 = vadd.s32 12, %v4139_v6 }
  0x65   : > { %366 = vperm.xlu1 %3930, %v317_v42   ;;  %369 = vperm.xlu0 %3929, %v318_v43   ;;  %v504_v43 = vadd.s32 12, %v4128_v3 }
  0x69   : > { %372 = vperm.xlu1 %3930, %v319_v44   ;;  %375 = vperm.xlu0 %3929, %v320_v45   ;;  %v507_v44 = vadd.s32 12, %v4147_v8 }
  0x6d   : > { %378 = vperm.xlu1 %3930, %v321_v46   ;;  %381 = vperm.xlu0 %3929, %v322_v47   ;;  %v506_v47 = vadd.s32 12, %v4136_v5 }
  0x71   : > { %384 = vperm.xlu1 %3930, %v323_v48   ;;  %387 = vperm.xlu0 %3929, %v324_v49   ;;  %v509_v48 = vadd.s32 12, %v4155_v10 }
  0x75   : > { %390 = vperm.xlu1 %3930, %v325_v50   ;;  %393 = vperm.xlu0 %3929, %v326_v51   ;;  %v508_v51 = vadd.s32 12, %v4144_v7 }
  0x79   : > { %396 = vperm.xlu1 %3930, %v327_v52   ;;  %399 = vperm.xlu0 %3929, %v328_v53   ;;  %v511_v52 = vadd.s32 12, %v4163_v12 }
  0x7d   : > { %402 = vperm.xlu1 %3930, %v329_v54   ;;  %405 = vperm.xlu0 %3929, %v330_v55   ;;  %v510_v55 = vadd.s32 12, %v4152_v9 }
  0x81   : > { %408 = vperm.xlu1 %3930, %v331_v56   ;;  %411 = vperm.xlu0 %3929, %v332_v57   ;;  %v513_v56 = vadd.s32 12, %v4171_v14 }
  0x85   : > { %414 = vperm.xlu1 %3930, %v333_v58   ;;  %417 = vperm.xlu0 %3929, %v334_v59   ;;  %v512_v59 = vadd.s32 12, %v4160_v11 }
  0x89   : > { %420 = vperm.xlu1 %3930, %v335_v60   ;;  %423 = vperm.xlu0 %3929, %v336_v61   ;;  %v515_v60 = vadd.s32 12, %v4179_v16 }
  0x8d   : > { %426 = vperm.xlu1 %3930, %v337_v62   ;;  %429 = vperm.xlu0 %3929, %v338_v63   ;;  %v514_v63 = vadd.s32 12, %v4168_v13 }
  0x91   : > { %432 = vperm.xlu1 %3930, %v339_v0   ;;  %435 = vperm.xlu0 %3929, %v340_v33   ;;  %v517_v0 = vadd.s32 12, %v4187_v18 }
  0x93   : > { %v4281_v36 = vpop.permute.xlu1 %188  ;;  %v4283_v37 = vpop.permute.xlu0 %182 }
  0x94   : > { %9047 = vst [vmem:[#allocation2_spill] sm:$0xff] %v4281_v36 }
  0x95   : > { %3931 = vset.pattern.permute.xlu1 %v4071_v38  ;;  %3932 = vset.pattern.permute.xlu0 %v4071_v38  ;;  %v519_v38 = vadd.s32 12, %v4195_v20 }
  0x96   : > { %534 = vperm.xlu1 %3931, %v501_v34   ;;  %537 = vperm.xlu0 %3932, %v502_v35   ;;  %v516_v35 = vadd.s32 12, %v4176_v15 }
  0x97   : > { %v4287_v41 = vpop.permute.xlu1 %191  ;;  %v4289_v42 = vpop.permute.xlu0 %185 }
  0x98   : > { %9048 = vst [vmem:[#allocation3_spill] sm:$0xff] %v4287_v41 }
  0x9a   : > { %540 = vperm.xlu1 %3931, %v503_v39   ;;  %546 = vperm.xlu0 %3932, %v505_v40  }
  0x9b   : > { %v4293_v45 = vpop.permute.xlu1 %197  ;;  %v4295_v46 = vpop.permute.xlu0 %194 }
  0x9c   : > { %9049 = vst [vmem:[#allocation4_spill] sm:$0xff] %v4293_v45  ;;  %9050 = vst [vmem:[#allocation5_spill] sm:$0xff] %v4295_v46 }
  0x9e   : > { %543 = vperm.xlu1 %3931, %v504_v43   ;;  %552 = vperm.xlu0 %3932, %v507_v44   ;;  %v518_v43 = vadd.s32 12, %v4184_v17  ;;  %v521_v44 = vadd.s32 12, %v4203_v22 }
  0x9f   : > { %v4299_v49 = vpop.permute.xlu1 %203  ;;  %v4301_v50 = vpop.permute.xlu0 %200 }
  0xa0   : > { %9051 = vst [vmem:[#allocation6_spill] sm:$0xff] %v4301_v50 }
  0xa2   : > { %549 = vperm.xlu1 %3931, %v506_v47   ;;  %558 = vperm.xlu0 %3932, %v509_v48  }
  0xa3   : > { %v4305_v53 = vpop.permute.xlu1 %209  ;;  %v4307_v54 = vpop.permute.xlu0 %206 }
  0xa4   : > { %9052 = vst [vmem:[#allocation7_spill] sm:$0xff] %v4305_v53  ;;  %9053 = vst [vmem:[#allocation8_spill] sm:$0xff] %v4307_v54  ;;  %v700_v53 = vadd.s32 15, %v4144_v7 }
  0xa6   : > { %555 = vperm.xlu1 %3931, %v508_v51   ;;  %564 = vperm.xlu0 %3932, %v511_v52   ;;  %v520_v51 = vadd.s32 12, %v4192_v19  ;;  %v523_v52 = vadd.s32 12, %v4211_v24 }
  0xa7   : > { %v4311_v57 = vpop.permute.xlu1 %215  ;;  %v4313_v58 = vpop.permute.xlu0 %212 }
  0xa8   : > { %9054 = vst [vmem:[#allocation9_spill] sm:$0xff] %v4313_v58 }
  0xaa   : > { %561 = vperm.xlu1 %3931, %v510_v55   ;;  %570 = vperm.xlu0 %3932, %v513_v56  }
  0xab   : > { %v4317_v61 = vpop.permute.xlu1 %221  ;;  %v4319_v62 = vpop.permute.xlu0 %218 }
  0xac   : > { %9055 = vst [vmem:[#allocation10_spill] sm:$0xff] %v4317_v61  ;;  %9056 = vst [vmem:[#allocation11_spill] sm:$0xff] %v4319_v62 }
  0xae   : > { %567 = vperm.xlu1 %3931, %v512_v59   ;;  %576 = vperm.xlu0 %3932, %v515_v60   ;;  %v522_v59 = vadd.s32 12, %v4200_v21  ;;  %v525_v60 = vadd.s32 12, %v4219_v26 }
  0xaf   : > { %v4323_v33 = vpop.permute.xlu1 %227  ;;  %v4325_v34 = vpop.permute.xlu0 %224 }
  0xb0   : > { %9057 = vst [vmem:[#allocation12_spill] sm:$0xff] %v4325_v34 }
  0xb2   : > { %573 = vperm.xlu1 %3931, %v514_v63   ;;  %582 = vperm.xlu0 %3932, %v517_v0  }
  0xb3   : > { %v4329_v39 = vpop.permute.xlu1 %233  ;;  %v4331_v40 = vpop.permute.xlu0 %230 }
  0xb6   : > { %579 = vperm.xlu1 %3931, %v516_v35   ;;  %588 = vperm.xlu0 %3932, %v519_v38   ;;  %v524_v35 = vadd.s32 12, %v4208_v23  ;;  %v527_v38 = vadd.s32 12, %v4227_v28 }
  0xb7   : > { %v4335_v47 = vpop.permute.xlu1 %239  ;;  %v4337_v48 = vpop.permute.xlu0 %236 }
  0xb8   : > { %9058 = vst [vmem:[#allocation13_spill] sm:$0xff] %v4335_v47  ;;  %9059 = vst [vmem:[#allocation14_spill] sm:$0xff] %v4337_v48 }
  0xba   : > { %585 = vperm.xlu1 %3931, %v518_v43   ;;  %594 = vperm.xlu0 %3932, %v521_v44  }
  0xbb   : > { %v4341_v55 = vpop.permute.xlu1 %245  ;;  %v4343_v56 = vpop.permute.xlu0 %242 }
  0xbc   : > { %9060 = vst [vmem:[#allocation15_spill] sm:$0xff] %v4341_v55 }
  0xbe   : > { %591 = vperm.xlu1 %3931, %v520_v51   ;;  %600 = vperm.xlu0 %3932, %v523_v52   ;;  %v526_v51 = vadd.s32 12, %v4216_v25  ;;  %v529_v52 = vadd.s32 12, %v4235_v30 }
  0xbf   : > { %v4347_v63 = vpop.permute.xlu1 %251  ;;  %v4349_v0 = vpop.permute.xlu0 %248 }
  0xc0   : > { %9061 = vst [vmem:[#allocation16_spill] sm:$0xff] %v4347_v63  ;;  %9062 = vst [vmem:[#allocation17_spill] sm:$0xff] %v4349_v0 }
  0xc2   : > { %597 = vperm.xlu1 %3931, %v522_v59   ;;  %606 = vperm.xlu0 %3932, %v525_v60   ;;  %v528_v59 = vadd.s32 12, %v4224_v27  ;;  %v531_v60 = vadd.s32 12, %v4243_v32 }
  0xc3   : > { %v4353_v43 = vpop.permute.xlu1 %257  ;;  %v4355_v44 = vpop.permute.xlu0 %254 }
  0xc4   : > { %9063 = vst [vmem:[#allocation18_spill] sm:$0xff] %v4353_v43 }
  0xc6   : > { %603 = vperm.xlu1 %3931, %v524_v35   ;;  %612 = vperm.xlu0 %3932, %v527_v38   ;;  %v530_v35 = vadd.s32 12, %v4232_v29 }
  0xc7   : > { %v4359_v34 = vpop.permute.xlu1 %263  ;;  %v4361_v61 = vpop.permute.xlu0 %260 }
  0xc8   : > { %9064 = vst [vmem:[#allocation19_spill] sm:$0xff] %v4359_v34  ;;  %9065 = vst [vmem:[#allocation20_spill] sm:$0xff] %v4361_v61  ;;  %v693_v61 = vadd.s32 15, %v4123_v2 }
  0xca   : > { %609 = vperm.xlu1 %3931, %v526_v51   ;;  %618 = vperm.xlu0 %3932, %v529_v52   ;;  %v4072_v51 = vmov 3   ;;  %v532_v52 = vadd.s32 12, %v4240_v31 }
  0xcb   : > { %v4365_v62 = vpop.permute.xlu1 %269  ;;  %v4367_v58 = vpop.permute.xlu0 %266 }
  0xcc   : > { %9066 = vst [vmem:[#allocation21_spill] sm:$0xff] %v4365_v62  ;;  %v696_v62 = vadd.s32 15, %v4128_v3 }
  0xce   : > { %615 = vperm.xlu1 %3931, %v528_v59   ;;  %624 = vperm.xlu0 %3932, %v531_v60   ;;  %v694_v60 = vadd.s32 15, %v4131_v4 }
  0xcf   : > { %v4370_v38 = vpop.permute.xlu1 %275  ;;  %v4372_v43 = vpop.permute.xlu0 %272 }
  0xd0   : > { %9067 = vst [vmem:[#allocation22_spill] sm:$0xff] %v4370_v38  ;;  %9068 = vst [vmem:[#allocation23_spill] sm:$0xff] %v4372_v43  ;;  %v698_v43 = vadd.s32 15, %v4136_v5 }
  0xd2   : > { %621 = vperm.xlu1 %3931, %v530_v35   ;;  %3933 = vset.pattern.permute.xlu0 %v4072_v51 }
  0xd3   : > { %726 = vperm.xlu0 %3933, %v693_v61   ;;  %v695_v61 = vadd.s32 15, %v4120_v1 }
  0xd4   : > { %v4377_v34 = vpop.permute.xlu1 %345  ;;  %v4379_v59 = vpop.permute.xlu0 %342 }
  0xd6   : > { %627 = vperm.xlu1 %3931, %v532_v52   ;;  %v702_v52 = vadd.s32 15, %v4152_v9 }
  0xd7   : > { %735 = vperm.xlu0 %3933, %v696_v62   ;;  %v697_v62 = vadd.s32 15, %v4139_v6 }
  0xd8   : > { %v4383_v38 = vpop.permute.xlu1 %348  ;;  %v4385_v35 = vpop.permute.xlu0 %351 }
  0xd9   : > { %9069 = vst [vmem:[#allocation24_spill] sm:$0xff] %v4383_v38  ;;  %9070 = vst [vmem:[#allocation25_spill] sm:$0xff] %v4385_v35 }
  0xda   : > { %3934 = vset.pattern.permute.xlu1 %v4072_v51  ;;  %v704_v51 = vadd.s32 15, %v4160_v11 }
  0xdb   : > { %729 = vperm.xlu1 %3934, %v694_v60   ;;  %741 = vperm.xlu0 %3933, %v698_v43   ;;  %v699_v43 = vadd.s32 15, %v4147_v8 }
  0xdc   : > { %v4389_v54 = vpop.permute.xlu1 %354  ;;  %v4391_v0 = vpop.permute.xlu0 %357 }
  0xdd   : > { %9071 = vst [vmem:[#allocation26_spill] sm:$0xff] %v4389_v54  ;;  %9072 = vst [vmem:[#allocation27_spill] sm:$0xff] %v4391_v0 }
  0xdf   : > { %732 = vperm.xlu1 %3934, %v695_v61   ;;  %747 = vperm.xlu0 %3933, %v700_v53   ;;  %v701_v53 = vadd.s32 15, %v4155_v10  ;;  %v706_v61 = vadd.s32 15, %v4168_v13 }
  0xe0   : > { %v4395_v63 = vpop.permute.xlu1 %360  ;;  %v4397_v50 = vpop.permute.xlu0 %363 }
  0xe1   : > { %9073 = vst [vmem:[#allocation28_spill] sm:$0xff] %v4395_v63 }
  0xe3   : > { %738 = vperm.xlu1 %3934, %v697_v62   ;;  %753 = vperm.xlu0 %3933, %v702_v52   ;;  %v703_v62 = vadd.s32 15, %v4163_v12  ;;  %v708_v52 = vadd.s32 15, %v4176_v15 }
  0xe4   : > { %v4401_v60 = vpop.permute.xlu1 %366  ;;  %v4403_v55 = vpop.permute.xlu0 %369 }
  0xe5   : > { %9074 = vst [vmem:[#allocation29_spill] sm:$0xff] %v4401_v60  ;;  %9075 = vst [vmem:[#allocation30_spill] sm:$0xff] %v4403_v55 }
  0xe7   : > { %744 = vperm.xlu1 %3934, %v699_v43   ;;  %759 = vperm.xlu0 %3933, %v704_v51   ;;  %v705_v43 = vadd.s32 15, %v4171_v14  ;;  %v710_v51 = vadd.s32 15, %v4184_v17 }
  0xe8   : > { %v4407_v54 = vpop.permute.xlu1 %372  ;;  %v4409_v63 = vpop.permute.xlu0 %375 }
  0xe9   : > { %9076 = vst [vmem:[#allocation31_spill] sm:$0xff] %v4407_v54 }
  0xeb   : > { %750 = vperm.xlu1 %3934, %v701_v53   ;;  %765 = vperm.xlu0 %3933, %v706_v61   ;;  %v707_v53 = vadd.s32 15, %v4179_v16  ;;  %v712_v61 = vadd.s32 15, %v4192_v19 }
  0xec   : > { %v4413_v46 = vpop.permute.xlu1 %378  ;;  %v4415_v60 = vpop.permute.xlu0 %381 }
  0xed   : > { %9077 = vst [vmem:[#allocation32_spill] sm:$0xff] %v4413_v46  ;;  %9078 = vst [vmem:[#allocation33_spill] sm:$0xff] %v4415_v60 }
  0xef   : > { %756 = vperm.xlu1 %3934, %v703_v62   ;;  %771 = vperm.xlu0 %3933, %v708_v52   ;;  %v709_v62 = vadd.s32 15, %v4187_v18  ;;  %v714_v52 = vadd.s32 15, %v4200_v21 }
  0xf0   : > { %v4419_v55 = vpop.permute.xlu1 %384  ;;  %v4421_v54 = vpop.permute.xlu0 %387 }
  0xf1   : > { %9079 = vst [vmem:[#allocation34_spill] sm:$0xff] %v4419_v55 }
  0xf3   : > { %762 = vperm.xlu1 %3934, %v705_v43   ;;  %777 = vperm.xlu0 %3933, %v710_v51   ;;  %v711_v43 = vadd.s32 15, %v4195_v20  ;;  %v716_v51 = vadd.s32 15, %v4208_v23 }
  0xf4   : > { %v4425_v0 = vpop.permute.xlu1 %390  ;;  %v4427_v46 = vpop.permute.xlu0 %393 }
  0xf7   : > { %768 = vperm.xlu1 %3934, %v707_v53   ;;  %783 = vperm.xlu0 %3933, %v712_v61   ;;  %v713_v53 = vadd.s32 15, %v4203_v22  ;;  %v718_v61 = vadd.s32 15, %v4216_v25 }
  0xf8   : > { %v4431_v60 = vpop.permute.xlu1 %396  ;;  %v4433_v55 = vpop.permute.xlu0 %399 }
  0xf9   : > { %9080 = vst [vmem:[#allocation35_spill] sm:$0xff] %v4431_v60  ;;  %9081 = vst [vmem:[#allocation36_spill] sm:$0xff] %v4433_v55 }
  0xfb   : > { %774 = vperm.xlu1 %3934, %v709_v62   ;;  %789 = vperm.xlu0 %3933, %v714_v52   ;;  %v715_v62 = vadd.s32 15, %v4211_v24  ;;  %v720_v52 = vadd.s32 15, %v4224_v27 }
  0xfc   : > { %v4437_v45 = vpop.permute.xlu1 %402  ;;  %v4439_v47 = vpop.permute.xlu0 %405 }
  0xfd   : > { %9082 = vst [vmem:[#allocation37_spill] sm:$0xff] %v4439_v47 }
  0xff   : > { %780 = vperm.xlu1 %3934, %v711_v43   ;;  %795 = vperm.xlu0 %3933, %v716_v51   ;;  %v717_v43 = vadd.s32 15, %v4219_v26  ;;  %v722_v51 = vadd.s32 15, %v4232_v29 }
 0x100   : > { %v4443_v41 = vpop.permute.xlu1 %408  ;;  %v4445_v36 = vpop.permute.xlu0 %411 }
 0x101   : > { %9083 = vst [vmem:[#allocation38_spill] sm:$0xff] %v4443_v41  ;;  %9084 = vst [vmem:[#allocation39_spill] sm:$0xff] %v4445_v36 }
 0x103   : > { %786 = vperm.xlu1 %3934, %v713_v53   ;;  %801 = vperm.xlu0 %3933, %v718_v61   ;;  %v719_v53 = vadd.s32 15, %v4227_v28  ;;  %v724_v61 = vadd.s32 15, %v4240_v31 }
 0x104   : > { %v4449_v55 = vpop.permute.xlu1 %414  ;;  %v4451_v60 = vpop.permute.xlu0 %417 }
 0x105   : > { %9085 = vst [vmem:[#allocation40_spill] sm:$0xff] %v4451_v60 }
 0x107   : > { %792 = vperm.xlu1 %3934, %v715_v62   ;;  %807 = vperm.xlu0 %3933, %v720_v52   ;;  %v721_v62 = vadd.s32 15, %v4235_v30 }
 0x108   : > { %v4455_v47 = vpop.permute.xlu1 %420  ;;  %v4457_v41 = vpop.permute.xlu0 %423 }
 0x109   : > { %9086 = vst [vmem:[#allocation41_spill] sm:$0xff] %v4455_v47  ;;  %9087 = vst [vmem:[#allocation42_spill] sm:$0xff] %v4457_v41  ;;  %v886_v47 = vadd.s32 24, %v4131_v4  ;;  %v889_v41 = vadd.s32 24, %v4139_v6 }
 0x10b   : > { %798 = vperm.xlu1 %3934, %v717_v43   ;;  %813 = vperm.xlu0 %3933, %v722_v51   ;;  %v4073_v43 = vmov 4   ;;  %v723_v51 = vadd.s32 15, %v4243_v32 }
 0x10c   : > { %v4461_v36 = vpop.permute.xlu1 %426  ;;  %v4463_v48 = vpop.permute.xlu0 %429 }
 0x10d   : > { %9088 = vst [vmem:[#allocation43_spill] sm:$0xff] %v4463_v48  ;;  %v893_v48 = vadd.s32 24, %v4155_v10 }
 0x10f   : > { %804 = vperm.xlu1 %3934, %v719_v53   ;;  %819 = vperm.xlu0 %3933, %v724_v61   ;;  %v885_v61 = vadd.s32 24, %v4123_v2 }
 0x110   : > { %v4466_v52 = vpop.permute.xlu1 %432  ;;  %v4468_v60 = vpop.permute.xlu0 %435 }
 0x111   : > { %9089 = vst [vmem:[#allocation44_spill] sm:$0xff] %v4466_v52  ;;  %9090 = vst [vmem:[#allocation45_spill] sm:$0xff] %v4468_v60  ;;  %v891_v52 = vadd.s32 24, %v4147_v8 }
 0x113   : > { %810 = vperm.xlu1 %3934, %v721_v62   ;;  %3936 = vset.pattern.permute.xlu0 %v4073_v43 }
 0x114   : > { %921 = vperm.xlu0 %3936, %v886_v47   ;;  %v887_v47 = vadd.s32 24, %v4120_v1 }
 0x115   : > { %v4473_v35 = vpop.permute.xlu1 %534  ;;  %v4475_v53 = vpop.permute.xlu0 %537 }
 0x116   : > { %9091 = vst [vmem:[#allocation46_spill] sm:$0xff] %v4473_v35  ;;  %9092 = vst [vmem:[#allocation47_spill] sm:$0xff] %v4475_v53 }
 0x117   : > { %816 = vperm.xlu1 %3934, %v723_v51   ;;  %v895_v51 = vadd.s32 24, %v4163_v12 }
 0x118   : > { %930 = vperm.xlu0 %3936, %v889_v41   ;;  %v888_v41 = vadd.s32 24, %v4128_v3 }
 0x119   : > { %v4479_v60 = vpop.permute.xlu1 %540  ;;  %v4481_v62 = vpop.permute.xlu0 %546 }
 0x11a   : > { %9093 = vst [vmem:[#allocation48_spill] sm:$0xff] %v4479_v60  ;;  %9094 = vst [vmem:[#allocation49_spill] sm:$0xff] %v4481_v62 }
 0x11b   : > { %3935 = vset.pattern.permute.xlu1 %v4073_v43  ;;  %v897_v43 = vadd.s32 24, %v4171_v14 }
 0x11c   : > { %918 = vperm.xlu1 %3935, %v885_v61   ;;  %936 = vperm.xlu0 %3936, %v891_v52   ;;  %v890_v52 = vadd.s32 24, %v4136_v5 }
 0x11d   : > { %v4485_v38 = vpop.permute.xlu1 %543  ;;  %v4487_v53 = vpop.permute.xlu0 %552 }
 0x11e   : > { %9095 = vst [vmem:[#allocation50_spill] sm:$0xff] %v4485_v38  ;;  %9096 = vst [vmem:[#allocation51_spill] sm:$0xff] %v4487_v53 }
 0x120   : > { %924 = vperm.xlu1 %3935, %v887_v47   ;;  %942 = vperm.xlu0 %3936, %v893_v48   ;;  %v892_v48 = vadd.s32 24, %v4144_v7  ;;  %v899_v47 = vadd.s32 24, %v4179_v16 }
 0x121   : > { %v4491_v60 = vpop.permute.xlu1 %549  ;;  %v4493_v62 = vpop.permute.xlu0 %558 }
 0x122   : > { %9097 = vst [vmem:[#allocation52_spill] sm:$0xff] %v4491_v60  ;;  %9098 = vst [vmem:[#allocation53_spill] sm:$0xff] %v4493_v62 }
 0x124   : > { %927 = vperm.xlu1 %3935, %v888_v41   ;;  %948 = vperm.xlu0 %3936, %v895_v51   ;;  %v894_v41 = vadd.s32 24, %v4152_v9  ;;  %v901_v51 = vadd.s32 24, %v4187_v18 }
 0x125   : > { %v4497_v61 = vpop.permute.xlu1 %555  ;;  %v4499_v38 = vpop.permute.xlu0 %564 }
 0x126   : > { %9099 = vst [vmem:[#allocation54_spill] sm:$0xff] %v4497_v61  ;;  %9100 = vst [vmem:[#allocation55_spill] sm:$0xff] %v4499_v38 }
 0x128   : > { %933 = vperm.xlu1 %3935, %v890_v52   ;;  %954 = vperm.xlu0 %3936, %v897_v43   ;;  %v896_v52 = vadd.s32 24, %v4160_v11  ;;  %v903_v43 = vadd.s32 24, %v4195_v20 }
 0x129   : > { %v4503_v53 = vpop.permute.xlu1 %561  ;;  %v4505_v60 = vpop.permute.xlu0 %570 }
 0x12a   : > { %9101 = vst [vmem:[#allocation56_spill] sm:$0xff] %v4503_v53  ;;  %9102 = vst [vmem:[#allocation57_spill] sm:$0xff] %v4505_v60 }
 0x12c   : > { %939 = vperm.xlu1 %3935, %v892_v48   ;;  %960 = vperm.xlu0 %3936, %v899_v47   ;;  %v898_v48 = vadd.s32 24, %v4168_v13  ;;  %v905_v47 = vadd.s32 24, %v4203_v22 }
 0x12d   : > { %v4509_v62 = vpop.permute.xlu1 %567  ;;  %v4511_v61 = vpop.permute.xlu0 %576 }
 0x12e   : > { %9103 = vst [vmem:[#allocation58_spill] sm:$0xff] %v4509_v62  ;;  %9104 = vst [vmem:[#allocation59_spill] sm:$0xff] %v4511_v61 }
 0x130   : > { %945 = vperm.xlu1 %3935, %v894_v41   ;;  %966 = vperm.xlu0 %3936, %v901_v51   ;;  %v900_v41 = vadd.s32 24, %v4176_v15  ;;  %v907_v51 = vadd.s32 24, %v4211_v24 }
 0x131   : > { %v4515_v38 = vpop.permute.xlu1 %573  ;;  %v4517_v53 = vpop.permute.xlu0 %582 }
 0x132   : > { %9105 = vst [vmem:[#allocation60_spill] sm:$0xff] %v4515_v38  ;;  %9106 = vst [vmem:[#allocation61_spill] sm:$0xff] %v4517_v53 }
 0x134   : > { %951 = vperm.xlu1 %3935, %v896_v52   ;;  %972 = vperm.xlu0 %3936, %v903_v43   ;;  %v902_v52 = vadd.s32 24, %v4184_v17  ;;  %v909_v43 = vadd.s32 24, %v4219_v26 }
 0x135   : > { %v4521_v60 = vpop.permute.xlu1 %579  ;;  %v4523_v62 = vpop.permute.xlu0 %588 }
 0x136   : > { %9107 = vst [vmem:[#allocation62_spill] sm:$0xff] %v4521_v60  ;;  %9108 = vst [vmem:[#allocation63_spill] sm:$0xff] %v4523_v62 }
 0x138   : > { %957 = vperm.xlu1 %3935, %v898_v48   ;;  %978 = vperm.xlu0 %3936, %v905_v47   ;;  %v904_v48 = vadd.s32 24, %v4192_v19  ;;  %v911_v47 = vadd.s32 24, %v4227_v28 }
 0x139   : > { %v4527_v61 = vpop.permute.xlu1 %585  ;;  %v4529_v38 = vpop.permute.xlu0 %594 }
 0x13a   : > { %9109 = vst [vmem:[#allocation64_spill] sm:$0xff] %v4527_v61  ;;  %9110 = vst [vmem:[#allocation65_spill] sm:$0xff] %v4529_v38 }
 0x13c   : > { %963 = vperm.xlu1 %3935, %v900_v41   ;;  %984 = vperm.xlu0 %3936, %v907_v51   ;;  %v906_v41 = vadd.s32 24, %v4200_v21  ;;  %v913_v51 = vadd.s32 24, %v4235_v30 }
 0x13d   : > { %v4533_v53 = vpop.permute.xlu1 %591  ;;  %v4535_v60 = vpop.permute.xlu0 %600 }
 0x13e   : > { %9111 = vst [vmem:[#allocation66_spill] sm:$0xff] %v4533_v53  ;;  %9112 = vst [vmem:[#allocation67_spill] sm:$0xff] %v4535_v60 }
 0x140   : > { %969 = vperm.xlu1 %3935, %v902_v52   ;;  %990 = vperm.xlu0 %3936, %v909_v43   ;;  %v908_v52 = vadd.s32 24, %v4208_v23  ;;  %v915_v43 = vadd.s32 24, %v4243_v32 }
 0x141   : > { %v4539_v62 = vpop.permute.xlu1 %597  ;;  %v4541_v61 = vpop.permute.xlu0 %606 }
 0x142   : > { %9113 = vst [vmem:[#allocation68_spill] sm:$0xff] %v4539_v62  ;;  %9114 = vst [vmem:[#allocation69_spill] sm:$0xff] %v4541_v61 }
 0x144   : > { %975 = vperm.xlu1 %3935, %v904_v48   ;;  %996 = vperm.xlu0 %3936, %v911_v47   ;;  %v910_v48 = vadd.s32 24, %v4216_v25 }
 0x145   : > { %v4545_v38 = vpop.permute.xlu1 %603  ;;  %v4547_v53 = vpop.permute.xlu0 %612 }
 0x146   : > { %9115 = vst [vmem:[#allocation70_spill] sm:$0xff] %v4545_v38  ;;  %9116 = vst [vmem:[#allocation71_spill] sm:$0xff] %v4547_v53  ;;  %v1077_v53 = vadd.s32 29, %v4123_v2  ;;  %v1082_v2 = vadd.s32 29, %v4136_v5 }
 0x148   : > { %981 = vperm.xlu1 %3935, %v906_v41   ;;  %1002 = vperm.xlu0 %3936, %v913_v51   ;;  %v4074_v41 = vmov 5   ;;  %v912_v51 = vadd.s32 24, %v4224_v27 }
 0x149   : > { %v4551_v60 = vpop.permute.xlu1 %609  ;;  %v4553_v62 = vpop.permute.xlu0 %618 }
 0x14a   : > { %9117 = vst [vmem:[#allocation72_spill] sm:$0xff] %v4551_v60  ;;  %9118 = vst [vmem:[#allocation73_spill] sm:$0xff] %v4553_v62  ;;  %v1080_v60 = vadd.s32 29, %v4128_v3 }
 0x14c   : > { %987 = vperm.xlu1 %3935, %v908_v52   ;;  %1008 = vperm.xlu0 %3936, %v915_v43   ;;  %v914_v43 = vadd.s32 24, %v4232_v29 }
 0x14d   : > { %v4556_v47 = vpop.permute.xlu1 %615  ;;  %v4558_v61 = vpop.permute.xlu0 %624 }
 0x14e   : > { %9119 = vst [vmem:[#allocation74_spill] sm:$0xff] %v4556_v47  ;;  %9120 = vst [vmem:[#allocation75_spill] sm:$0xff] %v4558_v61  ;;  %v916_v61 = vadd.s32 24, %v4240_v31 }
 0x150   : > { %993 = vperm.xlu1 %3935, %v910_v48   ;;  %3937 = vset.pattern.permute.xlu0 %v4074_v41 }
 0x151   : > { %v4562_v38 = vpop.permute.xlu1 %621  ;;  %1110 = vperm.xlu0 %3937, %v1077_v53   ;;  %v1084_v53 = vadd.s32 29, %v4144_v7  ;;  %v1088_v7 = vadd.s32 29, %v4160_v11  ;;  %v1092_v11 = vadd.s32 29, %v4176_v15  ;;  %v1096_v15 = vadd.s32 29, %v4192_v19 }
 0x152   : > { %9121 = vst [vmem:[#allocation76_spill] sm:$0xff] %v4562_v38  ;;  %v4565_v52 = vpop.permute.xlu0 %726  ;;  %v1100_v19 = vadd.s32 29, %v4208_v23  ;;  %v1104_v23 = vadd.s32 29, %v4224_v27  ;;  %v1108_v27 = vadd.s32 29, %v4240_v31  ;;  %v4075_v31 = vmov 6  }
 0x153   : > { %9122 = vst [vmem:[#allocation77_spill] sm:$0xff] %v4565_v52  ;;  %v4865_v52 = vld [vmem:[%s4117_s15 + $0xf8] sm:$0xff] }
 0x154   : > { %999 = vperm.xlu1 %3935, %v912_v51   ;;  %v1078_v51 = vadd.s32 29, %v4131_v4  ;;  %v1081_v4 = vadd.s32 29, %v4139_v6  ;;  %v1085_v6 = vadd.s32 29, %v4155_v10  ;;  %v1089_v10 = vadd.s32 29, %v4171_v14 }
 0x155   : > { %v4568_v47 = vpop.permute.xlu1 %627  ;;  %1119 = vperm.xlu0 %3937, %v1080_v60   ;;  %v1086_v60 = vadd.s32 29, %v4152_v9  ;;  %v1090_v9 = vadd.s32 29, %v4168_v13  ;;  %v1094_v13 = vadd.s32 29, %v4184_v17  ;;  %v1098_v17 = vadd.s32 29, %v4200_v21 }
 0x156   : > { %9123 = vst [vmem:[#allocation78_spill] sm:$0xff] %v4568_v47  ;;  %v4571_v48 = vpop.permute.xlu0 %735  ;;  %v1093_v14 = vadd.s32 29, %v4187_v18  ;;  %v1102_v21 = vadd.s32 29, %v4216_v25  ;;  %v1097_v18 = vadd.s32 29, %v4203_v22  ;;  %v1106_v25 = vadd.s32 29, %v4232_v29 }
 0x157   : > { %9124 = vst [vmem:[#allocation79_spill] sm:$0xff] %v4571_v48  ;;  %v1101_v22 = vadd.s32 29, %v4219_v26 }
 0x158   : > { %1005 = vperm.xlu1 %3935, %v914_v43   ;;  %v1079_v43 = vadd.s32 29, %v4120_v1  ;;  %v1083_v1 = vadd.s32 29, %v4147_v8  ;;  %v1087_v8 = vadd.s32 29, %v4163_v12  ;;  %v1091_v12 = vadd.s32 29, %v4179_v16 }
 0x159   : > { %1125 = vperm.xlu0 %3937, %v1082_v2   ;;  %v1095_v16 = vadd.s32 29, %v4195_v20  ;;  %v1099_v20 = vadd.s32 29, %v4211_v24 }
 0x15a   : > { %v4575_v38 = vpop.permute.xlu1 %729  ;;  %v4577_v3 = vpop.permute.xlu0 %741 }
 0x15b   : > { %9125 = vst [vmem:[#allocation80_spill] sm:$0xff] %v4575_v38  ;;  %9126 = vst [vmem:[#allocation81_spill] sm:$0xff] %v4577_v3 }
 0x15c   : > { %1011 = vperm.xlu1 %3935, %v916_v61  }
 0x15d   : > { %1131 = vperm.xlu0 %3937, %v1084_v53  }
 0x15e   : > { %v4581_v47 = vpop.permute.xlu1 %732  ;;  %v4583_v5 = vpop.permute.xlu0 %747 }
 0x15f   : > { %9127 = vst [vmem:[#allocation82_spill] sm:$0xff] %v4581_v47  ;;  %9128 = vst [vmem:[#allocation83_spill] sm:$0xff] %v4583_v5  ;;  %v4772_v47 = vld [vmem:[%s4117_s15 + $0x68] sm:$0xff] }
 0x160   : > { %3938 = vset.pattern.permute.xlu1 %v4074_v41 }
 0x161   : > { %1113 = vperm.xlu1 %3938, %v1078_v51   ;;  %1137 = vperm.xlu0 %3937, %v1086_v60  }
 0x162   : > { %v4587_v2 = vpop.permute.xlu1 %738  ;;  %v4589_v3 = vpop.permute.xlu0 %753 }
 0x163   : > { %9129 = vst [vmem:[#allocation84_spill] sm:$0xff] %v4587_v2  ;;  %9130 = vst [vmem:[#allocation85_spill] sm:$0xff] %v4589_v3 }
 0x165   : > { %1116 = vperm.xlu1 %3938, %v1079_v43   ;;  %1143 = vperm.xlu0 %3937, %v1088_v7  }
 0x166   : > { %v4593_v61 = vpop.permute.xlu1 %744  ;;  %v4595_v53 = vpop.permute.xlu0 %759 }
 0x167   : > { %9131 = vst [vmem:[#allocation86_spill] sm:$0xff] %v4593_v61  ;;  %9132 = vst [vmem:[#allocation87_spill] sm:$0xff] %v4595_v53  ;;  %v4736_v61 = vld [vmem:[%s4117_s15 + $0x38] sm:$0xff] }
 0x169   : > { %1122 = vperm.xlu1 %3938, %v1081_v4   ;;  %1149 = vperm.xlu0 %3937, %v1090_v9  }
 0x16a   : > { %v4599_v41 = vpop.permute.xlu1 %750  ;;  %v4601_v51 = vpop.permute.xlu0 %765 }
 0x16b   : > { %9133 = vst [vmem:[#allocation88_spill] sm:$0xff] %v4599_v41  ;;  %9134 = vst [vmem:[#allocation89_spill] sm:$0xff] %v4601_v51 }
 0x16d   : > { %1128 = vperm.xlu1 %3938, %v1083_v1   ;;  %1155 = vperm.xlu0 %3937, %v1092_v11  }
 0x16e   : > { %v4605_v60 = vpop.permute.xlu1 %756  ;;  %v4607_v43 = vpop.permute.xlu0 %771 }
 0x16f   : > { %9135 = vst [vmem:[#allocation90_spill] sm:$0xff] %v4605_v60  ;;  %9136 = vst [vmem:[#allocation91_spill] sm:$0xff] %v4607_v43 }
 0x171   : > { %1134 = vperm.xlu1 %3938, %v1085_v6   ;;  %1161 = vperm.xlu0 %3937, %v1094_v13  }
 0x172   : > { %v4611_v7 = vpop.permute.xlu1 %762  ;;  %v4613_v4 = vpop.permute.xlu0 %777 }
 0x173   : > { %9137 = vst [vmem:[#allocation92_spill] sm:$0xff] %v4611_v7  ;;  %9138 = vst [vmem:[#allocation93_spill] sm:$0xff] %v4613_v4 }
 0x175   : > { %1140 = vperm.xlu1 %3938, %v1087_v8   ;;  %1167 = vperm.xlu0 %3937, %v1096_v15  }
 0x176   : > { %v4617_v9 = vpop.permute.xlu1 %768  ;;  %v4619_v1 = vpop.permute.xlu0 %783 }
 0x177   : > { %9139 = vst [vmem:[#allocation94_spill] sm:$0xff] %v4617_v9  ;;  %9140 = vst [vmem:[#allocation95_spill] sm:$0xff] %v4619_v1 }
 0x179   : > { %1146 = vperm.xlu1 %3938, %v1089_v10   ;;  %1173 = vperm.xlu0 %3937, %v1098_v17  }
 0x17a   : > { %v4623_v11 = vpop.permute.xlu1 %774  ;;  %v4625_v6 = vpop.permute.xlu0 %789 }
 0x17b   : > { %9141 = vst [vmem:[#allocation96_spill] sm:$0xff] %v4623_v11  ;;  %9142 = vst [vmem:[#allocation97_spill] sm:$0xff] %v4625_v6  ;;  %v4748_v6 = vld [vmem:[%s4117_s15 + $0x48] sm:$0xff] }
 0x17d   : > { %1152 = vperm.xlu1 %3938, %v1091_v12   ;;  %1179 = vperm.xlu0 %3937, %v1100_v19  }
 0x17e   : > { %v4629_v13 = vpop.permute.xlu1 %780  ;;  %v4631_v8 = vpop.permute.xlu0 %795 }
 0x17f   : > { %9143 = vst [vmem:[#allocation98_spill] sm:$0xff] %v4629_v13  ;;  %9144 = vst [vmem:[#allocation99_spill] sm:$0xff] %v4631_v8 }
 0x181   : > { %1158 = vperm.xlu1 %3938, %v1093_v14   ;;  %1185 = vperm.xlu0 %3937, %v1102_v21  }
 0x182   : > { %v4635_v15 = vpop.permute.xlu1 %786  ;;  %v4637_v10 = vpop.permute.xlu0 %801 }
 0x183   : > { %9145 = vst [vmem:[#allocation100_spill] sm:$0xff] %v4635_v15  ;;  %9146 = vst [vmem:[#allocation101_spill] sm:$0xff] %v4637_v10  ;;  %v4076_v15 = vmov 7  }
 0x185   : > { %1164 = vperm.xlu1 %3938, %v1095_v16   ;;  %1191 = vperm.xlu0 %3937, %v1104_v23   ;;  %v4657_v16 = vld [vmem:[%s4117_s15 + $0x8] sm:$0xff]  ;;  %v1103_v23 = vadd.s32 29, %v4227_v28 }
 0x186   : > { %v4641_v17 = vpop.permute.xlu1 %792  ;;  %v4643_v12 = vpop.permute.xlu0 %807  ;;  %v1270_v24 = vadd.s32 36, %v4657_v16 }
 0x187   : > { %9147 = vst [vmem:[#allocation102_spill] sm:$0xff] %v4641_v17  ;;  %9148 = vst [vmem:[#allocation103_spill] sm:$0xff] %v4643_v12 }
 0x189   : > { %1170 = vperm.xlu1 %3938, %v1097_v18   ;;  %1197 = vperm.xlu0 %3937, %v1106_v25   ;;  %v4664_v25 = vld [vmem:[%s4117_s15 + $0x20] sm:$0xff] }
 0x18a   : > { %v4647_v19 = vpop.permute.xlu1 %798  ;;  %v4649_v14 = vpop.permute.xlu0 %813  ;;  %v1273_v26 = vadd.s32 36, %v4664_v25 }
 0x18b   : > { %9149 = vst [vmem:[#allocation104_spill] sm:$0xff] %v4647_v19  ;;  %9150 = vst [vmem:[#allocation105_spill] sm:$0xff] %v4649_v14  ;;  %v4680_v14 = vld [vmem:[%s4117_s15 + $0x40] sm:$0xff] }
 0x18d   : > { %1176 = vperm.xlu1 %3938, %v1099_v20   ;;  %1203 = vperm.xlu0 %3937, %v1108_v27   ;;  %v1105_v27 = vadd.s32 29, %v4235_v30 }
 0x18e   : > { %v4652_v29 = vpop.permute.xlu1 %804  ;;  %v4654_v21 = vpop.permute.xlu0 %819 }
 0x18f   : > { %9151 = vst [vmem:[#allocation106_spill] sm:$0xff] %v4652_v29  ;;  %9152 = vst [vmem:[#allocation107_spill] sm:$0xff] %v4654_v21  ;;  %v4700_v29 = vld [vmem:[%s4117_s15 + $0x10] sm:$0xff] }
 0x191   : > { %1182 = vperm.xlu1 %3938, %v1101_v22   ;;  %3940 = vset.pattern.permute.xlu0 %v4075_v31  ;;  %v4673_v22 = vld [vmem:[%s4117_s15 + $0x30] sm:$0xff] }
 0x192   : > { %v4661_v18 = vpop.permute.xlu1 %810  ;;  %1305 = vperm.xlu0 %3940, %v1270_v24   ;;  %v1275_v28 = vadd.s32 36, %v4673_v22  ;;  %v1107_v24 = vadd.s32 29, %v4243_v32 }
 0x193   : > { %9153 = vst [vmem:[#allocation108_spill] sm:$0xff] %v4661_v18  ;;  %v4667_v20 = vpop.permute.xlu0 %921 }
 0x194   : > { %9154 = vst [vmem:[#allocation109_spill] sm:$0xff] %v4667_v20 }
 0x195   : > { %1188 = vperm.xlu1 %3938, %v1103_v23   ;;  %v1277_v23 = vadd.s32 36, %v4680_v14 }
 0x196   : > { %v4670_v21 = vpop.permute.xlu1 %816  ;;  %1314 = vperm.xlu0 %3940, %v1273_v26   ;;  %v4688_v26 = vld [vmem:[%s4117_s15] sm:$0xff] }
 0x197   : > { %9155 = vst [vmem:[#allocation110_spill] sm:$0xff] %v4670_v21  ;;  %v4676_v9 = vpop.permute.xlu0 %930  ;;  %v1269_v7 = vadd.s32 36, %v4688_v26  ;;  %v1461_v11 = vadd.s32 39, %v4688_v26 }
 0x198   : > { %9156 = vst [vmem:[#allocation111_spill] sm:$0xff] %v4676_v9 }
 0x199   : > { %1194 = vperm.xlu1 %3938, %v1105_v27   ;;  %v4692_v27 = vld [vmem:[%s4117_s15 + $0x50] sm:$0xff] }
 0x19a   : > { %1320 = vperm.xlu0 %3940, %v1275_v28   ;;  %v1279_v32 = vadd.s32 36, %v4692_v27 }
 0x19b   : > { %v4683_v30 = vpop.permute.xlu1 %918  ;;  %v4685_v21 = vpop.permute.xlu0 %936 }
 0x19c   : > { %9157 = vst [vmem:[#allocation112_spill] sm:$0xff] %v4683_v30  ;;  %9158 = vst [vmem:[#allocation113_spill] sm:$0xff] %v4685_v21  ;;  %v4724_v21 = vld [vmem:[%s4117_s15 + $0x28] sm:$0xff] }
 0x19d   : > { %1200 = vperm.xlu1 %3938, %v1107_v24   ;;  %v1271_v24 = vadd.s32 36, %v4700_v29  ;;  %v1466_v43 = vadd.s32 39, %v4724_v21 }
 0x19e   : > { %1326 = vperm.xlu0 %3940, %v1277_v23   ;;  %v4704_v23 = vld [vmem:[%s4117_s15 + $0x60] sm:$0xff] }
 0x19f   : > { %v4695_v28 = vpop.permute.xlu1 %924  ;;  %v4697_v51 = vpop.permute.xlu0 %942  ;;  %v1281_v12 = vadd.s32 36, %v4704_v23 }
 0x1a0   : > { %9159 = vst [vmem:[#allocation114_spill] sm:$0xff] %v4695_v28  ;;  %9160 = vst [vmem:[#allocation115_spill] sm:$0xff] %v4697_v51  ;;  %v4712_v51 = vld [vmem:[%s4117_s15 + $0x18] sm:$0xff] }
 0x1a1   : > { %3939 = vset.pattern.permute.xlu1 %v4075_v31  ;;  %v4716_v31 = vld [vmem:[%s4117_s15 + $0x70] sm:$0xff] }
 0x1a2   : > { %1302 = vperm.xlu1 %3939, %v1269_v7   ;;  %1332 = vperm.xlu0 %3940, %v1279_v32   ;;  %v1272_v7 = vadd.s32 36, %v4712_v51  ;;  %v1283_v32 = vadd.s32 36, %v4716_v31 }
 0x1a3   : > { %v4707_v60 = vpop.permute.xlu1 %927  ;;  %v4709_v10 = vpop.permute.xlu0 %948 }
 0x1a4   : > { %9161 = vst [vmem:[#allocation116_spill] sm:$0xff] %v4707_v60  ;;  %9162 = vst [vmem:[#allocation117_spill] sm:$0xff] %v4709_v10 }
 0x1a6   : > { %1308 = vperm.xlu1 %3939, %v1271_v24   ;;  %1338 = vperm.xlu0 %3940, %v1281_v12   ;;  %v1274_v12 = vadd.s32 36, %v4724_v21  ;;  %v4728_v24 = vld [vmem:[%s4117_s15 + $0x80] sm:$0xff] }
 0x1a7   : > { %v4719_v41 = vpop.permute.xlu1 %933  ;;  %v4721_v3 = vpop.permute.xlu0 %954  ;;  %v1285_v10 = vadd.s32 36, %v4728_v24 }
 0x1a8   : > { %9163 = vst [vmem:[#allocation118_spill] sm:$0xff] %v4719_v41  ;;  %9164 = vst [vmem:[#allocation119_spill] sm:$0xff] %v4721_v3 }
 0x1aa   : > { %1311 = vperm.xlu1 %3939, %v1272_v7   ;;  %1344 = vperm.xlu0 %3940, %v1283_v32   ;;  %v1276_v7 = vadd.s32 36, %v4736_v61  ;;  %v4740_v32 = vld [vmem:[%s4117_s15 + $0x90] sm:$0xff] }
 0x1ab   : > { %v4731_v17 = vpop.permute.xlu1 %939  ;;  %v4733_v8 = vpop.permute.xlu0 %960  ;;  %v1287_v3 = vadd.s32 36, %v4740_v32 }
 0x1ac   : > { %9165 = vst [vmem:[#allocation120_spill] sm:$0xff] %v4731_v17  ;;  %9166 = vst [vmem:[#allocation121_spill] sm:$0xff] %v4733_v8 }
 0x1ae   : > { %1317 = vperm.xlu1 %3939, %v1274_v12   ;;  %1350 = vperm.xlu0 %3940, %v1285_v10   ;;  %v1278_v10 = vadd.s32 36, %v4748_v6  ;;  %v4752_v12 = vld [vmem:[%s4117_s15 + $0xa0] sm:$0xff] }
 0x1af   : > { %v4743_v9 = vpop.permute.xlu1 %945  ;;  %v4745_v41 = vpop.permute.xlu0 %966  ;;  %v1289_v8 = vadd.s32 36, %v4752_v12 }
 0x1b0   : > { %9167 = vst [vmem:[#allocation122_spill] sm:$0xff] %v4743_v9  ;;  %9168 = vst [vmem:[#allocation123_spill] sm:$0xff] %v4745_v41  ;;  %v4760_v9 = vld [vmem:[%s4117_s15 + $0x58] sm:$0xff] }
 0x1b2   : > { %1323 = vperm.xlu1 %3939, %v1276_v7   ;;  %1356 = vperm.xlu0 %3940, %v1287_v3   ;;  %v1280_v3 = vadd.s32 36, %v4760_v9  ;;  %v4764_v7 = vld [vmem:[%s4117_s15 + $0xb0] sm:$0xff] }
 0x1b3   : > { %v4755_v2 = vpop.permute.xlu1 %951  ;;  %v4757_v60 = vpop.permute.xlu0 %972  ;;  %v1291_v28 = vadd.s32 36, %v4764_v7 }
 0x1b4   : > { %9169 = vst [vmem:[#allocation124_spill] sm:$0xff] %v4755_v2  ;;  %9170 = vst [vmem:[#allocation125_spill] sm:$0xff] %v4757_v60 }
 0x1b6   : > { %1329 = vperm.xlu1 %3939, %v1278_v10   ;;  %1362 = vperm.xlu0 %3940, %v1289_v8   ;;  %v1282_v8 = vadd.s32 36, %v4772_v47  ;;  %v4776_v10 = vld [vmem:[%s4117_s15 + $0xc0] sm:$0xff] }
 0x1b7   : > { %v4767_v1 = vpop.permute.xlu1 %957  ;;  %v4769_v13 = vpop.permute.xlu0 %978  ;;  %v1293_v60 = vadd.s32 36, %v4776_v10 }
 0x1b8   : > { %9171 = vst [vmem:[#allocation126_spill] sm:$0xff] %v4767_v1  ;;  %9172 = vst [vmem:[#allocation127_spill] sm:$0xff] %v4769_v13  ;;  %v4784_v1 = vld [vmem:[%s4117_s15 + $0x78] sm:$0xff] }
 0x1ba   : > { %1335 = vperm.xlu1 %3939, %v1280_v3   ;;  %1368 = vperm.xlu0 %3940, %v1291_v28   ;;  %v1284_v28 = vadd.s32 36, %v4784_v1  ;;  %v4788_v3 = vld [vmem:[%s4117_s15 + $0xd0] sm:$0xff] }
 0x1bb   : > { %v4779_v48 = vpop.permute.xlu1 %963  ;;  %v4781_v41 = vpop.permute.xlu0 %984  ;;  %v1295_v20 = vadd.s32 36, %v4788_v3 }
 0x1bc   : > { %9173 = vst [vmem:[#allocation128_spill] sm:$0xff] %v4779_v48  ;;  %9174 = vst [vmem:[#allocation129_spill] sm:$0xff] %v4781_v41  ;;  %v4796_v48 = vld [vmem:[%s4117_s15 + $0x88] sm:$0xff] }
 0x1be   : > { %1341 = vperm.xlu1 %3939, %v1282_v8   ;;  %1374 = vperm.xlu0 %3940, %v1293_v60   ;;  %v1286_v60 = vadd.s32 36, %v4796_v48  ;;  %v4800_v8 = vld [vmem:[%s4117_s15 + $0xe0] sm:$0xff] }
 0x1bf   : > { %v4791_v13 = vpop.permute.xlu1 %969  ;;  %v4793_v2 = vpop.permute.xlu0 %990  ;;  %v1297_v41 = vadd.s32 36, %v4800_v8 }
 0x1c0   : > { %9175 = vst [vmem:[#allocation130_spill] sm:$0xff] %v4791_v13  ;;  %9176 = vst [vmem:[#allocation131_spill] sm:$0xff] %v4793_v2  ;;  %v4808_v13 = vld [vmem:[%s4117_s15 + $0x98] sm:$0xff] }
 0x1c2   : > { %1347 = vperm.xlu1 %3939, %v1284_v28   ;;  %1380 = vperm.xlu0 %3940, %v1295_v20   ;;  %v1288_v20 = vadd.s32 36, %v4808_v13  ;;  %v4812_v28 = vld [vmem:[%s4117_s15 + $0xf0] sm:$0xff] }
 0x1c3   : > { %v4803_v17 = vpop.permute.xlu1 %975  ;;  %v4805_v30 = vpop.permute.xlu0 %996  ;;  %v1299_v2 = vadd.s32 36, %v4812_v28 }
 0x1c4   : > { %9177 = vst [vmem:[#allocation132_spill] sm:$0xff] %v4803_v17  ;;  %9178 = vst [vmem:[#allocation133_spill] sm:$0xff] %v4805_v30  ;;  %v4820_v17 = vld [vmem:[%s4117_s15 + $0xa8] sm:$0xff] }
 0x1c6   : > { %1353 = vperm.xlu1 %3939, %v1286_v60   ;;  %1386 = vperm.xlu0 %3940, %v1297_v41   ;;  %v1290_v41 = vadd.s32 36, %v4820_v17 }
 0x1c7   : > { %v4815_v18 = vpop.permute.xlu1 %981  ;;  %v4817_v19 = vpop.permute.xlu0 %1002 }
 0x1c8   : > { %9179 = vst [vmem:[#allocation134_spill] sm:$0xff] %v4815_v18  ;;  %9180 = vst [vmem:[#allocation135_spill] sm:$0xff] %v4817_v19  ;;  %v4829_v18 = vld [vmem:[%s4117_s15 + $0xb8] sm:$0xff]  ;;  %v1464_v19 = vadd.s32 39, %v4712_v51 }
 0x1ca   : > { %1359 = vperm.xlu1 %3939, %v1288_v20   ;;  %1392 = vperm.xlu0 %3940, %v1299_v2   ;;  %v1292_v20 = vadd.s32 36, %v4829_v18 }
 0x1cb   : > { %v4823_v60 = vpop.permute.xlu1 %987  ;;  %v4825_v30 = vpop.permute.xlu0 %1008 }
 0x1cc   : > { %9181 = vst [vmem:[#allocation136_spill] sm:$0xff] %v4823_v60  ;;  %9182 = vst [vmem:[#allocation137_spill] sm:$0xff] %v4825_v30  ;;  %v4838_v30 = vld [vmem:[%s4117_s15 + $0xc8] sm:$0xff] }
 0x1ce   : > { %1365 = vperm.xlu1 %3939, %v1290_v41   ;;  %3941 = vset.pattern.permute.xlu0 %v4076_v15  ;;  %v1294_v41 = vadd.s32 36, %v4838_v30 }
 0x1cf   : > { %v4832_v2 = vpop.permute.xlu1 %993  ;;  %1494 = vperm.xlu0 %3941, %v1461_v11   ;;  %v4847_v11 = vld [vmem:[%s4117_s15 + $0xd8] sm:$0xff] }
 0x1d0   : > { %9183 = vst [vmem:[#allocation138_spill] sm:$0xff] %v4832_v2  ;;  %v4835_v4 = vpop.permute.xlu0 %1110  ;;  %v1296_v2 = vadd.s32 36, %v4847_v11 }
 0x1d1   : > { %9184 = vst [vmem:[#allocation139_spill] sm:$0xff] %v4835_v4 }
 0x1d2   : > { %1371 = vperm.xlu1 %3939, %v1292_v20   ;;  %v1468_v20 = vadd.s32 39, %v4736_v61 }
 0x1d3   : > { %v4841_v60 = vpop.permute.xlu1 %999  ;;  %1503 = vperm.xlu0 %3941, %v1464_v19  }
 0x1d4   : > { %9185 = vst [vmem:[#allocation140_spill] sm:$0xff] %v4841_v60  ;;  %v4844_v53 = vpop.permute.xlu0 %1119  ;;  %v4856_v60 = vld [vmem:[%s4117_s15 + $0xe8] sm:$0xff] }
 0x1d5   : > { %9186 = vst [vmem:[#allocation141_spill] sm:$0xff] %v4844_v53  ;;  %v1298_v19 = vadd.s32 36, %v4856_v60 }
 0x1d6   : > { %1377 = vperm.xlu1 %3939, %v1294_v41   ;;  %v1470_v41 = vadd.s32 39, %v4748_v6 }
 0x1d7   : > { %v4850_v4 = vpop.permute.xlu1 %1005  ;;  %1509 = vperm.xlu0 %3941, %v1466_v43   ;;  %v1300_v43 = vadd.s32 36, %v4865_v52 }
 0x1d8   : > { %9187 = vst [vmem:[#allocation142_spill] sm:$0xff] %v4850_v4  ;;  %v4853_v38 = vpop.permute.xlu0 %1125  ;;  %v1472_v4 = vadd.s32 39, %v4760_v9 }
 0x1d9   : > { %9188 = vst [vmem:[#allocation143_spill] sm:$0xff] %v4853_v38 }
 0x1da   : > { %1383 = vperm.xlu1 %3939, %v1296_v2  }
 0x1db   : > { %v4859_v5 = vpop.permute.xlu1 %1011  ;;  %1515 = vperm.xlu0 %3941, %v1468_v20   ;;  %v1462_v20 = vadd.s32 39, %v4657_v16 }
 0x1dc   : > { %9189 = vst [vmem:[#allocation144_spill] sm:$0xff] %v4859_v5  ;;  %v4862_v53 = vpop.permute.xlu0 %1131  ;;  %v1474_v5 = vadd.s32 39, %v4772_v47 }
 0x1dd   : > { %9190 = vst [vmem:[#allocation145_spill] sm:$0xff] %v4862_v53  ;;  %v1476_v53 = vadd.s32 39, %v4784_v1 }
 0x1de   : > { %1389 = vperm.xlu1 %3939, %v1298_v19  }
 0x1df   : > { %1521 = vperm.xlu0 %3941, %v1470_v41   ;;  %v1463_v41 = vadd.s32 39, %v4700_v29 }
 0x1e0   : > { %v4869_v2 = vpop.permute.xlu1 %1113  ;;  %v4871_v38 = vpop.permute.xlu0 %1137 }
 0x1e1   : > { %9191 = vst [vmem:[#allocation146_spill] sm:$0xff] %v4869_v2  ;;  %9192 = vst [vmem:[#allocation147_spill] sm:$0xff] %v4871_v38 }
 0x1e2   : > { %1395 = vperm.xlu1 %3939, %v1300_v43   ;;  %v1478_v43 = vadd.s32 39, %v4796_v48 }
 0x1e3   : > { %1527 = vperm.xlu0 %3941, %v1472_v4   ;;  %v1465_v4 = vadd.s32 39, %v4664_v25 }
 0x1e4   : > { %v4875_v62 = vpop.permute.xlu1 %1116  ;;  %v4877_v19 = vpop.permute.xlu0 %1143 }
 0x1e5   : > { %9193 = vst [vmem:[#allocation148_spill] sm:$0xff] %v4875_v62  ;;  %9194 = vst [vmem:[#allocation149_spill] sm:$0xff] %v4877_v19 }
 0x1e6   : > { %3942 = vset.pattern.permute.xlu1 %v4076_v15  ;;  %v1480_v15 = vadd.s32 39, %v4808_v13 }
 0x1e7   : > { %1497 = vperm.xlu1 %3942, %v1462_v20   ;;  %1533 = vperm.xlu0 %3941, %v1474_v5   ;;  %v1467_v5 = vadd.s32 39, %v4673_v22 }
 0x1e8   : > { %v4881_v2 = vpop.permute.xlu1 %1122  ;;  %v4883_v38 = vpop.permute.xlu0 %1149 }
 0x1e9   : > { %9195 = vst [vmem:[#allocation150_spill] sm:$0xff] %v4881_v2  ;;  %9196 = vst [vmem:[#allocation151_spill] sm:$0xff] %v4883_v38 }
 0x1eb   : > { %1500 = vperm.xlu1 %3942, %v1463_v41   ;;  %1539 = vperm.xlu0 %3941, %v1476_v53   ;;  %v1469_v53 = vadd.s32 39, %v4680_v14  ;;  %v1482_v41 = vadd.s32 39, %v4820_v17 }
 0x1ec   : > { %v4887_v62 = vpop.permute.xlu1 %1128  ;;  %v4889_v19 = vpop.permute.xlu0 %1155 }
 0x1ed   : > { %9197 = vst [vmem:[#allocation152_spill] sm:$0xff] %v4887_v62  ;;  %9198 = vst [vmem:[#allocation153_spill] sm:$0xff] %v4889_v19 }
 0x1ef   : > { %1506 = vperm.xlu1 %3942, %v1465_v4   ;;  %1545 = vperm.xlu0 %3941, %v1478_v43   ;;  %v1471_v4 = vadd.s32 39, %v4692_v27  ;;  %v1484_v43 = vadd.s32 39, %v4829_v18 }
 0x1f0   : > { %v4893_v20 = vpop.permute.xlu1 %1134  ;;  %v4895_v2 = vpop.permute.xlu0 %1161 }
 0x1f1   : > { %9199 = vst [vmem:[#allocation154_spill] sm:$0xff] %v4893_v20  ;;  %9200 = vst [vmem:[#allocation155_spill] sm:$0xff] %v4895_v2 }
 0x1f3   : > { %1512 = vperm.xlu1 %3942, %v1467_v5   ;;  %1551 = vperm.xlu0 %3941, %v1480_v15   ;;  %v1473_v5 = vadd.s32 39, %v4704_v23  ;;  %v1486_v15 = vadd.s32 39, %v4838_v30 }
 0x1f4   : > { %v4899_v38 = vpop.permute.xlu1 %1140  ;;  %v4901_v62 = vpop.permute.xlu0 %1167 }
 0x1f5   : > { %9201 = vst [vmem:[#allocation156_spill] sm:$0xff] %v4899_v38  ;;  %9202 = vst [vmem:[#allocation157_spill] sm:$0xff] %v4901_v62 }
 0x1f7   : > { %1518 = vperm.xlu1 %3942, %v1469_v53   ;;  %1557 = vperm.xlu0 %3941, %v1482_v41   ;;  %v1475_v53 = vadd.s32 39, %v4716_v31  ;;  %v1488_v41 = vadd.s32 39, %v4847_v11 }
 0x1f8   : > { %v4905_v19 = vpop.permute.xlu1 %1146  ;;  %v4907_v20 = vpop.permute.xlu0 %1173 }
 0x1f9   : > { %9203 = vst [vmem:[#allocation158_spill] sm:$0xff] %v4905_v19  ;;  %9204 = vst [vmem:[#allocation159_spill] sm:$0xff] %v4907_v20 }
 0x1fb   : > { %1524 = vperm.xlu1 %3942, %v1471_v4   ;;  %1563 = vperm.xlu0 %3941, %v1484_v43   ;;  %v1477_v4 = vadd.s32 39, %v4728_v24  ;;  %v1490_v43 = vadd.s32 39, %v4856_v60 }
 0x1fc   : > { %v4911_v2 = vpop.permute.xlu1 %1152  ;;  %v4913_v38 = vpop.permute.xlu0 %1179 }
 0x1fd   : > { %9205 = vst [vmem:[#allocation160_spill] sm:$0xff] %v4911_v2  ;;  %9206 = vst [vmem:[#allocation161_spill] sm:$0xff] %v4913_v38 }
 0x1ff   : > { %1530 = vperm.xlu1 %3942, %v1473_v5   ;;  %1569 = vperm.xlu0 %3941, %v1486_v15   ;;  %v1479_v5 = vadd.s32 39, %v4740_v32  ;;  %v1492_v15 = vadd.s32 39, %v4865_v52 }
 0x200   : > { %v4917_v62 = vpop.permute.xlu1 %1158  ;;  %v4919_v19 = vpop.permute.xlu0 %1185 }
 0x201   : > { %9207 = vst [vmem:[#allocation162_spill] sm:$0xff] %v4917_v62  ;;  %9208 = vst [vmem:[#allocation163_spill] sm:$0xff] %v4919_v19 }
 0x203   : > { %1536 = vperm.xlu1 %3942, %v1475_v53   ;;  %1575 = vperm.xlu0 %3941, %v1488_v41   ;;  %v1481_v53 = vadd.s32 39, %v4752_v12 }
 0x204   : > { %v4923_v20 = vpop.permute.xlu1 %1164  ;;  %v4925_v2 = vpop.permute.xlu0 %1191 }
 0x205   : > { %9209 = vst [vmem:[#allocation164_spill] sm:$0xff] %v4923_v20  ;;  %9210 = vst [vmem:[#allocation165_spill] sm:$0xff] %v4925_v2  ;;  %v1654_v2 = vadd.s32 48, %v4657_v16 }
 0x207   : > { %1542 = vperm.xlu1 %3942, %v1477_v4   ;;  %1581 = vperm.xlu0 %3941, %v1490_v43   ;;  %v4077_v4 = vmov 8   ;;  %v1483_v43 = vadd.s32 39, %v4764_v7 }
 0x208   : > { %v4929_v38 = vpop.permute.xlu1 %1170  ;;  %v4931_v62 = vpop.permute.xlu0 %1197 }
 0x209   : > { %9211 = vst [vmem:[#allocation166_spill] sm:$0xff] %v4929_v38  ;;  %9212 = vst [vmem:[#allocation167_spill] sm:$0xff] %v4931_v62  ;;  %v1657_v62 = vadd.s32 48, %v4664_v25  ;;  %v1487_v38 = vadd.s32 39, %v4788_v3 }
 0x20b   : > { %1548 = vperm.xlu1 %3942, %v1479_v5   ;;  %1587 = vperm.xlu0 %3941, %v1492_v15   ;;  %v1485_v15 = vadd.s32 39, %v4776_v10 }
 0x20c   : > { %v4934_v41 = vpop.permute.xlu1 %1176  ;;  %v4936_v19 = vpop.permute.xlu0 %1203 }
 0x20d   : > { %9213 = vst [vmem:[#allocation168_spill] sm:$0xff] %v4934_v41  ;;  %9214 = vst [vmem:[#allocation169_spill] sm:$0xff] %v4936_v19  ;;  %v1659_v19 = vadd.s32 48, %v4673_v22 }
 0x20f   : > { %1554 = vperm.xlu1 %3942, %v1481_v53   ;;  %3944 = vset.pattern.permute.xlu0 %v4077_v4 }
 0x210   : > { %v4940_v20 = vpop.permute.xlu1 %1182  ;;  %1689 = vperm.xlu0 %3944, %v1654_v2   ;;  %v1661_v2 = vadd.s32 48, %v4680_v14 }
 0x211   : > { %9215 = vst [vmem:[#allocation170_spill] sm:$0xff] %v4940_v20  ;;  %v4943_v5 = vpop.permute.xlu0 %1305 }
 0x212   : > { %9216 = vst [vmem:[#allocation171_spill] sm:$0xff] %v4943_v5 }
 0x213   : > { %1560 = vperm.xlu1 %3942, %v1483_v43   ;;  %v1489_v43 = vadd.s32 39, %v4800_v8 }
 0x214   : > { %v4946_v41 = vpop.permute.xlu1 %1188  ;;  %1698 = vperm.xlu0 %3944, %v1657_v62   ;;  %v1663_v62 = vadd.s32 48, %v4692_v27 }
 0x215   : > { %9217 = vst [vmem:[#allocation172_spill] sm:$0xff] %v4946_v41  ;;  %v4949_v53 = vpop.permute.xlu0 %1314 }
 0x216   : > { %9218 = vst [vmem:[#allocation173_spill] sm:$0xff] %v4949_v53 }
 0x217   : > { %1566 = vperm.xlu1 %3942, %v1485_v15   ;;  %v1491_v15 = vadd.s32 39, %v4812_v28 }
 0x218   : > { %v4952_v35 = vpop.permute.xlu1 %1194  ;;  %1704 = vperm.xlu0 %3944, %v1659_v19   ;;  %v1665_v19 = vadd.s32 48, %v4704_v23 }
 0x219   : > { %9219 = vst [vmem:[#allocation174_spill] sm:$0xff] %v4952_v35  ;;  %v4955_v20 = vpop.permute.xlu0 %1320 }
 0x21a   : > { %9220 = vst [vmem:[#allocation175_spill] sm:$0xff] %v4955_v20 }
 0x21b   : > { %1572 = vperm.xlu1 %3942, %v1487_v38   ;;  %v1653_v38 = vadd.s32 48, %v4688_v26 }
 0x21c   : > { %v4958_v5 = vpop.permute.xlu1 %1200  ;;  %1710 = vperm.xlu0 %3944, %v1661_v2   ;;  %v1667_v2 = vadd.s32 48, %v4716_v31 }
 0x21d   : > { %9221 = vst [vmem:[#allocation176_spill] sm:$0xff] %v4958_v5  ;;  %v4961_v41 = vpop.permute.xlu0 %1326 }
 0x21e   : > { %9222 = vst [vmem:[#allocation177_spill] sm:$0xff] %v4961_v41 }
 0x21f   : > { %1578 = vperm.xlu1 %3942, %v1489_v43   ;;  %v1655_v43 = vadd.s32 48, %v4700_v29 }
 0x220   : > { %1716 = vperm.xlu0 %3944, %v1663_v62   ;;  %v1669_v62 = vadd.s32 48, %v4728_v24 }
 0x221   : > { %v4965_v53 = vpop.permute.xlu1 %1302  ;;  %v4967_v35 = vpop.permute.xlu0 %1332 }
 0x222   : > { %9223 = vst [vmem:[#allocation178_spill] sm:$0xff] %v4965_v53  ;;  %9224 = vst [vmem:[#allocation179_spill] sm:$0xff] %v4967_v35 }
 0x223   : > { %1584 = vperm.xlu1 %3942, %v1491_v15   ;;  %v1656_v15 = vadd.s32 48, %v4712_v51 }
 0x224   : > { %1722 = vperm.xlu0 %3944, %v1665_v19   ;;  %v1671_v19 = vadd.s32 48, %v4740_v32 }
 0x225   : > { %v4971_v5 = vpop.permute.xlu1 %1308  ;;  %v4973_v20 = vpop.permute.xlu0 %1338 }
 0x226   : > { %9225 = vst [vmem:[#allocation180_spill] sm:$0xff] %v4971_v5  ;;  %9226 = vst [vmem:[#allocation181_spill] sm:$0xff] %v4973_v20 }
 0x227   : > { %3943 = vset.pattern.permute.xlu1 %v4077_v4  ;;  %v1658_v4 = vadd.s32 48, %v4724_v21 }
 0x228   : > { %1686 = vperm.xlu1 %3943, %v1653_v38   ;;  %1728 = vperm.xlu0 %3944, %v1667_v2   ;;  %v1673_v38 = vadd.s32 48, %v4752_v12 }
 0x229   : > { %v4977_v41 = vpop.permute.xlu1 %1311  ;;  %v4979_v35 = vpop.permute.xlu0 %1344 }
 0x22a   : > { %9227 = vst [vmem:[#allocation182_spill] sm:$0xff] %v4977_v41  ;;  %9228 = vst [vmem:[#allocation183_spill] sm:$0xff] %v4979_v35 }
 0x22c   : > { %1692 = vperm.xlu1 %3943, %v1655_v43   ;;  %1734 = vperm.xlu0 %3944, %v1669_v62   ;;  %v1660_v43 = vadd.s32 48, %v4736_v61  ;;  %v1675_v62 = vadd.s32 48, %v4764_v7 }
 0x22d   : > { %v4983_v5 = vpop.permute.xlu1 %1317  ;;  %v4985_v20 = vpop.permute.xlu0 %1350 }
 0x22e   : > { %9229 = vst [vmem:[#allocation184_spill] sm:$0xff] %v4983_v5  ;;  %9230 = vst [vmem:[#allocation185_spill] sm:$0xff] %v4985_v20 }
 0x230   : > { %1695 = vperm.xlu1 %3943, %v1656_v15   ;;  %1740 = vperm.xlu0 %3944, %v1671_v19   ;;  %v1662_v15 = vadd.s32 48, %v4748_v6  ;;  %v1677_v19 = vadd.s32 48, %v4776_v10 }
 0x231   : > { %v4989_v2 = vpop.permute.xlu1 %1323  ;;  %v4991_v41 = vpop.permute.xlu0 %1356 }
 0x232   : > { %9231 = vst [vmem:[#allocation186_spill] sm:$0xff] %v4989_v2  ;;  %9232 = vst [vmem:[#allocation187_spill] sm:$0xff] %v4991_v41 }
 0x234   : > { %1701 = vperm.xlu1 %3943, %v1658_v4   ;;  %1746 = vperm.xlu0 %3944, %v1673_v38   ;;  %v1664_v4 = vadd.s32 48, %v4760_v9  ;;  %v1679_v38 = vadd.s32 48, %v4788_v3 }
 0x235   : > { %v4995_v35 = vpop.permute.xlu1 %1329  ;;  %v4997_v5 = vpop.permute.xlu0 %1362 }
 0x236   : > { %9233 = vst [vmem:[#allocation188_spill] sm:$0xff] %v4995_v35  ;;  %9234 = vst [vmem:[#allocation189_spill] sm:$0xff] %v4997_v5 }
 0x238   : > { %1707 = vperm.xlu1 %3943, %v1660_v43   ;;  %1752 = vperm.xlu0 %3944, %v1675_v62   ;;  %v1666_v43 = vadd.s32 48, %v4772_v47  ;;  %v1681_v62 = vadd.s32 48, %v4800_v8 }
 0x239   : > { %v5001_v20 = vpop.permute.xlu1 %1335  ;;  %v5003_v2 = vpop.permute.xlu0 %1368 }
 0x23a   : > { %9235 = vst [vmem:[#allocation190_spill] sm:$0xff] %v5001_v20  ;;  %9236 = vst [vmem:[#allocation191_spill] sm:$0xff] %v5003_v2 }
 0x23c   : > { %1713 = vperm.xlu1 %3943, %v1662_v15   ;;  %1758 = vperm.xlu0 %3944, %v1677_v19   ;;  %v1668_v15 = vadd.s32 48, %v4784_v1  ;;  %v1683_v19 = vadd.s32 48, %v4812_v28 }
 0x23d   : > { %v5007_v41 = vpop.permute.xlu1 %1341  ;;  %v5009_v35 = vpop.permute.xlu0 %1374 }
 0x23e   : > { %9237 = vst [vmem:[#allocation192_spill] sm:$0xff] %v5007_v41  ;;  %9238 = vst [vmem:[#allocation193_spill] sm:$0xff] %v5009_v35 }
 0x240   : > { %1719 = vperm.xlu1 %3943, %v1664_v4   ;;  %1764 = vperm.xlu0 %3944, %v1679_v38   ;;  %v1670_v4 = vadd.s32 48, %v4796_v48 }
 0x241   : > { %v5013_v53 = vpop.permute.xlu1 %1347  ;;  %v5015_v20 = vpop.permute.xlu0 %1380 }
 0x242   : > { %9239 = vst [vmem:[#allocation194_spill] sm:$0xff] %v5013_v53  ;;  %9240 = vst [vmem:[#allocation195_spill] sm:$0xff] %v5015_v20  ;;  %v1845_v20 = vadd.s32 53, %v4688_v26 }
 0x244   : > { %1725 = vperm.xlu1 %3943, %v1666_v43   ;;  %1770 = vperm.xlu0 %3944, %v1681_v62   ;;  %v4078_v43 = vmov 9   ;;  %v1672_v62 = vadd.s32 48, %v4808_v13 }
 0x245   : > { %v5019_v2 = vpop.permute.xlu1 %1353  ;;  %v5021_v41 = vpop.permute.xlu0 %1386 }
 0x246   : > { %9241 = vst [vmem:[#allocation196_spill] sm:$0xff] %v5019_v2  ;;  %9242 = vst [vmem:[#allocation197_spill] sm:$0xff] %v5021_v41  ;;  %v1848_v2 = vadd.s32 53, %v4712_v51  ;;  %v1676_v41 = vadd.s32 48, %v4829_v18 }
 0x248   : > { %1731 = vperm.xlu1 %3943, %v1668_v15   ;;  %1776 = vperm.xlu0 %3944, %v1683_v19   ;;  %v1674_v19 = vadd.s32 48, %v4820_v17 }
 0x249   : > { %v5024_v38 = vpop.permute.xlu1 %1359  ;;  %v5026_v35 = vpop.permute.xlu0 %1392 }
 0x24a   : > { %9243 = vst [vmem:[#allocation198_spill] sm:$0xff] %v5024_v38  ;;  %9244 = vst [vmem:[#allocation199_spill] sm:$0xff] %v5026_v35  ;;  %v1850_v35 = vadd.s32 53, %v4724_v21 }
 0x24c   : > { %1737 = vperm.xlu1 %3943, %v1670_v4   ;;  %3945 = vset.pattern.permute.xlu0 %v4078_v43 }
 0x24d   : > { %v5030_v53 = vpop.permute.xlu1 %1365  ;;  %1878 = vperm.xlu0 %3945, %v1845_v20   ;;  %v1852_v20 = vadd.s32 53, %v4736_v61 }
 0x24e   : > { %9245 = vst [vmem:[#allocation200_spill] sm:$0xff] %v5030_v53  ;;  %v5033_v15 = vpop.permute.xlu0 %1494 }
 0x24f   : > { %9246 = vst [vmem:[#allocation201_spill] sm:$0xff] %v5033_v15 }
 0x250   : > { %1743 = vperm.xlu1 %3943, %v1672_v62   ;;  %v1678_v62 = vadd.s32 48, %v4838_v30 }
 0x251   : > { %v5036_v38 = vpop.permute.xlu1 %1371  ;;  %1887 = vperm.xlu0 %3945, %v1848_v2   ;;  %v1854_v2 = vadd.s32 53, %v4748_v6 }
 0x252   : > { %9247 = vst [vmem:[#allocation202_spill] sm:$0xff] %v5036_v38  ;;  %v5039_v4 = vpop.permute.xlu0 %1503 }
 0x253   : > { %9248 = vst [vmem:[#allocation203_spill] sm:$0xff] %v5039_v4 }
 0x254   : > { %1749 = vperm.xlu1 %3943, %v1674_v19   ;;  %v1680_v19 = vadd.s32 48, %v4847_v11 }
 0x255   : > { %v5042_v5 = vpop.permute.xlu1 %1377  ;;  %1893 = vperm.xlu0 %3945, %v1850_v35   ;;  %v1856_v35 = vadd.s32 53, %v4760_v9 }
 0x256   : > { %9249 = vst [vmem:[#allocation204_spill] sm:$0xff] %v5042_v5  ;;  %v5045_v53 = vpop.permute.xlu0 %1509 }
 0x257   : > { %9250 = vst [vmem:[#allocation205_spill] sm:$0xff] %v5045_v53 }
 0x258   : > { %1755 = vperm.xlu1 %3943, %v1676_v41   ;;  %v1682_v41 = vadd.s32 48, %v4856_v60 }
 0x259   : > { %v5048_v15 = vpop.permute.xlu1 %1383  ;;  %1899 = vperm.xlu0 %3945, %v1852_v20   ;;  %v1858_v20 = vadd.s32 53, %v4772_v47 }
 0x25a   : > { %9251 = vst [vmem:[#allocation206_spill] sm:$0xff] %v5048_v15  ;;  %v5051_v38 = vpop.permute.xlu0 %1515 }
 0x25b   : > { %9252 = vst [vmem:[#allocation207_spill] sm:$0xff] %v5051_v38 }
 0x25c   : > { %1761 = vperm.xlu1 %3943, %v1678_v62   ;;  %v1684_v62 = vadd.s32 48, %v4865_v52 }
 0x25d   : > { %v5054_v4 = vpop.permute.xlu1 %1389  ;;  %1905 = vperm.xlu0 %3945, %v1854_v2   ;;  %v1860_v2 = vadd.s32 53, %v4784_v1 }
 0x25e   : > { %9253 = vst [vmem:[#allocation208_spill] sm:$0xff] %v5054_v4  ;;  %v5057_v5 = vpop.permute.xlu0 %1521 }
 0x25f   : > { %9254 = vst [vmem:[#allocation209_spill] sm:$0xff] %v5057_v5 }
 0x260   : > { %1767 = vperm.xlu1 %3943, %v1680_v19   ;;  %v1846_v19 = vadd.s32 53, %v4657_v16 }
 0x261   : > { %v5060_v53 = vpop.permute.xlu1 %1395  ;;  %1911 = vperm.xlu0 %3945, %v1856_v35   ;;  %v1862_v35 = vadd.s32 53, %v4796_v48 }
 0x262   : > { %9255 = vst [vmem:[#allocation210_spill] sm:$0xff] %v5060_v53  ;;  %v5063_v15 = vpop.permute.xlu0 %1527 }
 0x263   : > { %9256 = vst [vmem:[#allocation211_spill] sm:$0xff] %v5063_v15 }
 0x264   : > { %1773 = vperm.xlu1 %3943, %v1682_v41   ;;  %v1847_v41 = vadd.s32 53, %v4700_v29 }
 0x265   : > { %1917 = vperm.xlu0 %3945, %v1858_v20   ;;  %v1864_v20 = vadd.s32 53, %v4808_v13 }
 0x266   : > { %v5067_v4 = vpop.permute.xlu1 %1497  ;;  %v5069_v38 = vpop.permute.xlu0 %1533 }
 0x267   : > { %9257 = vst [vmem:[#allocation212_spill] sm:$0xff] %v5067_v4  ;;  %9258 = vst [vmem:[#allocation213_spill] sm:$0xff] %v5069_v38 }
 0x268   : > { %1779 = vperm.xlu1 %3943, %v1684_v62   ;;  %v1849_v62 = vadd.s32 53, %v4664_v25 }
 0x269   : > { %1923 = vperm.xlu0 %3945, %v1860_v2   ;;  %v1866_v2 = vadd.s32 53, %v4820_v17 }
 0x26a   : > { %v5073_v53 = vpop.permute.xlu1 %1500  ;;  %v5075_v5 = vpop.permute.xlu0 %1539 }
 0x26b   : > { %9259 = vst [vmem:[#allocation214_spill] sm:$0xff] %v5073_v53  ;;  %9260 = vst [vmem:[#allocation215_spill] sm:$0xff] %v5075_v5 }
 0x26c   : > { %3946 = vset.pattern.permute.xlu1 %v4078_v43  ;;  %v1851_v43 = vadd.s32 53, %v4673_v22 }
 0x26d   : > { %1881 = vperm.xlu1 %3946, %v1846_v19   ;;  %1929 = vperm.xlu0 %3945, %v1862_v35   ;;  %v1868_v19 = vadd.s32 53, %v4829_v18 }
 0x26e   : > { %v5079_v4 = vpop.permute.xlu1 %1506  ;;  %v5081_v38 = vpop.permute.xlu0 %1545 }
 0x26f   : > { %9261 = vst [vmem:[#allocation216_spill] sm:$0xff] %v5079_v4  ;;  %9262 = vst [vmem:[#allocation217_spill] sm:$0xff] %v5081_v38 }
 0x271   : > { %1884 = vperm.xlu1 %3946, %v1847_v41   ;;  %1935 = vperm.xlu0 %3945, %v1864_v20   ;;  %v1853_v41 = vadd.s32 53, %v4680_v14  ;;  %v1870_v20 = vadd.s32 53, %v4838_v30 }
 0x272   : > { %v5085_v53 = vpop.permute.xlu1 %1512  ;;  %v5087_v5 = vpop.permute.xlu0 %1551 }
 0x273   : > { %9263 = vst [vmem:[#allocation218_spill] sm:$0xff] %v5085_v53  ;;  %9264 = vst [vmem:[#allocation219_spill] sm:$0xff] %v5087_v5 }
 0x275   : > { %1890 = vperm.xlu1 %3946, %v1849_v62   ;;  %1941 = vperm.xlu0 %3945, %v1866_v2   ;;  %v1855_v62 = vadd.s32 53, %v4692_v27  ;;  %v1872_v2 = vadd.s32 53, %v4847_v11 }
 0x276   : > { %v5091_v35 = vpop.permute.xlu1 %1518  ;;  %v5093_v4 = vpop.permute.xlu0 %1557 }
 0x277   : > { %9265 = vst [vmem:[#allocation220_spill] sm:$0xff] %v5091_v35  ;;  %9266 = vst [vmem:[#allocation221_spill] sm:$0xff] %v5093_v4 }
 0x279   : > { %1896 = vperm.xlu1 %3946, %v1851_v43   ;;  %1947 = vperm.xlu0 %3945, %v1868_v19   ;;  %v1857_v43 = vadd.s32 53, %v4704_v23  ;;  %v1874_v19 = vadd.s32 53, %v4856_v60 }
 0x27a   : > { %v5097_v38 = vpop.permute.xlu1 %1524  ;;  %v5099_v53 = vpop.permute.xlu0 %1563 }
 0x27b   : > { %9267 = vst [vmem:[#allocation222_spill] sm:$0xff] %v5097_v38  ;;  %9268 = vst [vmem:[#allocation223_spill] sm:$0xff] %v5099_v53 }
 0x27d   : > { %1902 = vperm.xlu1 %3946, %v1853_v41   ;;  %1953 = vperm.xlu0 %3945, %v1870_v20   ;;  %v1859_v41 = vadd.s32 53, %v4716_v31  ;;  %v1876_v20 = vadd.s32 53, %v4865_v52 }
 0x27e   : > { %v5103_v5 = vpop.permute.xlu1 %1530  ;;  %v5105_v35 = vpop.permute.xlu0 %1569 }
 0x27f   : > { %9269 = vst [vmem:[#allocation224_spill] sm:$0xff] %v5103_v5  ;;  %9270 = vst [vmem:[#allocation225_spill] sm:$0xff] %v5105_v35 }
 0x281   : > { %1908 = vperm.xlu1 %3946, %v1855_v62   ;;  %1959 = vperm.xlu0 %3945, %v1872_v2   ;;  %v1861_v62 = vadd.s32 53, %v4728_v24 }
 0x282   : > { %v5109_v4 = vpop.permute.xlu1 %1536  ;;  %v5111_v38 = vpop.permute.xlu0 %1575 }
 0x283   : > { %9271 = vst [vmem:[#allocation226_spill] sm:$0xff] %v5109_v4  ;;  %9272 = vst [vmem:[#allocation227_spill] sm:$0xff] %v5111_v38  ;;  %v2038_v4 = vadd.s32 60, %v4657_v16  ;;  %v2043_v16 = vadd.s32 60, %v4673_v22  ;;  %v2047_v22 = vadd.s32 60, %v4692_v27  ;;  %v2051_v27 = vadd.s32 60, %v4716_v31 }
 0x285   : > { %1914 = vperm.xlu1 %3946, %v1857_v43   ;;  %1965 = vperm.xlu0 %3945, %v1874_v19   ;;  %v4079_v43 = vmov 10   ;;  %v1863_v19 = vadd.s32 53, %v4740_v32 }
 0x286   : > { %v5115_v53 = vpop.permute.xlu1 %1542  ;;  %v5117_v5 = vpop.permute.xlu0 %1581 }
 0x287   : > { %9273 = vst [vmem:[#allocation228_spill] sm:$0xff] %v5115_v53  ;;  %9274 = vst [vmem:[#allocation229_spill] sm:$0xff] %v5117_v5  ;;  %v2041_v5 = vadd.s32 60, %v4664_v25  ;;  %v2045_v25 = vadd.s32 60, %v4680_v14  ;;  %v2049_v14 = vadd.s32 60, %v4704_v23 }
 0x289   : > { %1920 = vperm.xlu1 %3946, %v1859_v41   ;;  %1971 = vperm.xlu0 %3945, %v1876_v20   ;;  %v1865_v20 = vadd.s32 53, %v4752_v12 }
 0x28a   : > { %v5120_v2 = vpop.permute.xlu1 %1548  ;;  %v5122_v35 = vpop.permute.xlu0 %1587 }
 0x28b   : > { %9275 = vst [vmem:[#allocation230_spill] sm:$0xff] %v5120_v2  ;;  %9276 = vst [vmem:[#allocation231_spill] sm:$0xff] %v5122_v35  ;;  %v1867_v35 = vadd.s32 53, %v4764_v7 }
 0x28d   : > { %1926 = vperm.xlu1 %3946, %v1861_v62   ;;  %3948 = vset.pattern.permute.xlu0 %v4079_v43 }
 0x28e   : > { %v5126_v38 = vpop.permute.xlu1 %1554  ;;  %2073 = vperm.xlu0 %3948, %v2038_v4  }
 0x28f   : > { %v5129_v41 = vpop.permute.xlu0 %1689 }
 0x290   : > { %9277 = vst [vmem:[#allocation232_spill] sm:$0xff] %v5129_v41 }
 0x291   : > { %1932 = vperm.xlu1 %3946, %v1863_v19   ;;  %v1869_v19 = vadd.s32 53, %v4776_v10 }
 0x292   : > { %v5132_v2 = vpop.permute.xlu1 %1560  ;;  %2082 = vperm.xlu0 %3948, %v2041_v5  }
 0x293   : > { %9278 = vst [vmem:[#allocation233_spill] sm:$0xff] %v5132_v2  ;;  %v5135_v62 = vpop.permute.xlu0 %1698 }
 0x294   : > { %9279 = vst [vmem:[#allocation234_spill] sm:$0xff] %v5135_v62 }
 0x295   : > { %1938 = vperm.xlu1 %3946, %v1865_v20   ;;  %v1871_v20 = vadd.s32 53, %v4788_v3 }
 0x296   : > { %v5138_v53 = vpop.permute.xlu1 %1566  ;;  %2088 = vperm.xlu0 %3948, %v2043_v16  }
 0x297   : > { %9280 = vst [vmem:[#allocation235_spill] sm:$0xff] %v5138_v53  ;;  %v5141_v4 = vpop.permute.xlu0 %1704 }
 0x298   : > { %9281 = vst [vmem:[#allocation236_spill] sm:$0xff] %v5141_v4 }
 0x299   : > { %1944 = vperm.xlu1 %3946, %v1867_v35   ;;  %v1873_v35 = vadd.s32 53, %v4800_v8 }
 0x29a   : > { %v5144_v41 = vpop.permute.xlu1 %1572  ;;  %2094 = vperm.xlu0 %3948, %v2045_v25  }
 0x29b   : > { %9282 = vst [vmem:[#allocation237_spill] sm:$0xff] %v5144_v41  ;;  %v5147_v5 = vpop.permute.xlu0 %1710 }
 0x29c   : > { %9283 = vst [vmem:[#allocation238_spill] sm:$0xff] %v5147_v5 }
 0x29d   : > { %1950 = vperm.xlu1 %3946, %v1869_v19   ;;  %v1875_v19 = vadd.s32 53, %v4812_v28 }
 0x29e   : > { %v5150_v2 = vpop.permute.xlu1 %1578  ;;  %2100 = vperm.xlu0 %3948, %v2047_v22   ;;  %v2053_v22 = vadd.s32 60, %v4728_v24  ;;  %v2057_v24 = vadd.s32 60, %v4752_v12  ;;  %v2061_v12 = vadd.s32 60, %v4776_v10  ;;  %v2065_v10 = vadd.s32 60, %v4800_v8 }
 0x29f   : > { %9284 = vst [vmem:[#allocation239_spill] sm:$0xff] %v5150_v2  ;;  %v5153_v16 = vpop.permute.xlu0 %1716 }
 0x2a0   : > { %9285 = vst [vmem:[#allocation240_spill] sm:$0xff] %v5153_v16 }
 0x2a1   : > { %1956 = vperm.xlu1 %3946, %v1871_v20   ;;  %v2037_v20 = vadd.s32 60, %v4688_v26 }
 0x2a2   : > { %v5156_v4 = vpop.permute.xlu1 %1584  ;;  %2106 = vperm.xlu0 %3948, %v2049_v14   ;;  %v2055_v14 = vadd.s32 60, %v4740_v32  ;;  %v2059_v32 = vadd.s32 60, %v4764_v7  ;;  %v2063_v7 = vadd.s32 60, %v4788_v3  ;;  %v2067_v3 = vadd.s32 60, %v4812_v28 }
 0x2a3   : > { %9286 = vst [vmem:[#allocation241_spill] sm:$0xff] %v5156_v4  ;;  %v5159_v25 = vpop.permute.xlu0 %1722 }
 0x2a4   : > { %9287 = vst [vmem:[#allocation242_spill] sm:$0xff] %v5159_v25 }
 0x2a5   : > { %1962 = vperm.xlu1 %3946, %v1873_v35   ;;  %v2039_v35 = vadd.s32 60, %v4700_v29  ;;  %v2042_v29 = vadd.s32 60, %v4724_v21 }
 0x2a6   : > { %2112 = vperm.xlu0 %3948, %v2051_v27  }
 0x2a7   : > { %v5163_v41 = vpop.permute.xlu1 %1686  ;;  %v5165_v23 = vpop.permute.xlu0 %1728 }
 0x2a8   : > { %9288 = vst [vmem:[#allocation243_spill] sm:$0xff] %v5163_v41  ;;  %9289 = vst [vmem:[#allocation244_spill] sm:$0xff] %v5165_v23 }
 0x2a9   : > { %1968 = vperm.xlu1 %3946, %v1875_v19   ;;  %v2040_v19 = vadd.s32 60, %v4712_v51 }
 0x2aa   : > { %2118 = vperm.xlu0 %3948, %v2053_v22  }
 0x2ab   : > { %v5169_v4 = vpop.permute.xlu1 %1692  ;;  %v5171_v31 = vpop.permute.xlu0 %1734 }
 0x2ac   : > { %9290 = vst [vmem:[#allocation245_spill] sm:$0xff] %v5169_v4  ;;  %9291 = vst [vmem:[#allocation246_spill] sm:$0xff] %v5171_v31 }
 0x2ad   : > { %3947 = vset.pattern.permute.xlu1 %v4079_v43 }
 0x2ae   : > { %2070 = vperm.xlu1 %3947, %v2037_v20   ;;  %2124 = vperm.xlu0 %3948, %v2055_v14   ;;  %v2044_v14 = vadd.s32 60, %v4736_v61 }
 0x2af   : > { %v5175_v27 = vpop.permute.xlu1 %1695  ;;  %v5177_v23 = vpop.permute.xlu0 %1740 }
 0x2b0   : > { %9292 = vst [vmem:[#allocation247_spill] sm:$0xff] %v5175_v27  ;;  %9293 = vst [vmem:[#allocation248_spill] sm:$0xff] %v5177_v23 }
 0x2b2   : > { %2076 = vperm.xlu1 %3947, %v2039_v35   ;;  %2130 = vperm.xlu0 %3948, %v2057_v24  }
 0x2b3   : > { %v5181_v22 = vpop.permute.xlu1 %1701  ;;  %v5183_v25 = vpop.permute.xlu0 %1746 }
 0x2b4   : > { %9294 = vst [vmem:[#allocation249_spill] sm:$0xff] %v5181_v22 }
 0x2b6   : > { %2079 = vperm.xlu1 %3947, %v2040_v19   ;;  %2136 = vperm.xlu0 %3948, %v2059_v32   ;;  %v2046_v19 = vadd.s32 60, %v4748_v6 }
 0x2b7   : > { %v5187_v43 = vpop.permute.xlu1 %1707  ;;  %v5189_v20 = vpop.permute.xlu0 %1752 }
 0x2b8   : > { %9295 = vst [vmem:[#allocation250_spill] sm:$0xff] %v5187_v43  ;;  %9296 = vst [vmem:[#allocation251_spill] sm:$0xff] %v5189_v20  ;;  %v5465_v43 = vld [vmem:[%s4117_s15 + $0x58] sm:$0xff] }
 0x2ba   : > { %2085 = vperm.xlu1 %3947, %v2042_v29   ;;  %2142 = vperm.xlu0 %3948, %v2061_v12   ;;  %v2048_v29 = vadd.s32 60, %v4760_v9 }
 0x2bb   : > { %v5193_v35 = vpop.permute.xlu1 %1713  ;;  %v5195_v24 = vpop.permute.xlu0 %1758 }
 0x2bc   : > { %9297 = vst [vmem:[#allocation252_spill] sm:$0xff] %v5193_v35  ;;  %9298 = vst [vmem:[#allocation253_spill] sm:$0xff] %v5195_v24  ;;  %v4042_v24 = vld [vmem:[%s4117_s15 + $0xf8] sm:$0xff] }
 0x2be   : > { %2091 = vperm.xlu1 %3947, %v2044_v14   ;;  %2148 = vperm.xlu0 %3948, %v2063_v7   ;;  %v2050_v14 = vadd.s32 60, %v4772_v47 }
 0x2bf   : > { %v5199_v32 = vpop.permute.xlu1 %1719  ;;  %v5201_v16 = vpop.permute.xlu0 %1764 }
 0x2c0   : > { %9299 = vst [vmem:[#allocation254_spill] sm:$0xff] %v5199_v32  ;;  %9300 = vst [vmem:[#allocation255_spill] sm:$0xff] %v5201_v16  ;;  %v2229_v16 = vadd.s32 63, %v4688_v26  ;;  %v2234_v26 = vadd.s32 63, %v4724_v21  ;;  %v2238_v21 = vadd.s32 63, %v4748_v6  ;;  %v2242_v6 = vadd.s32 63, %v4772_v47 }
 0x2c1   : > { %v2246_v47 = vadd.s32 63, %v4796_v48  ;;  %v4031_v32 = vld [vmem:[%s4117_s15 + $0x48] sm:$0xff] }
 0x2c2   : > { %2097 = vperm.xlu1 %3947, %v2046_v19   ;;  %2154 = vperm.xlu0 %3948, %v2065_v10   ;;  %v4080_v19 = vmov 11   ;;  %v2052_v10 = vadd.s32 60, %v4784_v1 }
 0x2c3   : > { %v5205_v12 = vpop.permute.xlu1 %1725  ;;  %v5207_v35 = vpop.permute.xlu0 %1770 }
 0x2c4   : > { %9301 = vst [vmem:[#allocation256_spill] sm:$0xff] %v5205_v12  ;;  %9302 = vst [vmem:[#allocation257_spill] sm:$0xff] %v5207_v35  ;;  %v2232_v12 = vadd.s32 63, %v4712_v51  ;;  %v2236_v51 = vadd.s32 63, %v4736_v61  ;;  %v2240_v61 = vadd.s32 63, %v4760_v9  ;;  %v2244_v9 = vadd.s32 63, %v4784_v1 }
 0x2c5   : > { %v2248_v1 = vadd.s32 63, %v4808_v13 }
 0x2c6   : > { %2103 = vperm.xlu1 %3947, %v2048_v29   ;;  %2160 = vperm.xlu0 %3948, %v2067_v3   ;;  %v2054_v3 = vadd.s32 60, %v4796_v48 }
 0x2c7   : > { %v5210_v7 = vpop.permute.xlu1 %1731  ;;  %v5212_v8 = vpop.permute.xlu0 %1776 }
 0x2c8   : > { %9303 = vst [vmem:[#allocation258_spill] sm:$0xff] %v5210_v7  ;;  %9304 = vst [vmem:[#allocation259_spill] sm:$0xff] %v5212_v8  ;;  %v2056_v8 = vadd.s32 60, %v4808_v13  ;;  %v5279_v13 = vld [vmem:[%s4117_s15 + $0x10] sm:$0xff] }
 0x2ca   : > { %2109 = vperm.xlu1 %3947, %v2050_v14   ;;  %3949 = vset.pattern.permute.xlu0 %v4080_v19 }
 0x2cb   : > { %v5216_v28 = vpop.permute.xlu1 %1737  ;;  %2262 = vperm.xlu0 %3949, %v2229_v16  }
 0x2cc   : > { %9305 = vst [vmem:[#allocation260_spill] sm:$0xff] %v5216_v28  ;;  %v5219_v29 = vpop.permute.xlu0 %1878  ;;  %v5449_v28 = vld [vmem:[%s4117_s15 + $0x38] sm:$0xff] }
 0x2cd   : > { %9306 = vst [vmem:[#allocation261_spill] sm:$0xff] %v5219_v29 }
 0x2ce   : > { %2115 = vperm.xlu1 %3947, %v2052_v10   ;;  %v2058_v10 = vadd.s32 60, %v4820_v17 }
 0x2cf   : > { %v5222_v5 = vpop.permute.xlu1 %1743  ;;  %2271 = vperm.xlu0 %3949, %v2232_v12  }
 0x2d0   : > { %9307 = vst [vmem:[#allocation262_spill] sm:$0xff] %v5222_v5  ;;  %v5225_v14 = vpop.permute.xlu0 %1887 }
 0x2d1   : > { %9308 = vst [vmem:[#allocation263_spill] sm:$0xff] %v5225_v14 }
 0x2d2   : > { %2121 = vperm.xlu1 %3947, %v2054_v3   ;;  %v2060_v3 = vadd.s32 60, %v4829_v18 }
 0x2d3   : > { %v5228_v20 = vpop.permute.xlu1 %1749  ;;  %2277 = vperm.xlu0 %3949, %v2234_v26  }
 0x2d4   : > { %9309 = vst [vmem:[#allocation264_spill] sm:$0xff] %v5228_v20  ;;  %v5231_v16 = vpop.permute.xlu0 %1893  ;;  %v9015_v20 = vmov 12  }
 0x2d5   : > { %9310 = vst [vmem:[#allocation265_spill] sm:$0xff] %v5231_v16 }
 0x2d6   : > { %2127 = vperm.xlu1 %3947, %v2056_v8   ;;  %v2062_v8 = vadd.s32 60, %v4838_v30 }
 0x2d7   : > { %v5234_v22 = vpop.permute.xlu1 %1755  ;;  %2283 = vperm.xlu0 %3949, %v2236_v51  }
 0x2d8   : > { %9311 = vst [vmem:[#allocation266_spill] sm:$0xff] %v5234_v22  ;;  %v5237_v12 = vpop.permute.xlu0 %1899 }
 0x2d9   : > { %9312 = vst [vmem:[#allocation267_spill] sm:$0xff] %v5237_v12  ;;  %v5431_v12 = vld [vmem:[%s4117_s15 + $0x18] sm:$0xff] }
 0x2da   : > { %2133 = vperm.xlu1 %3947, %v2058_v10   ;;  %v2064_v10 = vadd.s32 60, %v4847_v11 }
 0x2db   : > { %v5240_v62 = vpop.permute.xlu1 %1761  ;;  %2289 = vperm.xlu0 %3949, %v2238_v21  }
 0x2dc   : > { %9313 = vst [vmem:[#allocation268_spill] sm:$0xff] %v5240_v62  ;;  %v5243_v26 = vpop.permute.xlu0 %1905 }
 0x2dd   : > { %9314 = vst [vmem:[#allocation269_spill] sm:$0xff] %v5243_v26 }
 0x2de   : > { %2139 = vperm.xlu1 %3947, %v2060_v3   ;;  %v2066_v3 = vadd.s32 60, %v4856_v60 }
 0x2df   : > { %v5246_v16 = vpop.permute.xlu1 %1767  ;;  %2295 = vperm.xlu0 %3949, %v2240_v61  }
 0x2e0   : > { %9315 = vst [vmem:[#allocation270_spill] sm:$0xff] %v5246_v16  ;;  %v5249_v51 = vpop.permute.xlu0 %1911 }
 0x2e1   : > { %9316 = vst [vmem:[#allocation271_spill] sm:$0xff] %v5249_v51 }
 0x2e2   : > { %2145 = vperm.xlu1 %3947, %v2062_v8   ;;  %v2068_v8 = vadd.s32 60, %v4865_v52 }
 0x2e3   : > { %v5252_v22 = vpop.permute.xlu1 %1773  ;;  %2301 = vperm.xlu0 %3949, %v2242_v6  }
 0x2e4   : > { %9317 = vst [vmem:[#allocation272_spill] sm:$0xff] %v5252_v22  ;;  %v5255_v21 = vpop.permute.xlu0 %1917 }
 0x2e5   : > { %9318 = vst [vmem:[#allocation273_spill] sm:$0xff] %v5255_v21 }
 0x2e6   : > { %2151 = vperm.xlu1 %3947, %v2064_v10   ;;  %v5270_v10 = vld [vmem:[%s4117_s15 + $0x8] sm:$0xff] }
 0x2e7   : > { %v5258_v16 = vpop.permute.xlu1 %1779  ;;  %2307 = vperm.xlu0 %3949, %v2244_v9   ;;  %v2230_v48 = vadd.s32 63, %v5270_v10  ;;  %v2250_v9 = vadd.s32 63, %v4820_v17  ;;  %v5288_v17 = vld [vmem:[%s4117_s15 + $0x20] sm:$0xff] }
 0x2e8   : > { %9319 = vst [vmem:[#allocation274_spill] sm:$0xff] %v5258_v16  ;;  %v5261_v61 = vpop.permute.xlu0 %1923 }
 0x2e9   : > { %9320 = vst [vmem:[#allocation275_spill] sm:$0xff] %v5261_v61 }
 0x2ea   : > { %2157 = vperm.xlu1 %3947, %v2066_v3  }
 0x2eb   : > { %2313 = vperm.xlu0 %3949, %v2246_v47   ;;  %v2231_v47 = vadd.s32 63, %v5279_v13 }
 0x2ec   : > { %v5265_v6 = vpop.permute.xlu1 %1881  ;;  %v5267_v21 = vpop.permute.xlu0 %1929 }
 0x2ed   : > { %9321 = vst [vmem:[#allocation276_spill] sm:$0xff] %v5265_v6  ;;  %9322 = vst [vmem:[#allocation277_spill] sm:$0xff] %v5267_v21  ;;  %v5406_v6 = vld [vmem:[%s4117_s15 + $0xf0] sm:$0xff] }
 0x2ee   : > { %2163 = vperm.xlu1 %3947, %v2068_v8   ;;  %v2252_v8 = vadd.s32 63, %v4829_v18  ;;  %v5297_v18 = vld [vmem:[%s4117_s15 + $0x30] sm:$0xff] }
 0x2ef   : > { %2319 = vperm.xlu0 %3949, %v2248_v1   ;;  %v2235_v62 = vadd.s32 63, %v5297_v18 }
 0x2f0   : > { %v5274_v3 = vpop.permute.xlu1 %1884  ;;  %v5276_v16 = vpop.permute.xlu0 %1935 }
 0x2f1   : > { %9323 = vst [vmem:[#allocation278_spill] sm:$0xff] %v5274_v3  ;;  %9324 = vst [vmem:[#allocation279_spill] sm:$0xff] %v5276_v16 }
 0x2f2   : > { %3950 = vset.pattern.permute.xlu1 %v4080_v19  ;;  %v2233_v19 = vadd.s32 63, %v5288_v17 }
 0x2f3   : > { %2265 = vperm.xlu1 %3950, %v2230_v48   ;;  %2325 = vperm.xlu0 %3949, %v2250_v9   ;;  %v2254_v48 = vadd.s32 63, %v4838_v30  ;;  %v5306_v30 = vld [vmem:[%s4117_s15 + $0x40] sm:$0xff] }
 0x2f4   : > { %v5283_v1 = vpop.permute.xlu1 %1890  ;;  %v5285_v22 = vpop.permute.xlu0 %1941 }
 0x2f5   : > { %9325 = vst [vmem:[#allocation280_spill] sm:$0xff] %v5283_v1  ;;  %9326 = vst [vmem:[#allocation281_spill] sm:$0xff] %v5285_v22 }
 0x2f7   : > { %2268 = vperm.xlu1 %3950, %v2231_v47   ;;  %2331 = vperm.xlu0 %3949, %v2252_v8   ;;  %v2256_v47 = vadd.s32 63, %v4847_v11  ;;  %v5315_v11 = vld [vmem:[%s4117_s15 + $0x50] sm:$0xff] }
 0x2f8   : > { %v5292_v9 = vpop.permute.xlu1 %1896  ;;  %v5294_v26 = vpop.permute.xlu0 %1947 }
 0x2f9   : > { %9327 = vst [vmem:[#allocation282_spill] sm:$0xff] %v5292_v9  ;;  %9328 = vst [vmem:[#allocation283_spill] sm:$0xff] %v5294_v26  ;;  %v2237_v26 = vadd.s32 63, %v5306_v30 }
 0x2fb   : > { %2274 = vperm.xlu1 %3950, %v2233_v19   ;;  %2337 = vperm.xlu0 %3949, %v2254_v48   ;;  %v2258_v19 = vadd.s32 63, %v4856_v60  ;;  %v5324_v60 = vld [vmem:[%s4117_s15 + $0x60] sm:$0xff] }
 0x2fc   : > { %v5301_v8 = vpop.permute.xlu1 %1902  ;;  %v5303_v22 = vpop.permute.xlu0 %1953 }
 0x2fd   : > { %9329 = vst [vmem:[#allocation284_spill] sm:$0xff] %v5301_v8  ;;  %9330 = vst [vmem:[#allocation285_spill] sm:$0xff] %v5303_v22  ;;  %v2239_v22 = vadd.s32 63, %v5315_v11 }
 0x2ff   : > { %2280 = vperm.xlu1 %3950, %v2235_v62   ;;  %2343 = vperm.xlu0 %3949, %v2256_v47   ;;  %v2260_v62 = vadd.s32 63, %v4865_v52  ;;  %v5334_v52 = vld [vmem:[%s4117_s15 + $0x70] sm:$0xff] }
 0x300   : > { %v5310_v48 = vpop.permute.xlu1 %1908  ;;  %v5312_v9 = vpop.permute.xlu0 %1959 }
 0x301   : > { %9331 = vst [vmem:[#allocation286_spill] sm:$0xff] %v5310_v48  ;;  %9332 = vst [vmem:[#allocation287_spill] sm:$0xff] %v5312_v9  ;;  %v2241_v9 = vadd.s32 63, %v5324_v60  ;;  %v2422_v48 = vadd.s32 72, %v5270_v10 }
 0x303   : > { %2286 = vperm.xlu1 %3950, %v2237_v26   ;;  %2349 = vperm.xlu0 %3949, %v2258_v19  }
 0x304   : > { %v5319_v47 = vpop.permute.xlu1 %1914  ;;  %v5321_v8 = vpop.permute.xlu0 %1965 }
 0x305   : > { %9333 = vst [vmem:[#allocation288_spill] sm:$0xff] %v5319_v47  ;;  %9334 = vst [vmem:[#allocation289_spill] sm:$0xff] %v5321_v8  ;;  %v2425_v8 = vadd.s32 72, %v5288_v17 }
 0x307   : > { %2292 = vperm.xlu1 %3950, %v2239_v22   ;;  %2355 = vperm.xlu0 %3949, %v2260_v62   ;;  %v2243_v22 = vadd.s32 63, %v5334_v52 }
 0x308   : > { %v5327_v26 = vpop.permute.xlu1 %1920  ;;  %v5329_v19 = vpop.permute.xlu0 %1971 }
 0x309   : > { %9335 = vst [vmem:[#allocation290_spill] sm:$0xff] %v5327_v26  ;;  %9336 = vst [vmem:[#allocation291_spill] sm:$0xff] %v5329_v19  ;;  %v5343_v19 = vld [vmem:[%s4117_s15 + $0x80] sm:$0xff] }
 0x30b   : > { %2298 = vperm.xlu1 %3950, %v2241_v9   ;;  %3952 = vset.pattern.permute.xlu0 %v9015_v20  ;;  %v2245_v9 = vadd.s32 63, %v5343_v19  ;;  %v2427_v20 = vadd.s32 72, %v5297_v18 }
 0x30c   : > { %v5337_v62 = vpop.permute.xlu1 %1926  ;;  %2457 = vperm.xlu0 %3952, %v2422_v48   ;;  %v5352_v48 = vld [vmem:[%s4117_s15 + $0x90] sm:$0xff] }
 0x30d   : > { %9337 = vst [vmem:[#allocation292_spill] sm:$0xff] %v5337_v62  ;;  %v5340_v47 = vpop.permute.xlu0 %2073  ;;  %v2247_v16 = vadd.s32 63, %v5352_v48 }
 0x30e   : > { %9338 = vst [vmem:[#allocation293_spill] sm:$0xff] %v5340_v47 }
 0x30f   : > { %2304 = vperm.xlu1 %3950, %v2243_v22   ;;  %v2429_v22 = vadd.s32 72, %v5306_v30 }
 0x310   : > { %v5346_v26 = vpop.permute.xlu1 %1932  ;;  %2466 = vperm.xlu0 %3952, %v2425_v8   ;;  %v5361_v8 = vld [vmem:[%s4117_s15 + $0xa0] sm:$0xff] }
 0x311   : > { %9339 = vst [vmem:[#allocation294_spill] sm:$0xff] %v5346_v26  ;;  %v5349_v1 = vpop.permute.xlu0 %2082  ;;  %v2249_v26 = vadd.s32 63, %v5361_v8 }
 0x312   : > { %9340 = vst [vmem:[#allocation295_spill] sm:$0xff] %v5349_v1 }
 0x313   : > { %2310 = vperm.xlu1 %3950, %v2245_v9   ;;  %v2431_v9 = vadd.s32 72, %v5315_v11 }
 0x314   : > { %v5355_v3 = vpop.permute.xlu1 %1938  ;;  %2472 = vperm.xlu0 %3952, %v2427_v20   ;;  %v5370_v20 = vld [vmem:[%s4117_s15 + $0xb0] sm:$0xff] }
 0x315   : > { %v5358_v14 = vpop.permute.xlu0 %2088  ;;  %v2251_v23 = vadd.s32 63, %v5370_v20 }
 0x316   : > { %9341 = vst [vmem:[#allocation296_spill] sm:$0xff] %v5358_v14 }
 0x317   : > { %2316 = vperm.xlu1 %3950, %v2247_v16   ;;  %v2433_v16 = vadd.s32 72, %v5324_v60 }
 0x318   : > { %v5364_v1 = vpop.permute.xlu1 %1944  ;;  %2478 = vperm.xlu0 %3952, %v2429_v22   ;;  %v5379_v22 = vld [vmem:[%s4117_s15 + $0xc0] sm:$0xff] }
 0x319   : > { %9342 = vst [vmem:[#allocation297_spill] sm:$0xff] %v5364_v1  ;;  %v5367_v5 = vpop.permute.xlu0 %2094  ;;  %v2253_v1 = vadd.s32 63, %v5379_v22 }
 0x31a   : > { %9343 = vst [vmem:[#allocation298_spill] sm:$0xff] %v5367_v5 }
 0x31b   : > { %2322 = vperm.xlu1 %3950, %v2249_v26   ;;  %v2435_v26 = vadd.s32 72, %v5334_v52 }
 0x31c   : > { %v5373_v14 = vpop.permute.xlu1 %1950  ;;  %2484 = vperm.xlu0 %3952, %v2431_v9   ;;  %v5388_v9 = vld [vmem:[%s4117_s15 + $0xd0] sm:$0xff] }
 0x31d   : > { %9344 = vst [vmem:[#allocation299_spill] sm:$0xff] %v5373_v14  ;;  %v5376_v27 = vpop.permute.xlu0 %2100  ;;  %v2255_v47 = vadd.s32 63, %v5388_v9  ;;  %v5538_v14 = vld [vmem:[%s4117_s15 + $0xe8] sm:$0xff] }
 0x31e   : > { %9345 = vst [vmem:[#allocation300_spill] sm:$0xff] %v5376_v27 }
 0x31f   : > { %2328 = vperm.xlu1 %3950, %v2251_v23   ;;  %v2437_v23 = vadd.s32 72, %v5343_v19 }
 0x320   : > { %v5382_v5 = vpop.permute.xlu1 %1956  ;;  %2490 = vperm.xlu0 %3952, %v2433_v16   ;;  %v5397_v16 = vld [vmem:[%s4117_s15 + $0xe0] sm:$0xff] }
 0x321   : > { %9346 = vst [vmem:[#allocation301_spill] sm:$0xff] %v5382_v5  ;;  %v5385_v4 = vpop.permute.xlu0 %2106  ;;  %v2257_v5 = vadd.s32 63, %v5397_v16 }
 0x322   : > { %9347 = vst [vmem:[#allocation302_spill] sm:$0xff] %v5385_v4 }
 0x323   : > { %2334 = vperm.xlu1 %3950, %v2253_v1   ;;  %v2439_v1 = vadd.s32 72, %v5352_v48 }
 0x324   : > { %v5391_v27 = vpop.permute.xlu1 %1962  ;;  %2496 = vperm.xlu0 %3952, %v2435_v26   ;;  %v2259_v26 = vadd.s32 63, %v5406_v6 }
 0x325   : > { %9348 = vst [vmem:[#allocation303_spill] sm:$0xff] %v5391_v27  ;;  %v5394_v62 = vpop.permute.xlu0 %2112 }
 0x326   : > { %9349 = vst [vmem:[#allocation304_spill] sm:$0xff] %v5394_v62 }
 0x327   : > { %2340 = vperm.xlu1 %3950, %v2255_v47   ;;  %v2441_v47 = vadd.s32 72, %v5361_v8 }
 0x328   : > { %v5400_v4 = vpop.permute.xlu1 %1968  ;;  %2502 = vperm.xlu0 %3952, %v2437_v23   ;;  %v5415_v23 = vld [vmem:[%s4117_s15] sm:$0xff] }
 0x329   : > { %9350 = vst [vmem:[#allocation305_spill] sm:$0xff] %v5400_v4  ;;  %v5403_v21 = vpop.permute.xlu0 %2118  ;;  %v2421_v4 = vadd.s32 72, %v5415_v23 }
 0x32a   : > { %9351 = vst [vmem:[#allocation306_spill] sm:$0xff] %v5403_v21 }
 0x32b   : > { %2346 = vperm.xlu1 %3950, %v2257_v5   ;;  %v2443_v5 = vadd.s32 72, %v5370_v20 }
 0x32c   : > { %2508 = vperm.xlu0 %3952, %v2439_v1   ;;  %v9356_v1 = vmov 12  }
 0x32d   : > { %v5410_v62 = vpop.permute.xlu1 %2070  ;;  %v5412_v61 = vpop.permute.xlu0 %2124 }
 0x32e   : > { %9352 = vst [vmem:[#allocation307_spill] sm:$0xff] %v5410_v62  ;;  %9353 = vst [vmem:[#allocation308_spill] sm:$0xff] %v5412_v61  ;;  %v2423_v61 = vadd.s32 72, %v5279_v13 }
 0x32f   : > { %2352 = vperm.xlu1 %3950, %v2259_v26   ;;  %v2445_v26 = vadd.s32 72, %v5379_v22 }
 0x330   : > { %2514 = vperm.xlu0 %3952, %v2441_v47  }
 0x331   : > { %v5419_v21 = vpop.permute.xlu1 %2076  ;;  %v5421_v51 = vpop.permute.xlu0 %2130 }
 0x332   : > { %9354 = vst [vmem:[#allocation309_spill] sm:$0xff] %v5419_v21  ;;  %9355 = vst [vmem:[#allocation310_spill] sm:$0xff] %v5421_v51  ;;  %v2424_v21 = vadd.s32 72, %v5431_v12 }
 0x333   : > { %3951 = vset.pattern.permute.xlu1 %v9356_v1  ;;  %v2447_v1 = vadd.s32 72, %v5388_v9 }
 0x334   : > { %2454 = vperm.xlu1 %3951, %v2421_v4   ;;  %2520 = vperm.xlu0 %3952, %v2443_v5   ;;  %v5440_v5 = vld [vmem:[%s4117_s15 + $0x28] sm:$0xff] }
 0x335   : > { %v5426_v47 = vpop.permute.xlu1 %2079  ;;  %v5428_v62 = vpop.permute.xlu0 %2136 }
 0x336   : > { %9357 = vst [vmem:[#allocation311_spill] sm:$0xff] %v5426_v47  ;;  %9358 = vst [vmem:[#allocation312_spill] sm:$0xff] %v5428_v62  ;;  %v2426_v62 = vadd.s32 72, %v5440_v5 }
 0x338   : > { %2460 = vperm.xlu1 %3951, %v2423_v61   ;;  %2526 = vperm.xlu0 %3952, %v2445_v26   ;;  %v2449_v61 = vadd.s32 72, %v5397_v16 }
 0x339   : > { %v5435_v29 = vpop.permute.xlu1 %2085  ;;  %v5437_v4 = vpop.permute.xlu0 %2142 }
 0x33a   : > { %9359 = vst [vmem:[#allocation313_spill] sm:$0xff] %v5435_v29  ;;  %9360 = vst [vmem:[#allocation314_spill] sm:$0xff] %v5437_v4  ;;  %v2428_v29 = vadd.s32 72, %v5449_v28 }
 0x33c   : > { %2463 = vperm.xlu1 %3951, %v2424_v21   ;;  %2532 = vperm.xlu0 %3952, %v2447_v1   ;;  %v2451_v21 = vadd.s32 72, %v5406_v6 }
 0x33d   : > { %v5444_v26 = vpop.permute.xlu1 %2091  ;;  %v5446_v47 = vpop.permute.xlu0 %2148 }
 0x33e   : > { %9361 = vst [vmem:[#allocation315_spill] sm:$0xff] %v5444_v26  ;;  %9362 = vst [vmem:[#allocation316_spill] sm:$0xff] %v5446_v47  ;;  %v2430_v26 = vadd.s32 72, %v4031_v32  ;;  %v9025_v47 = vmov 13  }
 0x340   : > { %2469 = vperm.xlu1 %3951, %v2426_v62   ;;  %2538 = vperm.xlu0 %3952, %v2449_v61   ;;  %v2613_v61 = vadd.s32 77, %v5415_v23 }
 0x341   : > { %v5453_v1 = vpop.permute.xlu1 %2097  ;;  %v5455_v7 = vpop.permute.xlu0 %2154 }
 0x342   : > { %9363 = vst [vmem:[#allocation317_spill] sm:$0xff] %v5453_v1  ;;  %9364 = vst [vmem:[#allocation318_spill] sm:$0xff] %v5455_v7  ;;  %v2432_v1 = vadd.s32 72, %v5465_v43  ;;  %v5480_v7 = vld [vmem:[%s4117_s15 + $0x78] sm:$0xff] }
 0x344   : > { %2475 = vperm.xlu1 %3951, %v2428_v29   ;;  %2544 = vperm.xlu0 %3952, %v2451_v21   ;;  %v2616_v21 = vadd.s32 77, %v5431_v12 }
 0x345   : > { %v5458_v31 = vpop.permute.xlu1 %2103  ;;  %v5460_v62 = vpop.permute.xlu0 %2160 }
 0x346   : > { %9365 = vst [vmem:[#allocation319_spill] sm:$0xff] %v5458_v31  ;;  %9366 = vst [vmem:[#allocation320_spill] sm:$0xff] %v5460_v62  ;;  %v4033_v62 = vld [vmem:[%s4117_s15 + $0x68] sm:$0xff] }
 0x347   : > { %v2434_v31 = vadd.s32 72, %v4033_v62 }
 0x348   : > { %2481 = vperm.xlu1 %3951, %v2430_v26   ;;  %3953 = vset.pattern.permute.xlu0 %v9025_v47  ;;  %v2618_v47 = vadd.s32 77, %v5440_v5 }
 0x349   : > { %v5468_v29 = vpop.permute.xlu1 %2109  ;;  %2646 = vperm.xlu0 %3953, %v2613_v61   ;;  %v2436_v61 = vadd.s32 72, %v5480_v7 }
 0x34a   : > { %9367 = vst [vmem:[#allocation321_spill] sm:$0xff] %v5468_v29  ;;  %v5471_v41 = vpop.permute.xlu0 %2262 }
 0x34b   : > { %9368 = vst [vmem:[#allocation322_spill] sm:$0xff] %v5471_v41 }
 0x34c   : > { %2487 = vperm.xlu1 %3951, %v2432_v1   ;;  %v2620_v1 = vadd.s32 77, %v5449_v28 }
 0x34d   : > { %v5474_v26 = vpop.permute.xlu1 %2115  ;;  %2655 = vperm.xlu0 %3953, %v2616_v21   ;;  %v5489_v21 = vld [vmem:[%s4117_s15 + $0x88] sm:$0xff] }
 0x34e   : > { %9369 = vst [vmem:[#allocation323_spill] sm:$0xff] %v5474_v26  ;;  %v5477_v15 = vpop.permute.xlu0 %2271  ;;  %v2438_v26 = vadd.s32 72, %v5489_v21 }
 0x34f   : > { %9370 = vst [vmem:[#allocation324_spill] sm:$0xff] %v5477_v15 }
 0x350   : > { %2493 = vperm.xlu1 %3951, %v2434_v31   ;;  %v2622_v31 = vadd.s32 77, %v4031_v32 }
 0x351   : > { %v5483_v29 = vpop.permute.xlu1 %2121  ;;  %2661 = vperm.xlu0 %3953, %v2618_v47  }
 0x352   : > { %9371 = vst [vmem:[#allocation325_spill] sm:$0xff] %v5483_v29  ;;  %v5486_v41 = vpop.permute.xlu0 %2277  ;;  %v5497_v29 = vld [vmem:[%s4117_s15 + $0x98] sm:$0xff] }
 0x353   : > { %9372 = vst [vmem:[#allocation326_spill] sm:$0xff] %v5486_v41  ;;  %v2440_v47 = vadd.s32 72, %v5497_v29 }
 0x354   : > { %2499 = vperm.xlu1 %3951, %v2436_v61   ;;  %v2624_v61 = vadd.s32 77, %v5465_v43 }
 0x355   : > { %v5492_v15 = vpop.permute.xlu1 %2127  ;;  %2667 = vperm.xlu0 %3953, %v2620_v1  }
 0x356   : > { %9373 = vst [vmem:[#allocation327_spill] sm:$0xff] %v5492_v15  ;;  %v5494_v27 = vpop.permute.xlu0 %2283  ;;  %v5506_v15 = vld [vmem:[%s4117_s15 + $0xa8] sm:$0xff] }
 0x357   : > { %9374 = vst [vmem:[#allocation328_spill] sm:$0xff] %v5494_v27  ;;  %v2442_v32 = vadd.s32 72, %v5506_v15 }
 0x358   : > { %2505 = vperm.xlu1 %3951, %v2438_v26   ;;  %v2626_v26 = vadd.s32 77, %v4033_v62 }
 0x359   : > { %v5500_v35 = vpop.permute.xlu1 %2133  ;;  %2673 = vperm.xlu0 %3953, %v2622_v31  }
 0x35a   : > { %9375 = vst [vmem:[#allocation329_spill] sm:$0xff] %v5500_v35  ;;  %v5503_v41 = vpop.permute.xlu0 %2289  ;;  %v5514_v35 = vld [vmem:[%s4117_s15 + $0xb8] sm:$0xff] }
 0x35b   : > { %9376 = vst [vmem:[#allocation330_spill] sm:$0xff] %v5503_v41  ;;  %v2444_v31 = vadd.s32 72, %v5514_v35 }
 0x35c   : > { %2511 = vperm.xlu1 %3951, %v2440_v47   ;;  %v2628_v47 = vadd.s32 77, %v5480_v7 }
 0x35d   : > { %v5509_v1 = vpop.permute.xlu1 %2139  ;;  %2679 = vperm.xlu0 %3953, %v2624_v61  }
 0x35e   : > { %9377 = vst [vmem:[#allocation331_spill] sm:$0xff] %v5509_v1  ;;  %v5511_v27 = vpop.permute.xlu0 %2295  ;;  %v5523_v1 = vld [vmem:[%s4117_s15 + $0xc8] sm:$0xff] }
 0x35f   : > { %9378 = vst [vmem:[#allocation332_spill] sm:$0xff] %v5511_v27  ;;  %v2446_v62 = vadd.s32 72, %v5523_v1 }
 0x360   : > { %2517 = vperm.xlu1 %3951, %v2442_v32   ;;  %v2630_v32 = vadd.s32 77, %v5489_v21 }
 0x361   : > { %v5517_v2 = vpop.permute.xlu1 %2145  ;;  %2685 = vperm.xlu0 %3953, %v2626_v26   ;;  %v4040_v26 = vld [vmem:[%s4117_s15 + $0xd8] sm:$0xff] }
 0x362   : > { %9379 = vst [vmem:[#allocation333_spill] sm:$0xff] %v5517_v2  ;;  %v5520_v41 = vpop.permute.xlu0 %2301  ;;  %v2448_v2 = vadd.s32 72, %v4040_v26 }
 0x363   : > { %9380 = vst [vmem:[#allocation334_spill] sm:$0xff] %v5520_v41 }
 0x364   : > { %2523 = vperm.xlu1 %3951, %v2444_v31   ;;  %v2632_v31 = vadd.s32 77, %v5497_v29 }
 0x365   : > { %v5526_v61 = vpop.permute.xlu1 %2151  ;;  %2691 = vperm.xlu0 %3953, %v2628_v47   ;;  %v2450_v47 = vadd.s32 72, %v5538_v14 }
 0x366   : > { %9381 = vst [vmem:[#allocation335_spill] sm:$0xff] %v5526_v61  ;;  %v5529_v27 = vpop.permute.xlu0 %2307 }
 0x367   : > { %9382 = vst [vmem:[#allocation336_spill] sm:$0xff] %v5529_v27  ;;  %v2633_v27 = vadd.s32 77, %v5361_v8 }
 0x368   : > { %2529 = vperm.xlu1 %3951, %v2446_v62  }
 0x369   : > { %v5532_v4 = vpop.permute.xlu1 %2157  ;;  %2697 = vperm.xlu0 %3953, %v2630_v32   ;;  %v2636_v32 = vadd.s32 77, %v5514_v35 }
 0x36a   : > { %9383 = vst [vmem:[#allocation337_spill] sm:$0xff] %v5532_v4  ;;  %v5535_v41 = vpop.permute.xlu0 %2313  ;;  %v2452_v4 = vadd.s32 72, %v4042_v24 }
 0x36b   : > { %9384 = vst [vmem:[#allocation338_spill] sm:$0xff] %v5535_v41  ;;  %v2614_v41 = vadd.s32 77, %v5270_v10 }
 0x36c   : > { %2535 = vperm.xlu1 %3951, %v2448_v2  }
 0x36d   : > { %v5541_v61 = vpop.permute.xlu1 %2163  ;;  %2703 = vperm.xlu0 %3953, %v2632_v31   ;;  %v2637_v31 = vadd.s32 77, %v5379_v22 }
 0x36e   : > { %9385 = vst [vmem:[#allocation339_spill] sm:$0xff] %v5541_v61  ;;  %v5544_v62 = vpop.permute.xlu0 %2319 }
 0x36f   : > { %9386 = vst [vmem:[#allocation340_spill] sm:$0xff] %v5544_v62  ;;  %v2640_v62 = vadd.s32 77, %v4040_v26 }
 0x370   : > { %2541 = vperm.xlu1 %3951, %v2450_v47   ;;  %v9391_v47 = vmov 13  }
 0x371   : > { %2706 = vperm.xlu0 %3953, %v2633_v27   ;;  %v2615_v27 = vadd.s32 77, %v5279_v13 }
 0x372   : > { %v5548_v53 = vpop.permute.xlu1 %2265  ;;  %v5550_v2 = vpop.permute.xlu0 %2325 }
 0x373   : > { %9387 = vst [vmem:[#allocation341_spill] sm:$0xff] %v5548_v53  ;;  %9388 = vst [vmem:[#allocation342_spill] sm:$0xff] %v5550_v2 }
 0x374   : > { %2547 = vperm.xlu1 %3951, %v2452_v4   ;;  %v2617_v4 = vadd.s32 77, %v5288_v17 }
 0x375   : > { %2715 = vperm.xlu0 %3953, %v2636_v32   ;;  %v2641_v32 = vadd.s32 77, %v5397_v16 }
 0x376   : > { %v5554_v61 = vpop.permute.xlu1 %2268  ;;  %v5556_v51 = vpop.permute.xlu0 %2331 }
 0x377   : > { %9389 = vst [vmem:[#allocation343_spill] sm:$0xff] %v5554_v61  ;;  %9390 = vst [vmem:[#allocation344_spill] sm:$0xff] %v5556_v51 }
 0x378   : > { %3954 = vset.pattern.permute.xlu1 %v9391_v47 }
 0x379   : > { %2649 = vperm.xlu1 %3954, %v2614_v41   ;;  %2718 = vperm.xlu0 %3953, %v2637_v31   ;;  %v2619_v41 = vadd.s32 77, %v5297_v18  ;;  %v2644_v31 = vadd.s32 77, %v4042_v24  ;;  %v2623_v24 = vadd.s32 77, %v5315_v11  ;;  %v2627_v11 = vadd.s32 77, %v5334_v52  ;;  %v3253_v52 = vld [vmem:[%s8919_s1] sm:$0xff] }
 0x37a   : > { %v5560_v53 = vpop.permute.xlu1 %2274  ;;  %v5562_v2 = vpop.permute.xlu0 %2337 }
 0x37b   : > { %9392 = vst [vmem:[#allocation345_spill] sm:$0xff] %v5560_v53  ;;  %9393 = vst [vmem:[#allocation346_spill] sm:$0xff] %v5562_v2 }
 0x37d   : > { %2652 = vperm.xlu1 %3954, %v2615_v27   ;;  %2727 = vperm.xlu0 %3953, %v2640_v62   ;;  %v2621_v62 = vadd.s32 77, %v5306_v30 }
 0x37e   : > { %v5566_v61 = vpop.permute.xlu1 %2280  ;;  %v5568_v51 = vpop.permute.xlu0 %2343 }
 0x37f   : > { %9394 = vst [vmem:[#allocation347_spill] sm:$0xff] %v5566_v61  ;;  %9395 = vst [vmem:[#allocation348_spill] sm:$0xff] %v5568_v51  ;;  %v2805_v61 = vadd.s32 84, %v5415_v23 }
 0x381   : > { %2658 = vperm.xlu1 %3954, %v2617_v4   ;;  %2730 = vperm.xlu0 %3953, %v2641_v32   ;;  %v9042_v4 = vmov 14   ;;  %v2822_v32 = vadd.s32 84, %v5489_v21 }
 0x382   : > { %v5571_v26 = vpop.permute.xlu1 %2286  ;;  %v5573_v53 = vpop.permute.xlu0 %2349 }
 0x383   : > { %9396 = vst [vmem:[#allocation349_spill] sm:$0xff] %v5571_v26  ;;  %9397 = vst [vmem:[#allocation350_spill] sm:$0xff] %v5573_v53  ;;  %v3257_v26 = vld [vmem:[%s8919_s1 + $0x20] sm:$0xff] }
 0x385   : > { %2664 = vperm.xlu1 %3954, %v2619_v41   ;;  %2739 = vperm.xlu0 %3953, %v2644_v31   ;;  %v2625_v31 = vadd.s32 77, %v5324_v60 }
 0x386   : > { %v5576_v27 = vpop.permute.xlu1 %2292  ;;  %v5578_v2 = vpop.permute.xlu0 %2355 }
 0x387   : > { %9398 = vst [vmem:[#allocation351_spill] sm:$0xff] %v5576_v27  ;;  %9399 = vst [vmem:[#allocation352_spill] sm:$0xff] %v5578_v2 }
 0x389   : > { %2670 = vperm.xlu1 %3954, %v2621_v62   ;;  %3975 = vset.pattern.permute.xlu0 %v9042_v4  ;;  %v2808_v62 = vadd.s32 84, %v5431_v12 }
 0x38a   : > { %v5583_v18 = vpop.permute.xlu1 %2298  ;;  %2838 = vperm.xlu0 %3975, %v2805_v61   ;;  %v2825_v61 = vadd.s32 84, %v5361_v8 }
 0x38b   : > { %9400 = vst [vmem:[#allocation353_spill] sm:$0xff] %v5583_v18  ;;  %v5586_v41 = vpop.permute.xlu0 %2457 }
 0x38d   : > { %2676 = vperm.xlu1 %3954, %v2623_v24   ;;  %v2629_v24 = vadd.s32 77, %v5343_v19 }
 0x38e   : > { %v5589_v53 = vpop.permute.xlu1 %2304  ;;  %2889 = vperm.xlu0 %3975, %v2822_v32   ;;  %v2812_v32 = vadd.s32 84, %v5449_v28 }
 0x38f   : > { %9401 = vst [vmem:[#allocation354_spill] sm:$0xff] %v5589_v53  ;;  %v5592_v2 = vpop.permute.xlu0 %2466 }
 0x390   : > { %9402 = vst [vmem:[#allocation355_spill] sm:$0xff] %v5592_v2 }
 0x391   : > { %2682 = vperm.xlu1 %3954, %v2625_v31   ;;  %v3254_v31 = vld [vmem:[%s8919_s1 + $0x8] sm:$0xff] }
 0x392   : > { %v5595_v4 = vpop.permute.xlu1 %2310  ;;  %2847 = vperm.xlu0 %3975, %v2808_v62   ;;  %v2631_v62 = vadd.s32 77, %v5352_v48 }
 0x393   : > { %v5598_v18 = vpop.permute.xlu0 %2472 }
 0x394   : > { %9403 = vst [vmem:[#allocation356_spill] sm:$0xff] %v5598_v18  ;;  %v3261_v18 = vld [vmem:[%s8919_s1 + $0x40] sm:$0xff] }
 0x395   : > { %2688 = vperm.xlu1 %3954, %v2627_v11   ;;  %v3866_v11 = vpack.c.bf16 %v3254_v31, %v3253_v52 }
 0x396   : > { %v5601_v51 = vpop.permute.xlu1 %2316  ;;  %2898 = vperm.xlu0 %3975, %v2825_v61   ;;  %v2829_v61 = vadd.s32 84, %v5379_v22  ;;  %v2821_v22 = vadd.s32 84, %v5343_v19 }
 0x397   : > { %v5604_v53 = vpop.permute.xlu0 %2478  ;;  %3867 = vmatprep.subr.bf16.mxu0 %v3866_v11  ;;  %3890 = vmatprep.subr.bf16.mxu1 %v3866_v11 }
 0x398   : > { %9404 = vst [vmem:[#allocation357_spill] sm:$0xff] %v5604_v53  ;;  %3869 = vmatpush3.bf16.msra.mxu0 %v3866_v11  ;;  %v3255_v53 = vld [vmem:[%s8919_s1 + $0x10] sm:$0xff]  ;;  %3896 = vmatpush3.bf16.msra.mxu1 %v3866_v11 }
 0x399   : > { %2694 = vperm.xlu1 %3954, %v2629_v24   ;;  %v3256_v24 = vld [vmem:[%s8919_s1 + $0x18] sm:$0xff] }
 0x39a   : > { %v5613_v27 = vpop.permute.xlu1 %2322  ;;  %2859 = vperm.xlu0 %3975, %v2812_v32   ;;  %v3870_v52 = vpack.c.bf16 %v3256_v24, %v3255_v53  ;;  %v2816_v32 = vadd.s32 84, %v5465_v43  ;;  %v3258_v53 = vld [vmem:[%s8919_s1 + $0x28] sm:$0xff]  ;;  %v2806_v43 = vadd.s32 84, %v5270_v10  ;;  %v2833_v24 = vadd.s32 84, %v5397_v16 }
 0x39b   : > { %v5616_v28 = vpop.permute.xlu0 %2484  ;;  %v3874_v11 = vpack.c.bf16 %v3258_v53, %v3257_v26  ;;  %v3260_v26 = vld [vmem:[%s8919_s1 + $0x38] sm:$0xff]  ;;  %v2820_v16 = vadd.s32 84, %v5480_v7 }
 0x39c   : > { %9405 = vst [vmem:[#allocation358_spill] sm:$0xff] %v5616_v28  ;;  %3871 = vmatprep.subr.bf16.mxu0 %v3870_v52  ;;  %3891 = vmatprep.subr.bf16.mxu1 %v3870_v52 }
 0x39d   : > { %2700 = vperm.xlu1 %3954, %v2631_v62   ;;  %3873 = vmatpush3.bf16.msra.mxu0 %v3870_v52  ;;  %v9408_v62 = vmov 14  }
 0x39e   : > { %v5624_v31 = vpop.permute.xlu1 %2328  ;;  %2910 = vperm.xlu0 %3975, %v2829_v61   ;;  %3897 = vmatpush3.bf16.msra.mxu1 %v3870_v52  ;;  %v3259_v52 = vld [vmem:[%s8919_s1 + $0x30] sm:$0xff] }
 0x39f   : > { %9406 = vst [vmem:[#allocation359_spill] sm:$0xff] %v5624_v31  ;;  %v5628_v28 = vpop.permute.xlu0 %2490  ;;  %3875 = vmatprep.subr.bf16.mxu0 %v3874_v11  ;;  %3892 = vmatprep.subr.bf16.mxu1 %v3874_v11 }
 0x3a0   : > { %9407 = vst [vmem:[#allocation360_spill] sm:$0xff] %v5628_v28 }
 0x3a1   : > { %3955 = vset.pattern.permute.xlu1 %v9408_v62  ;;  %3877 = vmatpush3.bf16.msra.mxu0 %v3874_v11 }
 0x3a2   : > { %2886 = vperm.xlu1 %3955, %v2821_v22   ;;  %v5637_v61 = vpop.permute.xlu1 %2334  ;;  %2871 = vperm.xlu0 %3975, %v2816_v32   ;;  %v3878_v22 = vpack.c.bf16 %v3260_v26, %v3259_v52  ;;  %v2998_v52 = vadd.s32 87, %v5270_v10  ;;  %v3013_v26 = vadd.s32 87, %v5343_v19  ;;  %v3014_v19 = vadd.s32 87, %v5489_v21 }
 0x3a3   : > { %v5641_v28 = vpop.permute.xlu0 %2496  ;;  %3898 = vmatpush3.bf16.msra.mxu1 %v3874_v11  ;;  %v3262_v11 = vld [vmem:[%s8919_s1 + $0x48] sm:$0xff] }
 0x3a4   : > { %9409 = vst [vmem:[#allocation361_spill] sm:$0xff] %v5641_v28  ;;  %v2997_v28 = vadd.s32 87, %v5415_v23  ;;  %3879 = vmatprep.subr.bf16.mxu0 %v3878_v22  ;;  %3893 = vmatprep.subr.bf16.mxu1 %v3878_v22 }
 0x3a5   : > { %3881 = vmatpush3.bf16.msra.mxu0 %v3878_v22 }
 0x3a6   : > { %2841 = vperm.xlu1 %3955, %v2806_v43   ;;  %v5649_v32 = vpop.permute.xlu1 %2340  ;;  %2922 = vperm.xlu0 %3975, %v2833_v24   ;;  %v3882_v43 = vpack.c.bf16 %v3262_v11, %v3261_v18  ;;  %v9044_v24 = vmov 15   ;;  %v3263_v18 = vld [vmem:[%s8919_s1 + $0x50] sm:$0xff] }
 0x3a7   : > { %9410 = vst [vmem:[#allocation362_spill] sm:$0xff] %v5649_v32  ;;  %v5652_v53 = vpop.permute.xlu0 %2502  ;;  %3899 = vmatpush3.bf16.msra.mxu1 %v3878_v22  ;;  %v3264_v22 = vld [vmem:[%s8919_s1 + $0x58] sm:$0xff] }
 0x3a8   : > { %3883 = vmatprep.subr.bf16.mxu0 %v3882_v43  ;;  %3894 = vmatprep.subr.bf16.mxu1 %v3882_v43  ;;  %v3886_v11 = vpack.c.bf16 %v3264_v22, %v3263_v18  ;;  %v3001_v18 = vadd.s32 87, %v5288_v17  ;;  %v3018_v22 = vadd.s32 87, %v5506_v15 }
 0x3a9   : > { %3885 = vmatpush3.bf16.msra.mxu0 %v3882_v43 }
 0x3aa   : > { %3956 = vset.pattern.permute.xlu1 %v9044_v24  ;;  %v5662_v7 = vpop.permute.xlu1 %2346  ;;  %2883 = vperm.xlu0 %3975, %v2820_v16   ;;  %v3015_v16 = vadd.s32 87, %v5352_v48 }
 0x3ab   : > { %3030 = vperm.xlu1 %3956, %v2997_v28   ;;  %v5664_v23 = vpop.permute.xlu0 %2508  ;;  %3900 = vmatpush3.bf16.msra.mxu1 %v3882_v43 }
 0x3ac   : > { %3887 = vmatprep.subr.bf16.mxu0 %v3886_v11  ;;  %3895 = vmatprep.subr.bf16.mxu1 %v3886_v11 }
 0x3ad   : > { %3889 = vmatpush3.bf16.msra.mxu0 %v3886_v11 }
 0x3ae   : > { %v5674_v28 = vpop.permute.xlu1 %2352  ;;  %3977 = vset.pattern.permute.xlu0 %v9044_v24 }
 0x3af   : > { %9411 = vst [vmem:[#allocation363_spill] sm:$0xff] %v5674_v28  ;;  %3033 = vperm.xlu1 %3956, %v2998_v52   ;;  %3078 = vperm.xlu0 %3977, %v3013_v26   ;;  %v5677_v10 = vpop.permute.xlu0 %2514  ;;  %v2807_v52 = vadd.s32 84, %v5279_v13  ;;  %v2824_v28 = vadd.s32 84, %v5497_v29 }
 0x3b0   : > { %3901 = vmatpush3.bf16.msra.mxu1 %v3886_v11  ;;  %v2823_v11 = vadd.s32 84, %v5352_v48  ;;  %v2999_v48 = vadd.s32 87, %v5279_v13  ;;  %v3023_v13 = vadd.s32 87, %v5388_v9  ;;  %v9444_v9 = vld [vmem:[#allocation58_spill] sm:$0xff] }
 0x3b3   : > { %3081 = vperm.xlu1 %3956, %v3014_v19   ;;  %v5681_v32 = vpop.permute.xlu1 %2454  ;;  %v5683_v43 = vpop.permute.xlu0 %2520  ;;  %3084 = vperm.xlu0 %3977, %v3015_v16   ;;  %v3019_v16 = vadd.s32 87, %v5370_v20 }
 0x3b4   : > { %9412 = vst [vmem:[#allocation364_spill] sm:$0xff] %v5683_v43 }
 0x3b7   : > { %3957 = vset.pattern.permute.xlu1 %v9408_v62  ;;  %v5688_v26 = vpop.permute.xlu1 %2460  ;;  %v5690_v21 = vpop.permute.xlu0 %2526  ;;  %3042 = vperm.xlu0 %3977, %v3001_v18   ;;  %v3005_v18 = vadd.s32 87, %v5306_v30 }
 0x3b8   : > { %2844 = vperm.xlu1 %3957, %v2807_v52   ;;  %v179_v52 = vlaneseq }
 0x3bb   : > { %v5694_v19 = vpop.permute.xlu1 %2463  ;;  %v5696_v24 = vpop.permute.xlu0 %2532  ;;  %3093 = vperm.xlu0 %3977, %v3018_v22   ;;  %v3022_v22 = vadd.s32 87, %v5523_v1 }
 0x3bc   : > { %9413 = vst [vmem:[#allocation365_spill] sm:$0xff] %v5694_v19  ;;  %9414 = vst [vmem:[#allocation366_spill] sm:$0xff] %v5696_v24  ;;  %2892 = vperm.xlu1 %3957, %v2823_v11   ;;  %v9417_v11 = vmov 15   ;;  %v5713_v19 = vand.u32 127, %v179_v52  ;;  %v9453_v52 = vld [vmem:[#allocation64_spill] sm:$0xff] }
 0x3be   : > { %vm277_vm0 = vcmp.eq.s32.totalorder %v4283_v37, %v5713_v19  ;;  %vm437_vm1 = vcmp.eq.s32.totalorder %v4379_v59, %v5713_v19  ;;  %vm278_vm2 = vcmp.eq.s32.totalorder %v4289_v42, %v5713_v19  ;;  %vm438_vm3 = vcmp.eq.s32.totalorder %v4377_v34, %v5713_v19  ;;  %v9467_v34 = vld [vmem:[#allocation73_spill] sm:$0xff] }
 0x3bf   : > { %v5700_v43 = vpop.permute.xlu1 %2469  ;;  %v5702_v31 = vpop.permute.xlu0 %2538  ;;  %3096 = vperm.xlu0 %3977, %v3019_v16   ;;  %vm444_vm4 = vcmp.eq.s32.totalorder %v4397_v50, %v5713_v19  ;;  %vm448_vm5 = vcmp.eq.s32.totalorder %v4409_v63, %v5713_v19  ;;  %v3009_v37 = vadd.s32 87, %v5324_v60  ;;  %vm284_vm6 = vcmp.eq.s32.totalorder %v4299_v49, %v5713_v19  ;;  %vm5738_vm7 = vmor %vm277_vm0, %vm437_vm1  ;;  %v9459_v50 = vld [vmem:[#allocation69_spill] sm:$0xff]  ;;  %v9524_v60 = vld [vmem:[#allocation166_spill] sm:$0xff] }
 0x3c0   : > { %9415 = vst [vmem:[#allocation367_spill] sm:$0xff] %v5700_v43  ;;  %2895 = vperm.xlu1 %3957, %v2824_v28   ;;  %v3000_v43 = vadd.s32 87, %v5431_v12  ;;  %v3016_v28 = vadd.s32 87, %v5497_v29  ;;  %vm452_vm8 = vcmp.eq.s32.totalorder %v4421_v54, %v5713_v19  ;;  %vm288_vm9 = vcmp.eq.s32.totalorder %v4311_v57, %v5713_v19  ;;  %vm5750_vm11 = vmor %vm278_vm2, %vm438_vm3  ;;  %v9511_v54 = vld [vmem:[#allocation124_spill] sm:$0xff]  ;;  %v9531_v59 = vld [vmem:[#allocation189_spill] sm:$0xff] }
 0x3c1   : > { %vm293_vm10 = vcmp.eq.s32.totalorder %v4331_v40, %v5713_v19  ;;  %vm5754_vm12 = vmor %vm284_vm6, %vm444_vm4  ;;  %vm453_vm13 = vcmp.eq.s32.totalorder %v4425_v0, %v5713_v19  ;;  %vm292_vm14 = vcmp.eq.s32.totalorder %v4323_v33, %v5713_v19  ;;  %vm454_vm0 = vcmp.eq.s32.totalorder %v4427_v46, %v5713_v19  ;;  %v9440_v0 = vld [vmem:[#allocation47_spill] sm:$0xff] }
 0x3c2   : > { %vm5765_vm15 = vmor %vm288_vm9, %vm448_vm5  ;;  %v2634_v57 = vadd.s32 77, %v5506_v15  ;;  %vm457_vm3 = vcmp.eq.s32.totalorder %v4437_v45, %v5713_v19  ;;  %v3026_v63 = vadd.s32 87, %v5538_v14  ;;  %vm294_vm4 = vcmp.eq.s32.totalorder %v4329_v39, %v5713_v19 }
 0x3c3   : > { %v5706_v2 = vpop.permute.xlu1 %2475  ;;  %v5708_v24 = vpop.permute.xlu0 %2544  ;;  %3054 = vperm.xlu0 %3977, %v3005_v18   ;;  %vm5774_vm2 = vmor %vm292_vm14, %vm452_vm8  ;;  %vm301_vm5 = vcmp.eq.s32.totalorder %v4355_v44, %v5713_v19  ;;  %v9430_v46 = vmov 0  ;;  %vm461_vm8 = vcmp.eq.s32.totalorder %v4449_v55, %v5713_v19  ;;  %vm305_vm9 = vcmp.eq.s32.totalorder %v4367_v58, %v5713_v19  ;;  %v9437_v55 = vld [vmem:[#allocation46_spill] sm:$0xff]  ;;  %v9476_v58 = vld [vmem:[#allocation80_spill] sm:$0xff] }
 0x3c4   : > { %9416 = vst [vmem:[#allocation368_spill] sm:$0xff] %v5708_v24  ;;  %3958 = vset.pattern.permute.xlu1 %v9417_v11  ;;  %vm5790_vm6 = vmor %vm293_vm10, %vm453_vm13  ;;  %v9432_v39 = vmov 0  ;;  %vm465_vm1 = vcmp.eq.s32.totalorder %v4461_v36, %v5713_v19  ;;  %vm9434_vm10 = vcmp.eq.s32.totalorder %v4343_v56, %v5713_v19  ;;  %v9441_v36 = vld [vmem:[#allocation54_spill] sm:$0xff]  ;;  %v2809_v56 = vadd.s32 84, %v5288_v17  ;;  %v9601_v24 = vld [vmem:[#allocation36_spill] sm:$0xff] }
 0x3c5   : > { %3036 = vperm.xlu1 %3958, %v2999_v48   ;;  %v9431_v46 = vsel %vm5790_vm6, 4294967295, %v9430_v46  ;;  %vm5800_vm14 = vmor %vm294_vm4, %vm454_vm0  ;;  %vm629_vm6 = vcmp.eq.s32.totalorder %v9437_v55, %v5713_v19  ;;  %vm630_vm4 = vcmp.eq.s32.totalorder %v9440_v0, %v5713_v19  ;;  %v3027_v14 = vadd.s32 87, %v5406_v6  ;;  %v9447_v17 = vld [vmem:[#allocation62_spill] sm:$0xff]  ;;  %v9452_v48 = vld [vmem:[#allocation61_spill] sm:$0xff] }
 0x3c6   : > { %v9433_v39 = vsel %vm5800_vm14, 4294967295, %v9432_v39  ;;  %vm5810_vm13 = vmor %vm9434_vm10, %vm457_vm3  ;;  %vm636_vm14 = vcmp.eq.s32.totalorder %v9441_v36, %v5713_v19  ;;  %vm644_vm10 = vcmp.eq.s32.totalorder %v9447_v17, %v5713_v19  ;;  %v9448_v6 = vmov 0  ;;  %v9473_v55 = vld [vmem:[#allocation83_spill] sm:$0xff]  ;;  %v9483_v17 = vld [vmem:[#allocation93_spill] sm:$0xff] }
 0x3c7   : > { %v5715_v16 = vpop.permute.xlu1 %2481  ;;  %3105 = vperm.xlu0 %3977, %v3022_v22   ;;  %vm5816_vm0 = vmor %vm301_vm5, %vm461_vm8  ;;  %vm640_vm5 = vcmp.eq.s32.totalorder %v9444_v9, %v5713_v19  ;;  %v9454_v22 = vmov 0  ;;  %v2826_v40 = vadd.s32 84, %v5506_v15  ;;  %v9474_v36 = vmov 0  ;;  %v9480_v15 = vld [vmem:[#allocation91_spill] sm:$0xff]  ;;  %v9526_v18 = vld [vmem:[#allocation170_spill] sm:$0xff] }
 0x3c8   : > { %9418 = vst [vmem:[#allocation369_spill] sm:$0xff] %v5715_v16  ;;  %v5718_v30 = vpop.permute.xlu0 %2646  ;;  %vm5828_vm3 = vmor %vm305_vm9, %vm465_vm1  ;;  %v9478_v9 = vmov 0  ;;  %v9846_v16 = vmov 0 }
 0x3c9   : > { %3039 = vperm.xlu1 %3958, %v3000_v43   ;;  %vm5838_vm8 = vmor %vm5738_vm7, %vm629_vm6  ;;  %vm645_vm7 = vcmp.eq.s32.totalorder %v9452_v48, %v5713_v19  ;;  %vm646_vm6 = vcmp.eq.s32.totalorder %v9453_v52, %v5713_v19  ;;  %v9484_v48 = vld [vmem:[#allocation100_spill] sm:$0xff]  ;;  %v2827_v43 = vadd.s32 84, %v5370_v20 }
 0x3ca   : > { %vm5846_vm1 = vmor %vm5750_vm11, %vm630_vm4  ;;  %vm9461_vm4 = vnez %v9431_v46  ;;  %v9470_v46 = vld [vmem:[#allocation77_spill] sm:$0xff]  ;;  %v9491_v52 = vld [vmem:[#allocation96_spill] sm:$0xff] }
 0x3cb   : > { %v5733_v12 = vpop.permute.xlu1 %2487  ;;  %3108 = vperm.xlu0 %3977, %v3023_v13   ;;  %v9449_v6 = vsel %vm5846_vm1, 4294967295, %v9448_v6  ;;  %vm5852_vm9 = vmor %vm5754_vm12, %vm636_vm14  ;;  %v9456_v13 = vld [vmem:[#allocation65_spill] sm:$0xff] }
 0x3cc   : > { %v5744_v42 = vpop.permute.xlu0 %2655  ;;  %vm5863_vm11 = vmor %vm5765_vm15, %vm640_vm5  ;;  %vm649_vm12 = vcmp.eq.s32.totalorder %v9456_v13, %v5713_v19  ;;  %vm653_vm15 = vcmp.eq.s32.totalorder %v9459_v50, %v5713_v19  ;;  %v9492_v13 = vld [vmem:[#allocation104_spill] sm:$0xff] }
 0x3cd   : > { %3087 = vperm.xlu1 %3958, %v3016_v28   ;;  %v9455_v22 = vsel %vm5863_vm11, 4294967295, %v9454_v22  ;;  %vm5874_vm14 = vmor %vm5774_vm2, %vm644_vm10  ;;  %vm9464_vm11 = vnez %v9433_v39  ;;  %vm657_vm2 = vcmp.eq.s32.totalorder %v9467_v34, %v5713_v19  ;;  %v9471_v39 = vmov 0 }
 0x3ce   : > { %vm5884_vm5 = vmor %vm9461_vm4, %vm645_vm7  ;;  %vm821_vm7 = vcmp.eq.s32.totalorder %v9470_v46, %v5713_v19  ;;  %v3017_v34 = vadd.s32 87, %v5361_v8  ;;  %v9497_v46 = vmov 0  ;;  %v9536_v8 = vld [vmem:[#allocation139_spill] sm:$0xff] }
 0x3cf   : > { %v5780_v33 = vpop.permute.xlu1 %2493  ;;  %3066 = vperm.xlu0 %3977, %v3009_v37   ;;  %v2810_v37 = vadd.s32 84, %v5440_v5  ;;  %vm5890_vm1 = vmor %vm9464_vm11, %vm646_vm6  ;;  %vm828_vm6 = vcmp.eq.s32.totalorder %v9473_v55, %v5713_v19  ;;  %v9501_v55 = vld [vmem:[#allocation112_spill] sm:$0xff] }
 0x3d0   : > { %9429 = vst [vmem:[#allocation370_spill] sm:$0xff] %v5780_v33  ;;  %v5796_v45 = vpop.permute.xlu0 %2661  ;;  %vm5898_vm10 = vmor %vm5810_vm13, %vm649_vm12 }
 0x3d1   : > { %3959 = vset.pattern.permute.xlu1 %v9391_v47  ;;  %vm5906_vm4 = vmor %vm5816_vm0, %vm653_vm15  ;;  %vm822_vm0 = vcmp.eq.s32.totalorder %v9476_v58, %v5713_v19 }
 0x3d2   : > { %2709 = vperm.xlu1 %3959, %v2634_v57   ;;  %v9472_v39 = vsel %vm5906_vm4, 4294967295, %v9471_v39  ;;  %vm5917_vm13 = vmor %vm5828_vm3, %vm657_vm2  ;;  %vm836_vm3 = vcmp.eq.s32.totalorder %v9480_v15, %v5713_v19  ;;  %vm838_vm2 = vcmp.eq.s32.totalorder %v9483_v17, %v5713_v19  ;;  %v9507_v57 = vld [vmem:[#allocation120_spill] sm:$0xff]  ;;  %v3002_v15 = vadd.s32 87, %v5440_v5  ;;  %v9516_v17 = vld [vmem:[#allocation109_spill] sm:$0xff] }
 0x3d3   : > { %v5824_v44 = vpop.permute.xlu1 %2499  ;;  %3117 = vperm.xlu0 %3977, %v3026_v63   ;;  %v9475_v36 = vsel %vm5917_vm13, 4294967295, %v9474_v36  ;;  %vm5929_vm12 = vmor %vm5838_vm8, %vm821_vm7  ;;  %vm841_vm13 = vcmp.eq.s32.totalorder %v9484_v48, %v5713_v19  ;;  %vm9485_vm8 = vnez %v9449_v6  ;;  %v9517_v48 = vmov 0  ;;  %v9522_v5 = vld [vmem:[#allocation128_spill] sm:$0xff]  ;;  %v9540_v63 = vld [vmem:[#allocation145_spill] sm:$0xff] }
 0x3d4   : > { %v5834_v29 = vpop.permute.xlu0 %2667  ;;  %v9479_v9 = vsel %vm5929_vm12, 4294967295, %v9478_v9  ;;  %vm5937_vm15 = vmor %vm5852_vm9, %vm828_vm6  ;;  %vm9488_vm12 = vnez %v9455_v22  ;;  %vm837_vm9 = vcmp.eq.s32.totalorder %v9491_v52, %v5713_v19  ;;  %vm845_vm6 = vcmp.eq.s32.totalorder %v9492_v13, %v5713_v19  ;;  %v9495_v22 = vld [vmem:[#allocation108_spill] sm:$0xff]  ;;  %v9523_v13 = vld [vmem:[#allocation135_spill] sm:$0xff] }
 0x3d5   : > { %vm5947_vm7 = vmor %vm9485_vm8, %vm822_vm0  ;;  %v9520_v52 = vmov 0  ;;  %v9608_v6 = vld [vmem:[#allocation48_spill] sm:$0xff] }
 0x3d6   : > { %3960 = vset.pattern.permute.xlu1 %v9408_v62  ;;  %vm5965_vm0 = vmor %vm5874_vm14, %vm836_vm3  ;;  %vm1013_vm14 = vcmp.eq.s32.totalorder %v9501_v55, %v5713_v19  ;;  %v9667_v55 = vld [vmem:[#allocation207_spill] sm:$0xff] }
 0x3d7   : > { %2850 = vperm.xlu1 %3960, %v2809_v56   ;;  %v5869_v28 = vpop.permute.xlu1 %2505  ;;  %3120 = vperm.xlu0 %3977, %v3027_v14   ;;  %v9477_v56 = vld [vmem:[#allocation87_spill] sm:$0xff]  ;;  %vm5982_vm8 = vmor %vm5898_vm10, %vm841_vm13  ;;  %vm1020_vm10 = vcmp.eq.s32.totalorder %v9507_v57, %v5713_v19  ;;  %vm9508_vm13 = vnez %v9475_v36 }
 0x3d8   : > { %v5880_v49 = vpop.permute.xlu0 %2673  ;;  %vm832_vm11 = vcmp.eq.s32.totalorder %v9477_v56, %v5713_v19  ;;  %vm5990_vm3 = vmor %vm5884_vm5, %vm837_vm9  ;;  %vm1024_vm5 = vcmp.eq.s32.totalorder %v9511_v54, %v5713_v19  ;;  %vm9512_vm9 = vnez %v9479_v9  ;;  %v9515_v56 = vld [vmem:[#allocation127_spill] sm:$0xff] }
 0x3d9   : > { %9460 = vst [vmem:[#allocation46_spill] sm:$0xff] %v5880_v49  ;;  %vm5953_vm4 = vmor %vm9488_vm12, %vm832_vm11  ;;  %vm849_vm11 = vcmp.eq.s32.totalorder %v9495_v22, %v5713_v19  ;;  %v9519_v9 = vld [vmem:[#allocation131_spill] sm:$0xff]  ;;  %v9525_v22 = vld [vmem:[#allocation130_spill] sm:$0xff] }
 0x3da   : > { %vm5976_vm12 = vmor %vm5890_vm1, %vm838_vm2  ;;  %vm9504_vm1 = vnez %v9472_v39  ;;  %v9513_v39 = vmov 0  ;;  %v9530_v57 = vld [vmem:[#allocation123_spill] sm:$0xff]  ;;  %v9842_v49 = vld [vmem:[#allocation322_spill] sm:$0xff] }
 0x3db   : > { %2853 = vperm.xlu1 %3960, %v2810_v37   ;;  %v5912_v0 = vpop.permute.xlu1 %2511  ;;  %v9498_v46 = vsel %vm5976_vm12, 4294967295, %v9497_v46  ;;  %vm5996_vm2 = vmor %vm9504_vm1, %vm845_vm6  ;;  %vm1033_vm1 = vcmp.eq.s32.totalorder %v9515_v56, %v5713_v19  ;;  %v9670_v56 = vld [vmem:[#allocation79_spill] sm:$0xff] }
 0x3dc   : > { %v5925_v14 = vpop.permute.xlu0 %2679  ;;  %vm6004_vm12 = vmor %vm9508_vm13, %vm849_vm11  ;;  %vm1014_vm11 = vcmp.eq.s32.totalorder %v9516_v17, %v5713_v19  ;;  %v9613_v17 = vld [vmem:[#allocation190_spill] sm:$0xff] }
 0x3dd   : > { %vm6015_vm6 = vmor %vm9512_vm9, %vm1013_vm14  ;;  %vm1037_vm14 = vcmp.eq.s32.totalorder %v9519_v9, %v5713_v19  ;;  %v9544_v9 = vld [vmem:[#allocation24_spill] sm:$0xff] }
 0x3de   : > { %v9514_v39 = vsel %vm6015_vm6, 4294967295, %v9513_v39  ;;  %vm6028_vm13 = vmor %vm5937_vm15, %vm1020_vm10  ;;  %vm1028_vm6 = vcmp.eq.s32.totalorder %v9522_v5, %v5713_v19  ;;  %vm1225_vm15 = vcmp.eq.s32.totalorder %v9524_v60, %v5713_v19  ;;  %v9547_v5 = vmov 0 }
 0x3df   : > { %2901 = vperm.xlu1 %3960, %v2826_v40   ;;  %v5961_v37 = vpop.permute.xlu1 %2517  ;;  %v9502_v40 = vmov 0  ;;  %v9518_v48 = vsel %vm6028_vm13, 4294967295, %v9517_v48  ;;  %vm6036_vm9 = vmor %vm5953_vm4, %vm1024_vm5  ;;  %vm1030_vm13 = vcmp.eq.s32.totalorder %v9525_v22, %v5713_v19  ;;  %v9551_v22 = vld [vmem:[#allocation14_spill] sm:$0xff] }
 0x3e0   : > { %v5971_v50 = vpop.permute.xlu0 %2685  ;;  %v9503_v40 = vsel %vm5990_vm3, 4294967295, %v9502_v40  ;;  %v9521_v52 = vsel %vm6036_vm9, 4294967295, %v9520_v52  ;;  %vm1041_vm3 = vcmp.eq.s32.totalorder %v9523_v13, %v5713_v19  ;;  %vm1065_vm10 = vmor %vm5982_vm8, %vm1033_vm1  ;;  %vm1029_vm9 = vcmp.eq.s32.totalorder %v9530_v57, %v5713_v19  ;;  %v9549_v13 = vld [vmem:[#allocation149_spill] sm:$0xff]  ;;  %v9557_v57 = vld [vmem:[#allocation310_spill] sm:$0xff] }
 0x3e1   : > { %9496 = vst [vmem:[#allocation47_spill] sm:$0xff] %v5971_v50  ;;  %vm6056_vm5 = vmor %vm5947_vm7, %vm1014_vm11  ;;  %vm1417_vm1 = vcmp.eq.s32.totalorder %v9531_v59, %v5713_v19  ;;  %v9604_v50 = vld [vmem:[#allocation186_spill] sm:$0xff] }
 0x3e2   : > { %vm1069_vm8 = vmor %vm5996_vm2, %vm1037_vm14  ;;  %vm1205_vm2 = vcmp.eq.s32.totalorder %v9536_v8, %v5713_v19  ;;  %v9558_v8 = vld [vmem:[#allocation2_spill] sm:$0xff]  ;;  %vm9561_vm14 = vnez %v9518_v48  ;;  %v9568_v48 = vmov 0 }
 0x3e3   : > { %3961 = vset.pattern.permute.xlu1 %v9417_v11  ;;  %v6011_v58 = vpop.permute.xlu1 %2523  ;;  %vm6070_vm4 = vmor %vm5965_vm0, %vm1028_vm6  ;;  %vm9537_vm0 = vnez %v9498_v46  ;;  %v9545_v46 = vld [vmem:[#allocation25_spill] sm:$0xff] }
 0x3e4   : > { %3090 = vperm.xlu1 %3961, %v3017_v34   ;;  %v6021_v36 = vpop.permute.xlu0 %2691  ;;  %vm6076_vm7 = vmor %vm6004_vm12, %vm1041_vm3  ;;  %vm9541_vm3 = vcmp.eq.s32.totalorder %v9526_v18, %v5713_v19  ;;  %v9554_v18 = vmov 0 }
 0x3e5   : > { %vm1257_vm11 = vmor %vm1065_vm10, %vm1225_vm15  ;;  %vm1801_vm10 = vcmp.eq.s32.totalorder %v5183_v25, %v5713_v19  ;;  %v9570_v25 = vld [vmem:[#allocation146_spill] sm:$0xff] }
 0x3e6   : > { %vm6090_vm6 = vmor %vm9537_vm0, %vm1030_vm13  ;;  %vm9546_vm0 = vnez %v9503_v40  ;;  %v9552_v40 = vld [vmem:[#allocation35_spill] sm:$0xff]  ;;  %vm9572_vm13 = vnez %v9521_v52  ;;  %v9578_v52 = vmov 0 }
 0x3e7   : > { %v6052_v34 = vpop.permute.xlu1 %2529  ;;  %vm6099_vm15 = vmor %vm1069_vm8, %vm9541_vm3 }
 0x3e8   : > { %9527 = vst [vmem:[#allocation54_spill] sm:$0xff] %v6052_v34  ;;  %3045 = vperm.xlu1 %3961, %v3002_v15   ;;  %v6066_v54 = vpop.permute.xlu0 %2697  ;;  %v2635_v15 = vadd.s32 77, %v5370_v20  ;;  %vm6114_vm12 = vmor %vm9546_vm0, %vm1029_vm9  ;;  %vm9553_vm0 = vnez %v9514_v39  ;;  %vm279_vm9 = vcmp.eq.s32.totalorder %v9558_v8, %v5713_v19  ;;  %v9559_v39 = vld [vmem:[#allocation3_spill] sm:$0xff]  ;;  %v9565_v8 = vmov 0 }
 0x3e9   : > { %v9548_v5 = vsel %vm6114_vm12, 4294967295, %v9547_v5  ;;  %vm1449_vm3 = vmor %vm1257_vm11, %vm1417_vm1  ;;  %vm9556_vm1 = vcmp.eq.s32.totalorder %v5126_v38, %v5713_v19  ;;  %v9562_v38 = vmov 0  ;;  %v9606_v20 = vld [vmem:[#allocation299_spill] sm:$0xff] }
 0x3ea   : > { %vm6136_vm8 = vmor %vm9553_vm0, %vm1205_vm2  ;;  %vm280_vm2 = vcmp.eq.s32.totalorder %v9559_v39, %v5713_v19  ;;  %vm9560_vm0 = vcmp.eq.s32.totalorder %v9540_v63, %v5713_v19  ;;  %v6197_v63 = vld [vmem:[%s4117_s15 + $0x30] sm:$0xff]  ;;  %v9848_v34 = vld [vmem:[#allocation187_spill] sm:$0xff] }
 0x3eb   : > { %v6125_v60 = vpop.permute.xlu1 %2535  ;;  %v9555_v18 = vsel %vm6136_vm8, 4294967295, %v9554_v18  ;;  %vm1641_vm11 = vmor %vm1449_vm3, %vm9556_vm1  ;;  %vm9564_vm8 = vcmp.eq.s32.totalorder %v9544_v9, %v5713_v19  ;;  %v2811_v9 = vadd.s32 84, %v6197_v63 }
 0x3ec   : > { %9550 = vst [vmem:[#allocation58_spill] sm:$0xff] %v6125_v60  ;;  %3962 = vset.pattern.permute.xlu1 %v9391_v47  ;;  %v6146_v59 = vpop.permute.xlu0 %2703  ;;  %vm6157_vm3 = vmor %vm9561_vm14, %vm9560_vm0  ;;  %vm9567_vm14 = vcmp.eq.s32.totalorder %v9545_v46, %v5713_v19  ;;  %v9581_v46 = vld [vmem:[#allocation174_spill] sm:$0xff]  ;;  %v6783_v60 = vld [vmem:[%s4117_s15 + $0x48] sm:$0xff] }
 0x3ed   : > { %v9563_v38 = vsel %vm6157_vm3, 4294967295, %v9562_v38  ;;  %vm1833_vm1 = vmor %vm1641_vm11, %vm1801_vm10  ;;  %2712 = vperm.xlu1 %3962, %v2635_v15   ;;  %vm9571_vm11 = vcmp.eq.s32.totalorder %v9549_v13, %v5713_v19  ;;  %v9573_v15 = vmov 0 }
 0x3ee   : > { %vm6169_vm12 = vmor %vm279_vm9, %vm9564_vm8  ;;  %vm9575_vm8 = vcmp.eq.s32.totalorder %v5355_v3, %v5713_v19  ;;  %v9580_v3 = vld [vmem:[#allocation153_spill] sm:$0xff] }
 0x3ef   : > { %v9566_v8 = vsel %vm6169_vm12, 4294967295, %v9565_v8  ;;  %vm6176_vm0 = vmor %vm280_vm2, %vm9567_vm14  ;;  %vm9576_vm14 = vcmp.eq.s32.totalorder %v9552_v40, %v5713_v19  ;;  %vm9582_vm2 = vcmp.eq.s32.totalorder %v9557_v57, %v5713_v19  ;;  %v6217_v13 = vpop.permute.xlu1 %2541  ;;  %v9584_v40 = vld [vmem:[#allocation155_spill] sm:$0xff]  ;;  %v9661_v57 = vld [vmem:[#allocation201_spill] sm:$0xff] }
 0x3f0   : > { %v9569_v48 = vsel %vm6176_vm0, 4294967295, %v9568_v48  ;;  %vm6187_vm3 = vmor %vm9572_vm13, %vm9571_vm11  ;;  %vm9577_vm13 = vcmp.eq.s32.totalorder %v9551_v22, %v5713_v19  ;;  %9583 = vst [vmem:[#allocation62_spill] sm:$0xff] %v6217_v13  ;;  %v9585_v22 = vld [vmem:[#allocation193_spill] sm:$0xff]  ;;  %v2707_v39 = vpop.permute.xlu0 %2706  ;;  %vm9587_vm0 = vcmp.eq.s32.totalorder %v9570_v25, %v5713_v19  ;;  %v9597_v25 = vld [vmem:[#allocation178_spill] sm:$0xff]  ;;  %v9619_v13 = vmov 0 }
 0x3f1   : > { %v9574_v15 = vsel %vm6187_vm3, 4294967295, %v9573_v15  ;;  %vm2025_vm9 = vmor %vm1833_vm1, %vm9575_vm8  ;;  %vm1220_vm1 = vcmp.eq.s32.totalorder %v9580_v3, %v5713_v19  ;;  %vm1233_vm8 = vcmp.eq.s32.totalorder %v9581_v46, %v5713_v19  ;;  %vm1222_vm3 = vcmp.eq.s32.totalorder %v9584_v40, %v5713_v19  ;;  %v9590_v3 = vld [vmem:[#allocation162_spill] sm:$0xff]  ;;  %v9591_v46 = vld [vmem:[#allocation235_spill] sm:$0xff]  ;;  %3963 = vset.pattern.permute.xlu1 %v9408_v62 }
 0x3f2   : > { %vm6206_vm11 = vmor %vm9577_vm13, %vm9576_vm14  ;;  %vm9586_vm13 = vcmp.eq.s32.totalorder %v5613_v27, %v5713_v19  ;;  %vm9592_vm14 = vcmp.eq.s32.totalorder %v5677_v10, %v5713_v19  ;;  %v9598_v10 = vld [vmem:[#allocation253_spill] sm:$0xff]  ;;  %2856 = vperm.xlu1 %3963, %v2811_v9   ;;  %v9609_v40 = vld [vmem:[#allocation50_spill] sm:$0xff] }
 0x3f3   : > { %v9579_v52 = vsel %vm6206_vm11, 4294967295, %v9578_v52  ;;  %vm2217_vm10 = vmor %vm2025_vm9, %vm9582_vm2  ;;  %vm1221_vm9 = vcmp.eq.s32.totalorder %v9590_v3, %v5713_v19  ;;  %vm1397_vm2 = vcmp.eq.s32.totalorder %v9597_v25, %v5713_v19  ;;  %v6285_v9 = vpop.permute.xlu1 %2547  ;;  %v9616_v3 = vld [vmem:[#allocation13_spill] sm:$0xff]  ;;  %v9637_v25 = vld [vmem:[#allocation171_spill] sm:$0xff] }
 0x3f4   : > { %vm2409_vm11 = vmor %vm2217_vm10, %vm9586_vm13  ;;  %vm2761_vm13 = vcmp.eq.s32.totalorder %v2707_v39, %v5713_v19  ;;  %v9599_v39 = vmov 0  ;;  %9607 = vst [vmem:[#allocation61_spill] sm:$0xff] %v6285_v9  ;;  %v9615_v9 = vld [vmem:[#allocation314_spill] sm:$0xff]  ;;  %v6307_v33 = vpop.permute.xlu0 %2715 }
 0x3f5   : > { %vm6231_vm12 = vmor %vm6056_vm5, %vm9587_vm0  ;;  %v9727_v27 = vld [vmem:[#allocation246_spill] sm:$0xff] }
 0x3f6   : > { %vm2601_vm10 = vmor %vm2409_vm11, %vm9592_vm14  ;;  %vm1805_vm11 = vcmp.eq.s32.totalorder %v9598_v10, %v5713_v19  ;;  %2904 = vperm.xlu1 %3963, %v2827_v43   ;;  %v9647_v10 = vld [vmem:[#allocation194_spill] sm:$0xff] }
 0x3f7   : > { %vm6246_vm5 = vmor %vm6070_vm4, %vm1220_vm1  ;;  %vm9610_vm1 = vnez %v9548_v5  ;;  %v9617_v5 = vld [vmem:[#allocation63_spill] sm:$0xff] }
 0x3f8   : > { %vm6252_vm0 = vmor %vm6076_vm7, %vm1233_vm8  ;;  %vm9605_vm8 = vcmp.eq.s32.totalorder %v9585_v22, %v5713_v19  ;;  %v9611_v22 = vmov 0  ;;  %v6397_v43 = vpop.permute.xlu1 %2649 }
 0x3f9   : > { %vm6260_vm14 = vmor %vm2601_vm10, %vm2761_vm13 }
 0x3fa   : > { %v9600_v39 = vsel %vm6260_vm14, 4294967295, %v9599_v39  ;;  %vm6272_vm7 = vmor %vm6090_vm6, %vm1222_vm3  ;;  %vm296_vm3 = vcmp.eq.s32.totalorder %v9616_v3, %v5713_v19  ;;  %vm9621_vm6 = vcmp.eq.s32.totalorder %v9601_v24, %v5713_v19  ;;  %v2828_v24 = vadd.s32 84, %v5514_v35  ;;  %v9662_v3 = vld [vmem:[#allocation303_spill] sm:$0xff] }
 0x3fb   : > { %vm1453_vm10 = vmor %vm6099_vm15, %vm9605_vm8  ;;  %vm9614_vm8 = vcmp.eq.s32.totalorder %v9591_v46, %v5713_v19  ;;  %v9622_v46 = vmov 0 }
 0x3fc   : > { %vm6296_vm4 = vmor %vm9610_vm1, %vm1221_vm9  ;;  %vm9618_vm1 = vnez %v9555_v18  ;;  %v9626_v18 = vmov 0  ;;  %2907 = vperm.xlu1 %3963, %v2828_v24   ;;  %v6452_v24 = vpop.permute.xlu1 %2652 }
 0x3fd   : > { %v9612_v22 = vsel %vm6296_vm4, 4294967295, %v9611_v22  ;;  %vm1645_vm13 = vmor %vm1453_vm10, %vm9614_vm8  ;;  %vm9638_vm8 = vcmp.eq.s32.totalorder %v9613_v17, %v5713_v19  ;;  %v9657_v17 = vmov 0 }
 0x3fe   : > { %vm6318_vm15 = vmor %vm9618_vm1, %vm1397_vm2  ;;  %vm9624_vm2 = vcmp.eq.s32.totalorder %v9604_v50, %v5713_v19  ;;  %vm9625_vm1 = vnez %v9563_v38  ;;  %v9631_v50 = vmov 0  ;;  %v9635_v38 = vmov 0 }
 0x3ff   : > { %v9620_v13 = vsel %vm6318_vm15, 4294967295, %v9619_v13  ;;  %vm1837_vm10 = vmor %vm1645_vm13, %vm1805_vm11  ;;  %vm9628_vm11 = vcmp.eq.s32.totalorder %v9606_v20, %v5713_v19  ;;  %vm1412_vm15 = vcmp.eq.s32.totalorder %v9647_v10, %v5713_v19  ;;  %v2719_v20 = vpop.permute.xlu0 %2718 }
 0x400   : > { %vm6330_vm9 = vmor %vm296_vm3, %vm9621_vm6  ;;  %vm9629_vm6 = vcmp.eq.s32.totalorder %v9608_v6, %v5713_v19  ;;  %vm9630_vm3 = vnez %v9566_v8  ;;  %v9640_v8 = vmov 0  ;;  %v9655_v6 = vld [vmem:[#allocation185_spill] sm:$0xff]  ;;  %3964 = vset.pattern.permute.xlu1 %v9417_v11 }
 0x401   : > { %v9623_v46 = vsel %vm6330_vm9, 4294967295, %v9622_v46  ;;  %vm6339_vm14 = vmor %vm9625_vm1, %vm9624_vm2  ;;  %vm9633_vm2 = vcmp.eq.s32.totalorder %v9609_v40, %v5713_v19  ;;  %v9656_v40 = vld [vmem:[#allocation257_spill] sm:$0xff] }
 0x402   : > { %v9627_v18 = vsel %vm6339_vm14, 4294967295, %v9626_v18  ;;  %vm2029_vm13 = vmor %vm1837_vm10, %vm9628_vm11  ;;  %vm9634_vm10 = vnez %v9569_v48  ;;  %vm1398_vm11 = vcmp.eq.s32.totalorder %v9637_v25, %v5713_v19  ;;  %v9645_v48 = vmov 0  ;;  %v9663_v25 = vld [vmem:[#allocation66_spill] sm:$0xff] }
 0x403   : > { %vm6354_vm9 = vmor %vm9630_vm3, %vm9629_vm6  ;;  %vm9639_vm6 = vnez %v9574_v15  ;;  %v9648_v15 = vld [vmem:[#allocation197_spill] sm:$0xff]  ;;  %v6454_v10 = vpop.permute.xlu0 %2727 }
 0x404   : > { %v9632_v50 = vsel %vm6354_vm9, 4294967295, %v9631_v50  ;;  %vm6363_vm1 = vmor %vm9634_vm10, %vm9633_vm2  ;;  %vm9642_vm9 = vcmp.eq.s32.totalorder %v9615_v9, %v5713_v19  ;;  %vm9643_vm2 = vcmp.eq.s32.totalorder %v9617_v5, %v5713_v19  ;;  %vm9644_vm10 = vnez %v9579_v52  ;;  %v9650_v9 = vld [vmem:[#allocation196_spill] sm:$0xff]  ;;  %v9651_v52 = vld [vmem:[#allocation239_spill] sm:$0xff]  ;;  %9669 = vst [vmem:[#allocation64_spill] sm:$0xff] %v6454_v10 }
 0x405   : > { %v9636_v38 = vsel %vm6363_vm1, 4294967295, %v9635_v38  ;;  %vm6374_vm3 = vmor %vm9639_vm6, %vm9638_vm8  ;;  %vm1425_vm8 = vcmp.eq.s32.totalorder %v9648_v15, %v5713_v19  ;;  %vm9649_vm6 = vcmp.eq.s32.totalorder %v5637_v61, %v5713_v19  ;;  %v3003_v5 = vadd.s32 87, %v6197_v63  ;;  %v9668_v63 = vld [vmem:[#allocation318_spill] sm:$0xff]  ;;  %v9717_v61 = vld [vmem:[#allocation243_spill] sm:$0xff] }
 0x406   : > { %v9641_v8 = vsel %vm6374_vm3, 4294967295, %v9640_v8  ;;  %vm2221_vm14 = vmor %vm2029_vm13, %vm9642_vm9  ;;  %vm1617_vm13 = vcmp.eq.s32.totalorder %v9651_v52, %v5713_v19  ;;  %v9671_v15 = vld [vmem:[#allocation82_spill] sm:$0xff] }
 0x407   : > { %vm6386_vm1 = vmor %vm9644_vm10, %vm9643_vm2  ;;  %vm9652_vm2 = vcmp.eq.s32.totalorder %v5690_v21, %v5713_v19  ;;  %v9676_v52 = vld [vmem:[#allocation98_spill] sm:$0xff]  ;;  %3048 = vperm.xlu1 %3964, %v3003_v5   ;;  %v2731_v5 = vpop.permute.xlu0 %2730 }
 0x408   : > { %v9646_v48 = vsel %vm6386_vm1, 4294967295, %v9645_v48  ;;  %vm2413_vm3 = vmor %vm2221_vm14, %vm9649_vm6  ;;  %vm2765_vm1 = vcmp.eq.s32.totalorder %v2719_v20, %v5713_v19  ;;  %vm1413_vm14 = vcmp.eq.s32.totalorder %v9655_v6, %v5713_v19  ;;  %vm1809_vm6 = vcmp.eq.s32.totalorder %v9656_v40, %v5713_v19  ;;  %v4044_v40 = vld [vmem:[%s4117_s15 + $0x38] sm:$0xff]  ;;  %v9722_v21 = vld [vmem:[#allocation250_spill] sm:$0xff] }
 0x409   : > { %vm2605_vm10 = vmor %vm2413_vm3, %vm9652_vm2  ;;  %vm2001_vm2 = vcmp.eq.s32.totalorder %v9662_v3, %v5713_v19  ;;  %v9685_v6 = vmov 0  ;;  %v9700_v3 = vld [vmem:[#allocation212_spill] sm:$0xff] }
 0x40a   : > { %vm6409_vm4 = vmor %vm6231_vm12, %vm1398_vm11  ;;  %vm1589_vm11 = vcmp.eq.s32.totalorder %v9661_v57, %v5713_v19  ;;  %v9690_v57 = vmov 0 }
 0x40b   : > { %vm6417_vm9 = vmor %vm2605_vm10, %vm2765_vm1  ;;  %vm648_vm1 = vcmp.eq.s32.totalorder %v9663_v25, %v5713_v19  ;;  %v9706_v25 = vld [vmem:[#allocation215_spill] sm:$0xff] }
 0x40c   : > { %v9658_v17 = vsel %vm6417_vm9, 4294967295, %v9657_v17  ;;  %vm6423_vm3 = vmor %vm6246_vm5, %vm1412_vm15  ;;  %vm9664_vm5 = vcmp.eq.s32.totalorder %v9650_v9, %v5713_v19  ;;  %v9675_v9 = vld [vmem:[#allocation211_spill] sm:$0xff] }
 0x40d   : > { %vm1457_vm12 = vmor %vm6252_vm0, %vm1425_vm8  ;;  %vm9672_vm0 = vnez %v9612_v22  ;;  %v9741_v22 = vld [vmem:[#allocation260_spill] sm:$0xff] }
 0x40e   : > { %vm6441_vm15 = vmor %vm6272_vm7, %vm9664_vm5 }
 0x40f   : > { %vm1649_vm8 = vmor %vm1457_vm12, %vm1617_vm13 }
 0x410   : > { %vm6465_vm13 = vmor %vm9672_vm0, %vm1413_vm14  ;;  %vm9677_vm14 = vnez %v9620_v13  ;;  %v9681_v13 = vmov 0 }
 0x411   : > { %vm1841_vm10 = vmor %vm1649_vm8, %vm1809_vm6  ;;  %vm9680_vm8 = vnez %v9623_v46  ;;  %v3004_v46 = vadd.s32 87, %v4044_v40  ;;  %v9719_v40 = vld [vmem:[#allocation95_spill] sm:$0xff] }
 0x412   : > { %vm6483_vm0 = vmor %vm9677_vm14, %vm1589_vm11  ;;  %vm9683_vm11 = vcmp.eq.s32.totalorder %v9667_v55, %v5713_v19  ;;  %vm9684_vm14 = vnez %v9627_v18  ;;  %v9694_v18 = vmov 0  ;;  %v9709_v55 = vmov 0 }
 0x413   : > { %vm2033_vm12 = vmor %vm1841_vm10, %vm2001_vm2  ;;  %vm9687_vm10 = vcmp.eq.s32.totalorder %v9668_v63, %v5713_v19  ;;  %v9713_v63 = vld [vmem:[#allocation228_spill] sm:$0xff]  ;;  %3051 = vperm.xlu1 %3964, %v3004_v46   ;;  %v9723_v46 = vld [vmem:[#allocation114_spill] sm:$0xff] }
 0x414   : > { %vm6498_vm5 = vmor %vm9680_vm8, %vm648_vm1  ;;  %vm9688_vm1 = vcmp.eq.s32.totalorder %v9670_v56, %v5713_v19  ;;  %vm9689_vm8 = vnez %v9636_v38  ;;  %v9698_v38 = vmov 0  ;;  %v9714_v56 = vmov 0 }
 0x415   : > { %v9682_v13 = vsel %vm6498_vm5, 4294967295, %v9681_v13  ;;  %vm6507_vm2 = vmor %vm9684_vm14, %vm9683_vm11  ;;  %vm9692_vm11 = vcmp.eq.s32.totalorder %v9671_v15, %v5713_v19  ;;  %vm9693_vm14 = vnez %v9632_v50  ;;  %v6547_v50 = vpop.permute.xlu1 %2658  ;;  %v9716_v15 = vld [vmem:[#allocation232_spill] sm:$0xff] }
 0x416   : > { %v9686_v6 = vsel %vm6507_vm2, 4294967295, %v9685_v6  ;;  %vm2225_vm6 = vmor %vm2033_vm12, %vm9687_vm10  ;;  %vm9696_vm12 = vcmp.eq.s32.totalorder %v9675_v9, %v5713_v19  ;;  %vm9697_vm10 = vnez %v9641_v8  ;;  %v9766_v8 = vld [vmem:[#allocation271_spill] sm:$0xff] }
 0x417   : > { %vm6520_vm7 = vmor %vm9689_vm8, %vm9688_vm1  ;;  %vm1590_vm1 = vcmp.eq.s32.totalorder %v9700_v3, %v5713_v19  ;;  %vm9701_vm8 = vcmp.eq.s32.totalorder %v5662_v7, %v5713_v19  ;;  %v9708_v7 = vld [vmem:[#allocation217_spill] sm:$0xff]  ;;  %v9724_v3 = vld [vmem:[#allocation116_spill] sm:$0xff] }
 0x418   : > { %v9691_v57 = vsel %vm6520_vm7, 4294967295, %v9690_v57  ;;  %vm6529_vm9 = vmor %vm9693_vm14, %vm9692_vm11  ;;  %vm9702_vm11 = vcmp.eq.s32.totalorder %v9676_v52, %v5713_v19  ;;  %vm9703_vm14 = vnez %v9646_v48  ;;  %v6591_v52 = vpop.permute.xlu0 %2739  ;;  %v9777_v48 = vld [vmem:[#allocation277_spill] sm:$0xff] }
 0x419   : > { %v9695_v18 = vsel %vm6529_vm9, 4294967295, %v9694_v18  ;;  %vm6538_vm2 = vmor %vm9697_vm10, %vm9696_vm12  ;;  %vm1604_vm12 = vcmp.eq.s32.totalorder %v9706_v25, %v5713_v19  ;;  %vm9707_vm10 = vcmp.eq.s32.totalorder %v5702_v31, %v5713_v19  ;;  %v3020_v31 = vadd.s32 87, %v5514_v35  ;;  %v6589_v9 = vpop.permute.xlu1 %2664  ;;  %9718 = vst [vmem:[#allocation65_spill] sm:$0xff] %v6591_v52  ;;  %v9728_v25 = vld [vmem:[#allocation254_spill] sm:$0xff]  ;;  %v9793_v52 = vld [vmem:[#allocation315_spill] sm:$0xff] }
 0x41a   : > { %v9699_v38 = vsel %vm6538_vm2, 4294967295, %v9698_v38  ;;  %vm2417_vm7 = vmor %vm2225_vm6, %vm9701_vm8  ;;  %vm2769_vm6 = vcmp.eq.s32.totalorder %v2731_v5, %v5713_v19  ;;  %vm1606_vm8 = vcmp.eq.s32.totalorder %v9708_v7, %v5713_v19  ;;  %v9720_v35 = vmov 0  ;;  %v9729_v7 = vld [vmem:[#allocation125_spill] sm:$0xff] }
 0x41b   : > { %vm6554_vm9 = vmor %vm9703_vm14, %vm9702_vm11  ;;  %vm1605_vm14 = vcmp.eq.s32.totalorder %v9713_v63, %v5713_v19  ;;  %3099 = vperm.xlu1 %3964, %v3020_v31   ;;  %v9755_v31 = vld [vmem:[#allocation261_spill] sm:$0xff]  ;;  %v9794_v5 = vmov 0  ;;  %v9841_v63 = vld [vmem:[#allocation182_spill] sm:$0xff] }
 0x41c   : > { %vm2609_vm2 = vmor %vm2417_vm7, %vm9707_vm10 }
 0x41d   : > { %vm6566_vm5 = vmor %vm2609_vm2, %vm2769_vm6  ;;  %vm1782_vm2 = vcmp.eq.s32.totalorder %v9716_v15, %v5713_v19  ;;  %v9734_v15 = vld [vmem:[#allocation258_spill] sm:$0xff]  ;;  %vm9735_vm6 = vnez %v9682_v13  ;;  %v9744_v13 = vmov 0 }
 0x41e   : > { %v9710_v55 = vsel %vm6566_vm5, 4294967295, %v9709_v55  ;;  %vm6572_vm11 = vmor %vm6409_vm4, %vm1590_vm1  ;;  %vm1781_vm4 = vcmp.eq.s32.totalorder %v9717_v61, %v5713_v19  ;;  %vm840_vm1 = vcmp.eq.s32.totalorder %v9719_v40, %v5713_v19  ;;  %v9736_v61 = vmov 0  ;;  %v6647_v40 = vpop.permute.xlu1 %2670 }
 0x41f   : > { %vm6581_vm7 = vmor %vm6423_vm3, %vm1604_vm12  ;;  %vm1788_vm3 = vcmp.eq.s32.totalorder %v9722_v21, %v5713_v19  ;;  %v2638_v21 = vadd.s32 77, %v5523_v1  ;;  %v9750_v1 = vmov 0  ;;  %3965 = vset.pattern.permute.xlu1 %v9391_v47 }
 0x420   : > { %v9715_v56 = vsel %vm6581_vm7, 4294967295, %v9714_v56  ;;  %vm6597_vm10 = vmor %vm6441_vm15, %vm1606_vm8  ;;  %vm1797_vm15 = vcmp.eq.s32.totalorder %v9727_v27, %v5713_v19  ;;  %vm1792_vm8 = vcmp.eq.s32.totalorder %v9728_v25, %v5713_v19  ;;  %v9769_v27 = vld [vmem:[#allocation275_spill] sm:$0xff]  ;;  %v9771_v25 = vmov 0 }
 0x421   : > { %v9721_v35 = vsel %vm6597_vm10, 4294967295, %v9720_v35  ;;  %vm6609_vm5 = vmor %vm6465_vm13, %vm1605_vm14  ;;  %vm1796_vm14 = vcmp.eq.s32.totalorder %v9734_v15, %v5713_v19  ;;  %2721 = vperm.xlu1 %3965, %v2638_v21   ;;  %v4045_v15 = vld [vmem:[%s4117_s15 + $0x40] sm:$0xff]  ;;  %v9775_v21 = vmov 0 }
 0x422   : > { %vm6621_vm12 = vmor %vm6572_vm11, %vm1782_vm2  ;;  %vm9738_vm11 = vnez %v9686_v6  ;;  %v9837_v6 = vmov 0 }
 0x423   : > { %vm6627_vm13 = vmor %vm6483_vm0, %vm1781_vm4  ;;  %vm1798_vm0 = vcmp.eq.s32.totalorder %v9741_v22, %v5713_v19  ;;  %vm9742_vm4 = vcmp.eq.s32.totalorder %v9723_v46, %v5713_v19  ;;  %v2813_v22 = vadd.s32 84, %v4045_v15  ;;  %v9825_v15 = vld [vmem:[#allocation27_spill] sm:$0xff] }
 0x424   : > { %vm6635_vm7 = vmor %vm9735_vm6, %vm840_vm1  ;;  %vm9743_vm1 = vnez %v9695_v18  ;;  %v9782_v18 = vld [vmem:[#allocation292_spill] sm:$0xff] }
 0x425   : > { %v9737_v61 = vsel %vm6635_vm7, 4294967295, %v9736_v61  ;;  %vm6641_vm2 = vmor %vm9738_vm11, %vm1788_vm3  ;;  %vm9746_vm3 = vcmp.eq.s32.totalorder %v9724_v3, %v5713_v19  ;;  %vm9747_vm11 = vnez %v9691_v57  ;;  %v6682_v57 = vpop.permute.xlu0 %2838  ;;  %v9762_v3 = vld [vmem:[#allocation267_spill] sm:$0xff]  ;;  %3966 = vset.pattern.permute.xlu1 %v9408_v62 }
 0x426   : > { %vm6655_vm6 = vmor %vm9743_vm1, %vm9742_vm4  ;;  %vm9752_vm4 = vnez %v9699_v38  ;;  %2862 = vperm.xlu1 %3966, %v2813_v22   ;;  %v9803_v22 = vld [vmem:[#allocation293_spill] sm:$0xff] }
 0x427   : > { %v9745_v13 = vsel %vm6655_vm6, 4294967295, %v9744_v13  ;;  %vm6664_vm10 = vmor %vm9747_vm11, %vm9746_vm3  ;;  %vm1973_vm6 = vcmp.eq.s32.totalorder %v9755_v31, %v5713_v19  ;;  %vm9756_vm3 = vcmp.eq.s32.totalorder %v9729_v7, %v5713_v19  ;;  %vm1980_vm11 = vcmp.eq.s32.totalorder %v9762_v3, %v5713_v19  ;;  %v9773_v7 = vld [vmem:[#allocation276_spill] sm:$0xff]  ;;  %v9778_v3 = vld [vmem:[#allocation141_spill] sm:$0xff] }
 0x428   : > { %vm6670_vm7 = vmor %vm6609_vm5, %vm1797_vm15  ;;  %vm9759_vm15 = vnez %v9715_v56  ;;  %v9774_v31 = vld [vmem:[#allocation132_spill] sm:$0xff] }
 0x429   : > { %v9751_v1 = vsel %vm6670_vm7, 4294967295, %v9750_v1  ;;  %vm6676_vm1 = vmor %vm9752_vm4, %vm1792_vm8  ;;  %vm9763_vm4 = vnez %v9721_v35  ;;  %v6718_v35 = vpop.permute.xlu1 %2676  ;;  %v6728_v20 = vpop.permute.xlu0 %2889 }
 0x42a   : > { %vm6689_vm5 = vmor %vm6554_vm9, %vm9756_vm3  ;;  %vm1984_vm9 = vcmp.eq.s32.totalorder %v9766_v8, %v5713_v19  ;;  %vm1988_vm3 = vcmp.eq.s32.totalorder %v9769_v27, %v5713_v19  ;;  %9770 = vst [vmem:[#allocation69_spill] sm:$0xff] %v6718_v35  ;;  %v9779_v8 = vld [vmem:[#allocation148_spill] sm:$0xff]  ;;  %v9830_v35 = vld [vmem:[#allocation157_spill] sm:$0xff]  ;;  %v9832_v27 = vmov 0 }
 0x42b   : > { %vm6695_vm8 = vmor %vm9759_vm15, %vm1796_vm14  ;;  %vm1974_vm15 = vcmp.eq.s32.totalorder %v9773_v7, %v5713_v19  ;;  %v9783_v7 = vld [vmem:[#allocation164_spill] sm:$0xff] }
 0x42c   : > { %vm6703_vm7 = vmor %vm9763_vm4, %vm1798_vm0 }
 0x42d   : > { %vm6712_vm14 = vmor %vm6627_vm13, %vm1973_vm6  ;;  %vm1032_vm13 = vcmp.eq.s32.totalorder %v9774_v31, %v5713_v19  ;;  %v9786_v31 = vld [vmem:[#allocation307_spill] sm:$0xff]  ;;  %v6764_v38 = vpop.permute.xlu1 %2682  ;;  %v6780_v10 = vpop.permute.xlu0 %2847 }
 0x42e   : > { %vm6722_vm0 = vmor %vm6641_vm2, %vm1980_vm11  ;;  %vm1990_vm2 = vcmp.eq.s32.totalorder %v9777_v48, %v5713_v19  ;;  %vm1208_vm11 = vcmp.eq.s32.totalorder %v9778_v3, %v5713_v19  ;;  %9787 = vst [vmem:[#allocation73_spill] sm:$0xff] %v6764_v38  ;;  %v9804_v3 = vld [vmem:[#allocation319_spill] sm:$0xff]  ;;  %v9866_v48 = vmov 0 }
 0x42f   : > { %v9772_v25 = vsel %vm6722_vm0, 4294967295, %v9771_v25  ;;  %vm6735_vm6 = vmor %vm6676_vm1, %vm1984_vm9  ;;  %vm1989_vm1 = vcmp.eq.s32.totalorder %v9782_v18, %v5713_v19  ;;  %v9812_v18 = vld [vmem:[#allocation306_spill] sm:$0xff] }
 0x430   : > { %v9776_v21 = vsel %vm6735_vm6, 4294967295, %v9775_v21  ;;  %vm6747_vm0 = vmor %vm6695_vm8, %vm1988_vm3  ;;  %vm9788_vm8 = vnez %v9737_v61  ;;  %v2814_v61 = vadd.s32 84, %v6783_v60 }
 0x431   : > { %vm6757_vm6 = vmor %vm6621_vm12, %vm1974_vm15  ;;  %vm2172_vm12 = vcmp.eq.s32.totalorder %v9793_v52, %v5713_v19  ;;  %v9798_v52 = vmov 0  ;;  %v6847_v56 = vpop.permute.xlu1 %2688 }
 0x432   : > { %vm6768_vm3 = vmor %vm9788_vm8, %vm1032_vm13  ;;  %vm9797_vm13 = vnez %v9745_v13  ;;  %vm9800_vm8 = vnez %v9751_v1  ;;  %v9806_v13 = vmov 0  ;;  %9817 = vst [vmem:[#allocation77_spill] sm:$0xff] %v6847_v56  ;;  %2865 = vperm.xlu1 %3966, %v2814_v61   ;;  %v9824_v56 = vld [vmem:[#allocation4_spill] sm:$0xff]  ;;  %v9828_v61 = vld [vmem:[#allocation5_spill] sm:$0xff] }
 0x433   : > { %vm6774_vm9 = vmor %vm6703_vm7, %vm1990_vm2  ;;  %vm9796_vm7 = vcmp.eq.s32.totalorder %v9779_v8, %v5713_v19  ;;  %v9811_v8 = vld [vmem:[#allocation323_spill] sm:$0xff] }
 0x434   : > { %vm6791_vm15 = vmor %vm6664_vm10, %vm1208_vm11  ;;  %vm2166_vm10 = vcmp.eq.s32.totalorder %v9803_v22, %v5713_v19  ;;  %vm2176_vm11 = vcmp.eq.s32.totalorder %v9804_v3, %v5713_v19  ;;  %v2899_v3 = vpop.permute.xlu0 %2898 }
 0x435   : > { %v9795_v5 = vsel %vm6791_vm15, 4294967295, %v9794_v5  ;;  %vm6800_vm2 = vmor %vm9797_vm13, %vm9796_vm7  ;;  %vm9805_vm7 = vcmp.eq.s32.totalorder %v9783_v7, %v5713_v19  ;;  %vm2180_vm15 = vcmp.eq.s32.totalorder %v9811_v8, %v5713_v19  ;;  %v9816_v7 = vld [vmem:[#allocation325_spill] sm:$0xff]  ;;  %v4047_v8 = vld [vmem:[%s4117_s15 + $0xc8] sm:$0xff] }
 0x436   : > { %v9799_v52 = vsel %vm6800_vm2, 4294967295, %v9798_v52  ;;  %vm6809_vm4 = vmor %vm9800_vm8, %vm1989_vm1  ;;  %vm9808_vm1 = vcmp.eq.s32.totalorder %v9786_v31, %v5713_v19  ;;  %v2830_v38 = vadd.s32 84, %v4047_v8  ;;  %v9829_v8 = vld [vmem:[#allocation26_spill] sm:$0xff]  ;;  %v9892_v31 = vld [vmem:[#allocation49_spill] sm:$0xff] }
 0x437   : > { %vm6822_vm13 = vmor %vm6689_vm5, %vm9805_vm7  ;;  %vm9813_vm5 = vnez %v9772_v25  ;;  %v9823_v25 = vld [vmem:[#allocation328_spill] sm:$0xff] }
 0x438   : > { %v9807_v13 = vsel %vm6822_vm13, 4294967295, %v9806_v13  ;;  %vm6831_vm8 = vmor %vm6712_vm14, %vm9808_vm1  ;;  %vm2182_vm13 = vcmp.eq.s32.totalorder %v9816_v7, %v5713_v19  ;;  %vm9820_vm1 = vnez %v9776_v21  ;;  %v9840_v7 = vld [vmem:[#allocation180_spill] sm:$0xff]  ;;  %2913 = vperm.xlu1 %3966, %v2830_v38   ;;  %v2860_v46 = vpop.permute.xlu0 %2859  ;;  %v3006_v21 = vadd.s32 87, %v6783_v60  ;;  %v9894_v60 = vld [vmem:[#allocation198_spill] sm:$0xff] }
 0x439   : > { %vm6841_vm7 = vmor %vm9813_vm5, %vm2172_vm12  ;;  %vm9836_vm5 = vnez %v9600_v39  ;;  %v6922_v39 = vpop.permute.xlu1 %2694  ;;  %v9859_v38 = vld [vmem:[#allocation336_spill] sm:$0xff] }
 0x43a   : > { %vm6851_vm14 = vmor %vm6757_vm6, %vm2166_vm10  ;;  %vm9843_vm6 = vcmp.eq.s32.totalorder %v9823_v25, %v5713_v19  ;;  %v9849_v25 = vld [vmem:[#allocation332_spill] sm:$0xff] }
 0x43b   : > { %vm6857_vm2 = vmor %vm9820_vm1, %vm2176_vm11  ;;  %vm2953_vm1 = vcmp.eq.s32.totalorder %v2899_v3, %v5713_v19  ;;  %v9834_v3 = vmov 0 }
 0x43c   : > { %vm6870_vm10 = vmor %vm6747_vm0, %vm2180_vm15  ;;  %vm9831_vm0 = vcmp.eq.s32.totalorder %v9812_v18, %v5713_v19  ;;  %v9839_v18 = vld [vmem:[#allocation37_spill] sm:$0xff]  ;;  %3967 = vset.pattern.permute.xlu1 %v9417_v11  ;;  %v2911_v22 = vpop.permute.xlu0 %2910 }
 0x43d   : > { %vm6888_vm15 = vmor %vm6809_vm4, %vm9831_vm0  ;;  %vm9845_vm0 = vcmp.eq.s32.totalorder %v9824_v56, %v5713_v19  ;;  %v9854_v56 = vmov 0  ;;  %v7027_v1 = vpop.permute.xlu1 %2700 }
 0x43e   : > { %v9833_v27 = vsel %vm6888_vm15, 4294967295, %v9832_v27  ;;  %vm6897_vm12 = vmor %vm6774_vm9, %vm2182_vm13  ;;  %vm9856_vm9 = vcmp.eq.s32.totalorder %v9830_v35, %v5713_v19  ;;  %vm9860_vm13 = vcmp.eq.s32.totalorder %v5834_v29, %v5713_v19  ;;  %v9936_v29 = vmov 0  ;;  %v9999_v35 = vld [vmem:[#allocation111_spill] sm:$0xff] }
 0x43f   : > { %v9835_v3 = vsel %vm6897_vm12, 4294967295, %v9834_v3  ;;  %vm6905_vm11 = vmor %vm9836_vm5, %vm2953_vm1  ;;  %vm9844_vm1 = vcmp.eq.s32.totalorder %v9825_v15, %v5713_v19  ;;  %v9851_v15 = vld [vmem:[#allocation15_spill] sm:$0xff] }
 0x440   : > { %v9838_v6 = vsel %vm6905_vm11, 4294967295, %v9837_v6  ;;  %vm2396_vm5 = vmor %vm6841_vm7, %vm9843_vm6  ;;  %vm9850_vm7 = vcmp.eq.s32.totalorder %v5706_v2, %v5713_v19  ;;  %vm298_vm11 = vcmp.eq.s32.totalorder %v9851_v15, %v5713_v19  ;;  %v9857_v2 = vmov 0 }
 0x441   : > { %vm6930_vm4 = vmor %vm9845_vm0, %vm9844_vm1  ;;  %vm9852_vm0 = vcmp.eq.s32.totalorder %v9829_v8, %v5713_v19  ;;  %vm9853_vm1 = vcmp.eq.s32.totalorder %v9828_v61, %v5713_v19  ;;  %v4048_v61 = vld [vmem:[%s4117_s15 + $0xc0] sm:$0xff]  ;;  %v9900_v15 = vmov 0 }
 0x442   : > { %v9847_v16 = vsel %vm6930_vm4, 4294967295, %v9846_v16  ;;  %vm2588_vm6 = vmor %vm2396_vm5, %vm9850_vm7  ;;  %vm2372_vm7 = vcmp.eq.s32.totalorder %v9859_v38, %v5713_v19  ;;  %v3021_v8 = vadd.s32 87, %v4048_v61  ;;  %v9907_v61 = vld [vmem:[#allocation214_spill] sm:$0xff] }
 0x443   : > { %vm6949_vm4 = vmor %vm9853_vm1, %vm9852_vm0  ;;  %vm2940_vm0 = vcmp.eq.s32.totalorder %v2860_v46, %v5713_v19  ;;  %vm9861_vm1 = vcmp.eq.s32.totalorder %v9839_v18, %v5713_v19  ;;  %v9875_v18 = vld [vmem:[#allocation341_spill] sm:$0xff]  ;;  %v9893_v46 = vld [vmem:[#allocation68_spill] sm:$0xff] }
 0x444   : > { %v9855_v56 = vsel %vm6949_vm4, 4294967295, %v9854_v56  ;;  %vm6958_vm5 = vmor %vm6768_vm3, %vm9856_vm9  ;;  %vm9864_vm3 = vcmp.eq.s32.totalorder %v9840_v7, %v5713_v19  ;;  %vm9865_vm9 = vnez %v9799_v52  ;;  %v9876_v7 = vmov 0  ;;  %3102 = vperm.xlu1 %3967, %v3021_v8   ;;  %v9913_v8 = vld [vmem:[#allocation230_spill] sm:$0xff] }
 0x445   : > { %v9858_v2 = vsel %vm6958_vm5, 4294967295, %v9857_v2  ;;  %vm2780_vm15 = vmor %vm2588_vm6, %vm9860_vm13  ;;  %vm9868_vm13 = vcmp.eq.s32.totalorder %v9841_v63, %v5713_v19  ;;  %vm9869_vm6 = vnez %v9795_v5  ;;  %v9888_v63 = vld [vmem:[#allocation52_spill] sm:$0xff]  ;;  %v9998_v5 = vld [vmem:[#allocation118_spill] sm:$0xff] }
 0x446   : > { %vm6972_vm4 = vmor %vm298_vm11, %vm9861_vm1  ;;  %vm9872_vm11 = vcmp.eq.s32.totalorder %v9842_v49, %v5713_v19  ;;  %v7231_v49 = vld [vmem:[%s4117_s15 + $0x50] sm:$0xff]  ;;  %v10029_v38 = vld [vmem:[#allocation6_spill] sm:$0xff] }
 0x447   : > { %vm6981_vm5 = vmor %vm9865_vm9, %vm9864_vm3  ;;  %vm2358_vm3 = vcmp.eq.s32.totalorder %v9875_v18, %v5713_v19 }
 0x448   : > { %v9867_v48 = vsel %vm6981_vm5, 4294967295, %v9866_v48  ;;  %vm6990_vm12 = vmor %vm9869_vm6, %vm9868_vm13  ;;  %vm9878_vm13 = vcmp.eq.s32.totalorder %v9848_v34, %v5713_v19  ;;  %vm9879_vm6 = vnez %v9807_v13  ;;  %v9887_v13 = vld [vmem:[#allocation338_spill] sm:$0xff]  ;;  %3057 = vperm.xlu1 %3967, %v3006_v21   ;;  %v2815_v34 = vadd.s32 84, %v7231_v49  ;;  %v9955_v21 = vld [vmem:[#allocation245_spill] sm:$0xff] }
 0x449   : > { %vm6999_vm1 = vmor %vm6831_vm8, %vm9872_vm11  ;;  %vm9882_vm8 = vcmp.eq.s32.totalorder %v9849_v25, %v5713_v19  ;;  %v9890_v25 = vmov 0 }
 0x44a   : > { %vm7005_vm9 = vmor %vm2780_vm15, %vm2940_vm0 }
 0x44b   : > { %v9877_v7 = vsel %vm7005_vm9, 4294967295, %v9876_v7  ;;  %vm7014_vm5 = vmor %vm9879_vm6, %vm9878_vm13  ;;  %vm9889_vm13 = vnez %v9658_v17  ;;  %v9897_v17 = vmov 0 }
 0x44c   : > { %vm7023_vm11 = vmor %vm6857_vm2, %vm9882_vm8  ;;  %vm9895_vm8 = vcmp.eq.s32.totalorder %v9887_v13, %v5713_v19  ;;  %vm9896_vm2 = vnez %v9835_v3  ;;  %v9906_v3 = vld [vmem:[#allocation203_spill] sm:$0xff]  ;;  %3968 = vset.pattern.permute.xlu1 %v9391_v47  ;;  %v9952_v13 = vld [vmem:[#allocation84_spill] sm:$0xff] }
 0x44d   : > { %vm7031_vm15 = vmor %vm6870_vm10, %vm2372_vm7  ;;  %vm2957_vm7 = vcmp.eq.s32.totalorder %v2911_v22, %v5713_v19  ;;  %vm9903_vm10 = vnez %v9833_v27  ;;  %v9911_v27 = vmov 0  ;;  %v9953_v22 = vld [vmem:[#allocation97_spill] sm:$0xff] }
 0x44e   : > { %vm2390_vm6 = vmor %vm6851_vm14, %vm2358_vm3  ;;  %vm9902_vm3 = vcmp.eq.s32.totalorder %v5595_v4, %v5713_v19  ;;  %v7102_v4 = vpop.permute.xlu1 %2886 }
 0x44f   : > { %vm7054_vm0 = vmor %vm9889_vm13, %vm2957_vm7  ;;  %vm9899_vm13 = vcmp.eq.s32.totalorder %v5586_v41, %v5713_v19  ;;  %v2872_v41 = vpop.permute.xlu0 %2871 }
 0x450   : > { %v9891_v25 = vsel %vm7054_vm0, 4294967295, %v9890_v25  ;;  %vm7069_vm9 = vmor %vm9896_vm2, %vm9895_vm8  ;;  %vm9908_vm0 = vcmp.eq.s32.totalorder %v5733_v12, %v5713_v19  ;;  %vm9910_vm8 = vnez %v9847_v16  ;;  %v4085_v16 = vmov 0.0  }
 0x451   : > { %v9898_v17 = vsel %vm7069_vm9, 4294967295, %v9897_v17  ;;  %vm7076_vm7 = vmor %vm2390_vm6, %vm9899_vm13  ;;  %vm9915_vm9 = vcmp.eq.s32.totalorder %v9892_v31, %v5713_v19  ;;  %vm9919_vm13 = vcmp.eq.s32.totalorder %v9894_v60, %v5713_v19  ;;  %vm9920_vm6 = vnez %v9858_v2  ;;  %v4051_v2 = vld [vmem:[%s4117_s15 + $0xd8] sm:$0xff] }
 0x452   : > { %v9901_v15 = vsel %vm7076_vm7, 4294967295, %v9900_v15  ;;  %vm7085_vm14 = vmor %vm9903_vm10, %vm9902_vm3  ;;  %vm9909_vm3 = vcmp.eq.s32.totalorder %v9888_v63, %v5713_v19  ;;  %vm2944_vm7 = vcmp.eq.s32.totalorder %v2872_v41, %v5713_v19  ;;  %v9981_v41 = vmov 0 }
 0x453   : > { %vm2592_vm10 = vmor %vm7023_vm11, %vm9908_vm0  ;;  %vm9914_vm11 = vcmp.eq.s32.totalorder %v5925_v14, %v5713_v19  ;;  %v9923_v14 = vmov 0  ;;  %v2923_v52 = vpop.permute.xlu0 %2922  ;;  %v10018_v63 = vmov 0 }
 0x454   : > { %vm7109_vm2 = vmor %vm9910_vm8, %vm9909_vm3  ;;  %vm9916_vm8 = vnez %v9855_v56  ;;  %v4049_v56 = vld [vmem:[%s4117_s15 + $0xd0] sm:$0xff] }
 0x455   : > { %v9912_v27 = vsel %vm7109_vm2, 4294967295, %v9911_v27  ;;  %vm2784_vm0 = vmor %vm2592_vm10, %vm9914_vm11  ;;  %v2639_v18 = vadd.s32 77, %v4049_v56 }
 0x456   : > { %vm7126_vm3 = vmor %vm9916_vm8, %vm9915_vm9  ;;  %vm9925_vm9 = vcmp.eq.s32.totalorder %v9893_v46, %v5713_v19  ;;  %v9964_v46 = vld [vmem:[#allocation247_spill] sm:$0xff] }
 0x457   : > { %vm7135_vm2 = vmor %vm9920_vm6, %vm9919_vm13  ;;  %vm9928_vm6 = vcmp.eq.s32.totalorder %v9906_v3, %v5713_v19  ;;  %vm9931_vm13 = vcmp.eq.s32.totalorder %v9907_v61, %v5713_v19  ;;  %2724 = vperm.xlu1 %3968, %v2639_v18   ;;  %v2884_v31 = vpop.permute.xlu0 %2883  ;;  %v2831_v61 = vadd.s32 84, %v4049_v56  ;;  %v9993_v56 = vmov 0 }
 0x458   : > { %vm7141_vm11 = vmor %vm2784_vm0, %vm2944_vm7  ;;  %vm9932_vm0 = vnez %v9867_v48  ;;  %v2842_v48 = vpop.permute.xlu1 %2841 }
 0x459   : > { %v9924_v14 = vsel %vm7141_vm11, 4294967295, %v9923_v14  ;;  %vm7151_vm8 = vmor %vm6972_vm4, %vm9925_vm9  ;;  %vm9935_vm4 = vcmp.eq.s32.totalorder %v5652_v53, %v5713_v19  ;;  %v9940_v53 = vmov 0 }
 0x45a   : > { %vm7160_vm7 = vmor %vm6990_vm12, %vm9928_vm6  ;;  %vm9938_vm12 = vcmp.eq.s32.totalorder %v5681_v32, %v5713_v19 }
 0x45b   : > { %vm7169_vm10 = vmor %vm9932_vm0, %vm9931_vm13  ;;  %vm2756_vm13 = vcmp.eq.s32.totalorder %v6021_v36, %v5713_v19  ;;  %vm9939_vm0 = vcmp.eq.s32.totalorder %v9913_v8, %v5713_v19  ;;  %v9950_v36 = vmov 0  ;;  %3969 = vset.pattern.permute.xlu1 %v9408_v62  ;;  %v9987_v8 = vmov 0 }
 0x45c   : > { %vm7178_vm9 = vmor %vm7085_vm14, %vm9935_vm4  ;;  %vm9942_vm14 = vcmp.eq.s32.totalorder %v5718_v30, %v5713_v19  ;;  %2868 = vperm.xlu1 %3969, %v2815_v34   ;;  %v10005_v30 = vld [vmem:[#allocation278_spill] sm:$0xff] }
 0x45d   : > { %v9937_v29 = vsel %vm7178_vm9, 4294967295, %v9936_v29  ;;  %vm2581_vm6 = vmor %vm6999_vm1, %vm9938_vm12  ;;  %vm9945_vm12 = vcmp.eq.s32.totalorder %v5824_v44, %v5713_v19  ;;  %v9948_v44 = vld [vmem:[#allocation81_spill] sm:$0xff]  ;;  %v10009_v34 = vld [vmem:[#allocation294_spill] sm:$0xff] }
 0x45e   : > { %vm7194_vm11 = vmor %vm7014_vm5, %vm9939_vm0 }
 0x45f   : > { %v9941_v53 = vsel %vm7194_vm11, 4294967295, %v9940_v53  ;;  %vm7201_vm4 = vmor %vm2581_vm6, %vm9942_vm14  ;;  %vm2961_vm11 = vcmp.eq.s32.totalorder %v2923_v52, %v5713_v19  ;;  %vm2933_vm14 = vcmp.eq.s32.totalorder %v6682_v57, %v5713_v19  ;;  %v9954_v57 = vld [vmem:[#allocation219_spill] sm:$0xff] }
 0x460   : > { %vm2596_vm5 = vmor %vm7031_vm15, %vm9945_vm12  ;;  %vm9949_vm15 = vnez %v9710_v55  ;;  %v9958_v55 = vmov 0  ;;  %2916 = vperm.xlu1 %3969, %v2831_v61   ;;  %v10004_v52 = vld [vmem:[#allocation263_spill] sm:$0xff]  ;;  %v10031_v61 = vld [vmem:[#allocation28_spill] sm:$0xff] }
 0x461   : > { %vm7216_vm6 = vmor %vm2596_vm5, %vm2756_vm13  ;;  %vm9960_vm13 = vcmp.eq.s32.totalorder %v6397_v43, %v5713_v19  ;;  %vm9961_vm5 = vnez %v9901_v15  ;;  %v3031_v43 = vpop.permute.xlu1 %3030  ;;  %v9972_v15 = vmov 0 }
 0x462   : > { %vm7226_vm12 = vmor %vm9949_vm15, %vm2961_vm11  ;;  %vm9956_vm11 = vcmp.eq.s32.totalorder %v5869_v28, %v5713_v19  ;;  %vm9957_vm15 = vnez %v9898_v17  ;;  %v9971_v17 = vld [vmem:[#allocation248_spill] sm:$0xff]  ;;  %vm3125_vm1 = vcmp.eq.s32.totalorder %v3031_v43, %v5713_v19  ;;  %v10026_v43 = vmov 0 }
 0x463   : > { %v9951_v36 = vsel %vm7226_vm12, 4294967295, %v9950_v36  ;;  %vm7247_vm12 = vmor %vm9957_vm15, %vm9956_vm11  ;;  %vm2948_vm15 = vcmp.eq.s32.totalorder %v2884_v31, %v5713_v19 }
 0x464   : > { %v9959_v55 = vsel %vm7247_vm12, 4294967295, %v9958_v55  ;;  %vm7256_vm9 = vmor %vm9961_vm5, %vm9960_vm13  ;;  %vm9967_vm13 = vcmp.eq.s32.totalorder %v9948_v44, %v5713_v19  ;;  %vm9968_vm5 = vnez %v9912_v27  ;;  %v9984_v27 = vmov 0  ;;  %v10059_v44 = vld [vmem:[#allocation17_spill] sm:$0xff] }
 0x465   : > { %vm7264_vm0 = vmor %vm7201_vm4, %vm2933_vm14  ;;  %v3034_v18 = vpop.permute.xlu1 %3033 }
 0x466   : > { %vm7276_vm12 = vmor %vm9968_vm5, %vm9967_vm13  ;;  %vm9974_vm5 = vcmp.eq.s32.totalorder %v9952_v13, %v5713_v19  ;;  %v10012_v13 = vld [vmem:[#allocation279_spill] sm:$0xff] }
 0x467   : > { %vm7286_vm11 = vmor %vm7216_vm6, %vm2948_vm15  ;;  %vm9977_vm6 = vcmp.eq.s32.totalorder %v9954_v57, %v5713_v19 }
 0x468   : > { %v9973_v15 = vsel %vm7286_vm11, 4294967295, %v9972_v15  ;;  %vm7297_vm4 = vmor %vm7126_vm3, %vm9974_vm5  ;;  %vm9980_vm3 = vcmp.eq.s32.totalorder %v9953_v22, %v5713_v19  ;;  %v10013_v22 = vld [vmem:[#allocation308_spill] sm:$0xff] }
 0x469   : > { %vm7306_vm15 = vmor %vm7135_vm2, %vm9977_vm6  ;;  %vm9983_vm2 = vcmp.eq.s32.totalorder %v9955_v21, %v5713_v19  ;;  %v3007_v21 = vadd.s32 87, %v7231_v49  ;;  %v10022_v49 = vld [vmem:[#allocation309_spill] sm:$0xff] }
 0x46a   : > { %vm3157_vm13 = vmor %vm7264_vm0, %vm3125_vm1  ;;  %vm9986_vm1 = vcmp.eq.s32.totalorder %v9964_v46, %v5713_v19  ;;  %v10024_v46 = vmov 0 }
 0x46b   : > { %vm7318_vm5 = vmor %vm7151_vm8, %vm9980_vm3  ;;  %vm9989_vm8 = vcmp.eq.s32.totalorder %v6922_v39, %v5713_v19  ;;  %vm9990_vm3 = vnez %v9937_v29  ;;  %v3684_v12 = vsel %vm3157_vm13, 1.0, %v4085_v16  ;;  %v3079_v39 = vpop.permute.xlu0 %3078  ;;  %vm2758_vm13 = vcmp.eq.s32.totalorder %v6066_v54, %v5713_v19  ;;  %v10000_v29 = vld [vmem:[#allocation262_spill] sm:$0xff] }
 0x46c   : > { %v9982_v41 = vsel %vm7318_vm5, 4294967295, %v9981_v41  ;;  %vm7327_vm6 = vmor %vm7169_vm10, %vm9983_vm2  ;;  %vm9991_vm10 = vcmp.eq.s32.totalorder %v9971_v17, %v5713_v19  ;;  %vm9992_vm2 = vnez %v9941_v53  ;;  %v3082_v53 = vpop.permute.xlu1 %3081  ;;  %v10028_v17 = vld [vmem:[#allocation143_spill] sm:$0xff] }
 0x46d   : > { %v9985_v27 = vsel %vm7327_vm6, 4294967295, %v9984_v27  ;;  %vm7336_vm0 = vmor %vm7160_vm7, %vm9986_vm1  ;;  %vm9995_vm7 = vcmask 785408   ;;  %vm9996_vm1 = vcmp.eq.s32.totalorder %v7102_v4, %v5713_v19  ;;  %v2832_v4 = vadd.s32 84, %v4051_v2 }
 0x46e   : > { %v9988_v8 = vsel %vm7336_vm0, 4294967295, %v9987_v8  ;;  %vm2789_vm14 = vmor %vm9990_vm3, %vm9989_vm8  ;;  %3818 = vmatprep.mubr.msk.f32.mxu0 %vm9995_vm7, %v3684_v12  ;;  %vm9997_vm3 = vcmp.eq.s32.totalorder %v2842_v48, %v5713_v19  ;;  %vm2950_vm7 = vcmp.eq.s32.totalorder %v6728_v20, %v5713_v19  ;;  %vm10001_vm0 = vnez %v9959_v55  ;;  %v10003_v48 = vld [vmem:[#allocation134_spill] sm:$0xff]  ;;  %v10061_v20 = vld [vmem:[#allocation173_spill] sm:$0xff] }
 0x46f   : > { %vm7351_vm11 = vmor %vm9992_vm2, %vm9991_vm10  ;;  %vm3126_vm10 = vcmp.eq.s32.totalorder %v3034_v18, %v5713_v19  ;;  %vm3141_vm2 = vcmp.eq.s32.totalorder %v3079_v39, %v5713_v19  ;;  %2919 = vperm.xlu1 %3969, %v2832_v4   ;;  %v10015_v55 = vmov 0  ;;  %v3085_v28 = vpop.permute.xlu0 %3084  ;;  %v3024_v12 = vadd.s32 87, %v4051_v2  ;;  %v10039_v18 = vld [vmem:[#allocation327_spill] sm:$0xff]  ;;  %v10047_v4 = vld [vmem:[#allocation340_spill] sm:$0xff] }
 0x470   : > { %v9994_v56 = vsel %vm7351_vm11, 4294967295, %v9993_v56  ;;  %vm2981_vm8 = vmor %vm2789_vm14, %vm9996_vm1  ;;  %vm1018_vm14 = vcmp.eq.s32.totalorder %v9998_v5, %v5713_v19  ;;  %v2845_v31 = vpop.permute.xlu1 %2844  ;;  %v10044_v2 = vmov 0  ;;  %v10048_v5 = vld [vmem:[#allocation343_spill] sm:$0xff]  ;;  %v10099_v39 = vld [vmem:[#allocation30_spill] sm:$0xff] }
 0x471   : > { %vm2966_vm6 = vmor %vm7256_vm9, %vm9997_vm3  ;;  %vm1017_vm9 = vcmp.eq.s32.totalorder %v9999_v35, %v5713_v19  ;;  %vm1800_vm3 = vcmp.eq.s32.totalorder %v10000_v29, %v5713_v19  ;;  %v10111_v29 = vmov 0 }
 0x472   : > { %vm3158_vm11 = vmor %vm2966_vm6, %vm3126_vm10  ;;  %vm10002_vm6 = vcmask 785408   ;;  %vm1034_vm10 = vcmp.eq.s32.totalorder %v10003_v48, %v5713_v19  ;;  %v10056_v48 = vld [vmem:[#allocation16_spill] sm:$0xff] }
 0x473   : > { %v3685_v54 = vsel %vm3158_vm11, 1.0, %v4085_v16  ;;  %vm3173_vm1 = vmor %vm2981_vm8, %vm3141_vm2  ;;  %vm1976_vm11 = vcmp.eq.s32.totalorder %v10004_v52, %v5713_v19  ;;  %3970 = vset.pattern.permute.xlu1 %v9417_v11  ;;  %v10057_v52 = vld [vmem:[#allocation39_spill] sm:$0xff] }
 0x474   : > { %vm2790_vm5 = vmor %vm10001_vm0, %vm2758_vm13  ;;  %3819 = vmatmul.mubr.msk.f32.vlgmr.msra.gmra.mrb[0].mxu0 %vm10002_vm6, %v3685_v54  ;;  %v3700_v32 = vsel %vm3173_vm1, 1.0, %v4085_v16  ;;  %vm3142_vm0 = vcmp.eq.s32.totalorder %v3082_v53, %v5713_v19  ;;  %3060 = vperm.xlu1 %3970, %v3007_v21   ;;  %v2893_v3 = vpop.permute.xlu1 %2892  ;;  %v10064_v21 = vld [vmem:[#allocation200_spill] sm:$0xff]  ;;  %v10113_v53 = vld [vmem:[#allocation295_spill] sm:$0xff] }
 0x475   : > { %vm2982_vm2 = vmor %vm2790_vm5, %vm2950_vm7  ;;  %vm1992_vm7 = vcmp.eq.s32.totalorder %v10012_v13, %v5713_v19  ;;  %v10062_v13 = vld [vmem:[#allocation365_spill] sm:$0xff] }
 0x476   : > { %vm10006_vm13 = vmmov %vm10002_vm6  ;;  %vm1991_vm6 = vcmp.eq.s32.totalorder %v10009_v34, %v5713_v19  ;;  %v10060_v34 = vld [vmem:[#allocation38_spill] sm:$0xff] }
 0x477   : > { %3842 = vmatprep.mubr.msk.f32.mxu1 %vm10006_vm13, %v3700_v32  ;;  %vm7397_vm1 = vmor %vm7276_vm12, %vm1018_vm14  ;;  %vm2183_vm14 = vcmp.eq.s32.totalorder %v10013_v22, %v5713_v19  ;;  %v7538_v32 = vld [vmem:[%s4117_s15 + $0xe8] sm:$0xff] }
 0x478   : > { %vm3174_vm8 = vmor %vm2982_vm2, %vm3142_vm0  ;;  %vm10021_vm2 = vnez %v9985_v27  ;;  %v7517_v35 = vpop.permute.xlu1 %2895  ;;  %v4057_v27 = vld [vmem:[%s4117_s15 + $0xf0] sm:$0xff] }
 0x479   : > { %vm7408_vm5 = vmor %vm7297_vm4, %vm1017_vm9  ;;  %v3701_v57 = vsel %vm3174_vm8, 1.0, %v4085_v16  ;;  %vm10014_vm4 = vnez %v9982_v41  ;;  %vm10020_vm8 = vcmp.eq.s32.totalorder %v10005_v30, %v5713_v19  ;;  %v10033_v41 = vld [vmem:[#allocation311_spill] sm:$0xff]  ;;  %v10058_v30 = vld [vmem:[#allocation184_spill] sm:$0xff] }
 0x47a   : > { %vm1832_vm12 = vmor %vm7306_vm15, %vm1800_vm3  ;;  %vm10017_vm15 = vnez %v9988_v8  ;;  %3843 = vmatmul.mubr.msk.f32.vlgmr.msra.gmra.mrb[0].mxu1 %vm10006_vm13, %v3701_v57  ;;  %vm443_vm13 = vcmp.eq.s32.totalorder %v10031_v61, %v5713_v19  ;;  %v10036_v8 = vld [vmem:[#allocation324_spill] sm:$0xff]  ;;  %v10063_v57 = vld [vmem:[#allocation51_spill] sm:$0xff] }
 0x47b   : > { %vm7428_vm9 = vmor %vm10014_vm4, %vm1034_vm10  ;;  %vm2167_vm10 = vcmp.eq.s32.totalorder %v10022_v49, %v5713_v19  ;;  %vm10023_vm4 = vnez %v9994_v56  ;;  %v10091_v61 = vld [vmem:[#allocation86_spill] sm:$0xff] }
 0x47c   : > { %v10016_v55 = vsel %vm7428_vm9, 4294967295, %v10015_v55  ;;  %vm7437_vm3 = vmor %vm10017_vm15, %vm1976_vm11  ;;  %vm2375_vm11 = vcmp.eq.s32.totalorder %v5601_v51, %v5713_v19  ;;  %v4052_v51 = vld [vmem:[%s4117_s15 + $0x58] sm:$0xff]  ;;  %v3037_v22 = vpop.permute.xlu1 %3036 }
 0x47d   : > { %v10019_v63 = vsel %vm7437_vm3, 4294967295, %v10018_v63  ;;  %vm2007_vm0 = vmor %vm10021_vm2, %vm10020_vm8  ;;  %vm2567_vm8 = vcmp.eq.s32.totalorder %v5664_v23, %v5713_v19  ;;  %v3008_v60 = vadd.s32 87, %v4052_v51  ;;  %v10030_v23 = vld [vmem:[#allocation150_spill] sm:$0xff]  ;;  %v10083_v51 = vmov 0 }
 0x47e   : > { %vm2023_vm9 = vmor %vm10023_vm4, %vm1991_vm6  ;;  %vm2759_vm6 = vcmp.eq.s32.totalorder %v7027_v1, %v5713_v19  ;;  %v10032_v1 = vld [vmem:[#allocation159_spill] sm:$0xff] }
 0x47f   : > { %vm7453_vm15 = vmor %vm1832_vm12, %vm1992_vm7  ;;  %vm1210_vm12 = vcmp.eq.s32.totalorder %v10028_v17, %v5713_v19  ;;  %vm1226_vm4 = vcmp.eq.s32.totalorder %v10032_v1, %v5713_v19  ;;  %3063 = vperm.xlu1 %3970, %v3008_v60   ;;  %v10088_v17 = vld [vmem:[#allocation205_spill] sm:$0xff] }
 0x480   : > { %v10025_v46 = vsel %vm7453_vm15, 4294967295, %v10024_v46  ;;  %vm2215_vm3 = vmor %vm2023_vm9, %vm2183_vm14  ;;  %vm1209_vm9 = vcmp.eq.s32.totalorder %v10030_v23, %v5713_v19  ;;  %v3040_v60 = vpop.permute.xlu1 %3039  ;;  %v10089_v23 = vld [vmem:[#allocation67_spill] sm:$0xff]  ;;  %v10092_v1 = vld [vmem:[#allocation221_spill] sm:$0xff] }
 0x481   : > { %vm7460_vm2 = vmor %vm2007_vm0, %vm2167_vm10  ;;  %vm3143_vm10 = vcmp.eq.s32.totalorder %v3085_v28, %v5713_v19 }
 0x482   : > { %v10027_v43 = vsel %vm7460_vm2, 4294967295, %v10026_v43  ;;  %vm2407_vm7 = vmor %vm2215_vm3, %vm2375_vm11  ;;  %vm2168_vm2 = vcmp.eq.s32.totalorder %v10033_v41, %v5713_v19  ;;  %vm2951_vm11 = vcmp.eq.s32.totalorder %v2893_v3, %v5713_v19  ;;  %v10090_v3 = vld [vmem:[#allocation216_spill] sm:$0xff]  ;;  %v10093_v41 = vld [vmem:[#allocation234_spill] sm:$0xff] }
 0x483   : > { %vm2599_vm0 = vmor %vm2407_vm7, %vm2567_vm8  ;;  %vm2360_vm8 = vcmp.eq.s32.totalorder %v10036_v8, %v5713_v19  ;;  %3111 = vperm.xlu1 %3970, %v3024_v12   ;;  %v10098_v12 = vld [vmem:[#allocation249_spill] sm:$0xff]  ;;  %v2643_v8 = vadd.s32 77, %v4057_v27 }
 0x484   : > { %vm2791_vm3 = vmor %vm2599_vm0, %vm2759_vm6  ;;  %vm2184_vm6 = vcmp.eq.s32.totalorder %v10039_v18, %v5713_v19  ;;  %v2834_v18 = vadd.s32 84, %v7538_v32 }
 0x485   : > { %vm7483_vm14 = vmor %vm7397_vm1, %vm1210_vm12  ;;  %vm10040_vm1 = vcmp.eq.s32.totalorder %v10029_v38, %v5713_v19  ;;  %v3088_v38 = vpop.permute.xlu1 %3087 }
 0x486   : > { %vm2983_vm7 = vmor %vm2791_vm3, %vm2951_vm11  ;;  %vm10043_vm3 = vnez %v10016_v55  ;;  %v10130_v55 = vld [vmem:[#allocation99_spill] sm:$0xff] }
 0x487   : > { %vm7491_vm15 = vmor %vm7408_vm5, %vm1209_vm9  ;;  %vm10046_vm5 = vnez %v10019_v63  ;;  %3971 = vset.pattern.permute.xlu1 %v9391_v47  ;;  %v10131_v63 = vld [vmem:[#allocation102_spill] sm:$0xff] }
 0x488   : > { %vm3175_vm0 = vmor %vm2983_vm7, %vm3143_vm10  ;;  %vm2376_vm10 = vcmp.eq.s32.totalorder %v10047_v4, %v5713_v19  ;;  %vm2359_vm7 = vcmp.eq.s32.totalorder %v10048_v5, %v5713_v19  ;;  %v10103_v4 = vld [vmem:[#allocation280_spill] sm:$0xff] }
 0x489   : > { %vm7500_vm12 = vmor %vm10040_vm1, %vm443_vm13  ;;  %v3702_v54 = vsel %vm3175_vm0, 1.0, %v4085_v16  ;;  %vm10051_vm1 = vcmask 785408   ;;  %v10105_v5 = vld [vmem:[#allocation8_spill] sm:$0xff] }
 0x48a   : > { %vm7506_vm11 = vmor %vm10043_vm3, %vm1226_vm4  ;;  %vm2551_vm4 = vcmp.eq.s32.totalorder %v5688_v26, %v5713_v19  ;;  %3845 = vmatprep.mubr.msk.f32.mxu1 %vm10051_vm1, %v3702_v54  ;;  %v2642_v26 = vadd.s32 77, %v7538_v32  ;;  %vm460_vm1 = vcmp.eq.s32.totalorder %v10057_v52, %v5713_v19  ;;  %v10106_v54 = vld [vmem:[#allocation29_spill] sm:$0xff]  ;;  %v7736_v32 = vpop.permute.xlu1 %2709  ;;  %v10116_v52 = vmov 0 }
 0x48b   : > { %v10045_v2 = vsel %vm7506_vm11, 4294967295, %v10044_v2  ;;  %vm2200_vm9 = vmor %vm10046_vm5, %vm2168_vm2  ;;  %vm10052_vm2 = vnez %v10025_v46  ;;  %vm2743_vm5 = vcmp.eq.s32.totalorder %v6452_v24, %v5713_v19  ;;  %v4054_v46 = vld [vmem:[%s4117_s15 + $0x60] sm:$0xff]  ;;  %v10128_v24 = vmov 0 }
 0x48c   : > { %vm7519_vm13 = vmor %vm2200_vm9, %vm2360_vm8  ;;  %vm10055_vm8 = vnez %v10027_v43  ;;  %vm3127_vm9 = vcmp.eq.s32.totalorder %v3037_v22, %v5713_v19  ;;  %2733 = vperm.xlu1 %3971, %v2642_v26   ;;  %v2817_v28 = vadd.s32 84, %v4054_v46  ;;  %v10079_v43 = vmov 0  ;;  %v10114_v26 = vld [vmem:[#allocation7_spill] sm:$0xff] }
 0x48d   : > { %vm2216_vm3 = vmor %vm10052_vm2, %vm2184_vm6  ;;  %v10134_v46 = vmov 0  ;;  %v10188_v22 = vmov 0 }
 0x48e   : > { %vm7530_vm11 = vmor %vm2216_vm3, %vm2376_vm10  ;;  %vm1402_vm10 = vcmp.eq.s32.totalorder %v10058_v30, %v5713_v19  ;;  %v10118_v30 = vld [vmem:[#allocation345_spill] sm:$0xff]  ;;  %v2851_v49 = vpop.permute.xlu1 %2850 }
 0x48f   : > { %vm2391_vm0 = vmor %vm10055_vm8, %vm2359_vm7  ;;  %vm10065_vm8 = vcmp.eq.s32.totalorder %v2845_v31, %v5713_v19 }
 0x490   : > { %vm2583_vm2 = vmor %vm2391_vm0, %vm2551_vm4  ;;  %vm635_vm4 = vcmp.eq.s32.totalorder %v10063_v57, %v5713_v19  ;;  %3972 = vset.pattern.permute.xlu1 %v9408_v62  ;;  %v4056_v57 = vld [vmem:[%s4117_s15 + $0xe0] sm:$0xff] }
 0x491   : > { %vm2775_vm6 = vmor %vm2583_vm2, %vm2743_vm5  ;;  %vm10066_vm5 = vcmp.eq.s32.totalorder %v10056_v48, %v5713_v19  ;;  %2874 = vperm.xlu1 %3972, %v2817_v28   ;;  %v10115_v48 = vld [vmem:[#allocation40_spill] sm:$0xff]  ;;  %v10136_v28 = vld [vmem:[#allocation265_spill] sm:$0xff] }
 0x492   : > { %vm2967_vm7 = vmor %vm2775_vm6, %vm10065_vm8  ;;  %vm2936_vm8 = vcmp.eq.s32.totalorder %v6780_v10, %v5713_v19  ;;  %v10087_v10 = vld [vmem:[#allocation70_spill] sm:$0xff] }
 0x493   : > { %vm7574_vm2 = vmor %vm10066_vm5, %vm460_vm1  ;;  %vm10071_vm1 = vcmp.eq.s32.totalorder %v10060_v34, %v5713_v19  ;;  %vm10072_vm5 = vcmp.eq.s32.totalorder %v10059_v44, %v5713_v19  ;;  %v10120_v44 = vmov 0  ;;  %v10122_v34 = vld [vmem:[#allocation355_spill] sm:$0xff] }
 0x494   : > { %vm7583_vm6 = vmor %vm7483_vm14, %vm1402_vm10  ;;  %vm10075_vm14 = vcmp.eq.s32.totalorder %v10061_v20, %v5713_v19  ;;  %v3043_v20 = vpop.permute.xlu0 %3042 }
 0x495   : > { %vm3159_vm3 = vmor %vm2967_vm7, %vm3127_vm9  ;;  %vm10078_vm9 = vcmp.eq.s32.totalorder %v10062_v13, %v5713_v19  ;;  %v10123_v13 = vld [vmem:[#allocation18_spill] sm:$0xff] }
 0x496   : > { %vm7595_vm0 = vmor %vm10072_vm5, %vm10071_vm1  ;;  %v3686_v31 = vsel %vm3159_vm3, 1.0, %v4085_v16  ;;  %vm10081_vm1 = vcmp.eq.s32.totalorder %v10064_v21, %v5713_v19  ;;  %vm10082_vm5 = vnez %v10045_v2  ;;  %vm10085_vm3 = vcmp.eq.s32.totalorder %v5744_v42, %v5713_v19  ;;  %v10163_v2 = vld [vmem:[#allocation313_spill] sm:$0xff] }
 0x497   : > { %vm7604_vm10 = vmor %vm7491_vm15, %vm10075_vm14  ;;  %v3025_v21 = vadd.s32 87, %v4056_v57 }
 0x498   : > { %vm2584_vm7 = vmor %vm7519_vm13, %vm10078_vm9  ;;  %vm2568_vm9 = vcmp.eq.s32.totalorder %v5912_v0, %v5713_v19  ;;  %v7652_v0 = vld [vmem:[%s4117_s15 + $0x68] sm:$0xff] }
 0x499   : > { %vm7620_vm15 = vmor %vm7500_vm12, %vm635_vm4  ;;  %vm10086_vm12 = vcmask 785408   ;;  %vm2760_vm4 = vcmp.eq.s32.totalorder %v6146_v59, %v5713_v19  ;;  %v2818_v59 = vadd.s32 84, %v7652_v0 }
 0x49a   : > { %v10080_v43 = vsel %vm7620_vm15, 4294967295, %v10079_v43  ;;  %vm7629_vm13 = vmor %vm10082_vm5, %vm10081_vm1  ;;  %3821 = vmatprep.mubr.msk.f32.mxu0 %vm10086_vm12, %v3686_v31  ;;  %vm3128_vm5 = vcmp.eq.s32.totalorder %v3040_v60, %v5713_v19  ;;  %v10132_v31 = vld [vmem:[#allocation113_spill] sm:$0xff]  ;;  %v10138_v60 = vmov 0 }
 0x49b   : > { %v10084_v51 = vsel %vm7629_vm13, 4294967295, %v10083_v51  ;;  %vm2776_vm14 = vmor %vm2584_vm7, %vm10085_vm3  ;;  %vm2952_vm13 = vcmp.eq.s32.totalorder %v7517_v35, %v5713_v19  ;;  %vm1594_vm3 = vcmp.eq.s32.totalorder %v10088_v17, %v5713_v19  ;;  %2877 = vperm.xlu1 %3972, %v2818_v59   ;;  %v10108_v35 = vmov 0  ;;  %v10141_v59 = vld [vmem:[#allocation53_spill] sm:$0xff] }
 0x49c   : > { %vm2968_vm1 = vmor %vm2776_vm14, %vm2936_vm8  ;;  %vm652_vm8 = vcmp.eq.s32.totalorder %v10087_v10, %v5713_v19  ;;  %v10146_v10 = vld [vmem:[#allocation329_spill] sm:$0xff] }
 0x49d   : > { %vm3160_vm15 = vmor %vm2968_vm1, %vm3128_vm5  ;;  %vm3144_vm1 = vcmp.eq.s32.totalorder %v3088_v38, %v5713_v19  ;;  %vm827_vm5 = vcmp.eq.s32.totalorder %v10091_v61, %v5713_v19  ;;  %v2854_v38 = vpop.permute.xlu1 %2853  ;;  %v10151_v61 = vld [vmem:[#allocation342_spill] sm:$0xff] }
 0x49e   : > { %vm2600_vm7 = vmor %vm7530_vm11, %vm2568_vm9  ;;  %v3687_v42 = vsel %vm3160_vm15, 1.0, %v4085_v16  ;;  %vm1593_vm15 = vcmp.eq.s32.totalorder %v10090_v3, %v5713_v19  ;;  %v10216_v3 = vld [vmem:[#allocation297_spill] sm:$0xff] }
 0x49f   : > { %vm2792_vm14 = vmor %vm2600_vm7, %vm2760_vm4  ;;  %3822 = vmatmul.mubr.msk.f32.gmra.mrb[2].mxu0 %vm10086_vm12, %v3687_v42  ;;  %vm1610_vm4 = vcmp.eq.s32.totalorder %v10092_v1, %v5713_v19  ;;  %vm1785_vm7 = vcmp.eq.s32.totalorder %v10093_v41, %v5713_v19  ;;  %2925 = vperm.xlu1 %3972, %v2834_v18   ;;  %v10140_v42 = vld [vmem:[#allocation281_spill] sm:$0xff]  ;;  %v10156_v41 = vmov 0  ;;  %v3094_v18 = vpop.permute.xlu0 %3093  ;;  %v10218_v1 = vmov 0 }
 0x4a0   : > { %vm2984_vm9 = vmor %vm2792_vm14, %vm2952_vm13  ;;  %vm1786_vm14 = vcmp.eq.s32.totalorder %v10098_v12, %v5713_v19  ;;  %v10159_v12 = vmov 0 }
 0x4a1   : > { %vm3176_vm12 = vmor %vm2984_vm9, %vm3144_vm1  ;;  %vm1977_vm9 = vcmp.eq.s32.totalorder %v10103_v4, %v5713_v19  ;;  %vm10104_vm1 = vcmask 785408   ;;  %v10164_v4 = vld [vmem:[#allocation152_spill] sm:$0xff] }
 0x4a2   : > { %vm7676_vm11 = vmor %vm7574_vm2, %vm652_vm8  ;;  %v3703_v56 = vsel %vm3176_vm12, 1.0, %v4085_v16  ;;  %vm10100_vm8 = vcmp.eq.s32.totalorder %v10089_v23, %v5713_v19  ;;  %vm462_vm12 = vcmp.eq.s32.totalorder %v10115_v48, %v5713_v19  ;;  %v10147_v23 = vld [vmem:[#allocation72_spill] sm:$0xff]  ;;  %v10177_v48 = vmov 0 }
 0x4a3   : > { %vm7682_vm13 = vmor %vm7583_vm6, %vm1594_vm3  ;;  %3846 = vmatmul.mubr.msk.f32.gmra.mrb[2].mxu1 %vm10104_vm1, %v3703_v56  ;;  %3973 = vset.pattern.permute.xlu1 %v9417_v11  ;;  %v2902_v56 = vpop.permute.xlu1 %2901 }
 0x4a4   : > { %vm7697_vm6 = vmor %vm7595_vm0, %vm10100_vm8  ;;  %vm10107_vm8 = vnez %v10080_v43  ;;  %3114 = vperm.xlu1 %3973, %v3025_v21   ;;  %v3010_v43 = vadd.s32 87, %v7652_v0  ;;  %v10143_v0 = vmov 0  ;;  %v10192_v21 = vld [vmem:[#allocation168_spill] sm:$0xff] }
 0x4a5   : > { %vm1625_vm3 = vmor %vm7604_vm10, %vm1593_vm15  ;;  %vm10110_vm10 = vnez %v10084_v51  ;;  %v10137_v51 = vld [vmem:[#allocation56_spill] sm:$0xff] }
 0x4a6   : > { %vm7718_vm2 = vmor %vm10107_vm8, %vm827_vm5  ;;  %vm2169_vm5 = vcmp.eq.s32.totalorder %v10113_v53, %v5713_v19  ;;  %vm286_vm8 = vcmp.eq.s32.totalorder %v10114_v26, %v5713_v19  ;;  %v4058_v53 = vld [vmem:[%s4117_s15 + $0x70] sm:$0xff] }
 0x4a7   : > { %v10109_v35 = vsel %vm7718_vm2, 4294967295, %v10108_v35  ;;  %vm7727_vm15 = vmor %vm10110_vm10, %vm1610_vm4  ;;  %v10175_v26 = vld [vmem:[#allocation88_spill] sm:$0xff] }
 0x4a8   : > { %v10112_v29 = vsel %vm7727_vm15, 4294967295, %v10111_v29  ;;  %vm1817_vm1 = vmor %vm1625_vm3, %vm1785_vm7  ;;  %vm2361_vm7 = vcmp.eq.s32.totalorder %v10118_v30, %v5713_v19  ;;  %vm10119_vm3 = vcmp.eq.s32.totalorder %v10099_v39, %v5713_v19  ;;  %vm2553_vm15 = vcmp.eq.s32.totalorder %v10122_v34, %v5713_v19  ;;  %3069 = vperm.xlu1 %3973, %v3010_v43   ;;  %v10162_v39 = vld [vmem:[#allocation129_spill] sm:$0xff]  ;;  %v3091_v30 = vpop.permute.xlu1 %3090  ;;  %v10203_v43 = vld [vmem:[#allocation115_spill] sm:$0xff] }
 0x4a9   : > { %vm7747_vm4 = vmor %vm7682_vm13, %vm1786_vm14  ;;  %vm302_vm13 = vcmp.eq.s32.totalorder %v10123_v13, %v5713_v19  ;;  %vm10124_vm14 = vcmp.eq.s32.totalorder %v10106_v54, %v5713_v19  ;;  %v10167_v54 = vmov 0  ;;  %v2835_v13 = vadd.s32 84, %v4057_v27  ;;  %v10222_v27 = vld [vmem:[#allocation312_spill] sm:$0xff] }
 0x4aa   : > { %v10117_v52 = vsel %vm7747_vm4, 4294967295, %v10116_v52  ;;  %vm7756_vm10 = vmor %vm286_vm8, %vm10119_vm3  ;;  %vm10125_vm4 = vcmp.eq.s32.totalorder %v10105_v5, %v5713_v19  ;;  %vm844_vm3 = vcmp.eq.s32.totalorder %v10130_v55, %v5713_v19  ;;  %v10165_v5 = vld [vmem:[#allocation326_spill] sm:$0xff]  ;;  %v10248_v34 = vmov 0  ;;  %v10260_v55 = vld [vmem:[#allocation283_spill] sm:$0xff] }
 0x4ab   : > { %v10121_v44 = vsel %vm7756_vm10, 4294967295, %v10120_v44  ;;  %vm2009_vm0 = vmor %vm1817_vm1, %vm1977_vm9  ;;  %vm2745_vm9 = vcmp.eq.s32.totalorder %v6547_v50, %v5713_v19  ;;  %v10133_v50 = vld [vmem:[#allocation264_spill] sm:$0xff] }
 0x4ac   : > { %vm7770_vm2 = vmor %vm10125_vm4, %vm10124_vm14  ;;  %vm843_vm4 = vcmp.eq.s32.totalorder %v10131_v63, %v5713_v19  ;;  %3974 = vset.pattern.permute.xlu1 %v9391_v47  ;;  %v10173_v47 = vmov 0  ;;  %v3046_v57 = vpop.permute.xlu1 %3045  ;;  %v10198_v63 = vld [vmem:[#allocation191_spill] sm:$0xff] }
 0x4ad   : > { %vm2201_vm8 = vmor %vm2009_vm0, %vm2169_vm5  ;;  %vm3129_vm0 = vcmp.eq.s32.totalorder %v3043_v20, %v5713_v19  ;;  %vm1019_vm5 = vcmp.eq.s32.totalorder %v10132_v31, %v5713_v19  ;;  %2736 = vperm.xlu1 %3974, %v2643_v8   ;;  %v4059_v31 = vld [vmem:[%s4117_s15 + $0xf8] sm:$0xff]  ;;  %v10223_v8 = vmov 0 }
 0x4ae   : > { %vm7777_vm1 = vmor %vm302_vm13, %vm462_vm12  ;;  %vm1802_vm12 = vcmp.eq.s32.totalorder %v10133_v50, %v5713_v19  ;;  %v2836_v50 = vadd.s32 84, %v4059_v31 }
 0x4af   : > { %v10129_v24 = vsel %vm7777_vm1, 4294967295, %v10128_v24  ;;  %vm2393_vm10 = vmor %vm2201_vm8, %vm2361_vm7  ;;  %vm2937_vm1 = vcmp.eq.s32.totalorder %v2851_v49, %v5713_v19  ;;  %vm638_vm8 = vcmp.eq.s32.totalorder %v10137_v51, %v5713_v19  ;;  %v10205_v51 = vld [vmem:[#allocation218_spill] sm:$0xff] }
 0x4b0   : > { %vm2585_vm14 = vmor %vm2393_vm10, %vm2553_vm15  ;;  %vm1978_vm15 = vcmp.eq.s32.totalorder %v10136_v28, %v5713_v19  ;;  %v10201_v28 = vld [vmem:[#allocation202_spill] sm:$0xff] }
 0x4b1   : > { %vm2777_vm13 = vmor %vm2585_vm14, %vm2745_vm9  ;;  %vm10142_vm14 = vnez %v10109_v35  ;;  %3976 = vset.pattern.permute.xlu1 %v9408_v62 }
 0x4b2   : > { %vm7794_vm7 = vmor %vm7676_vm11, %vm844_vm3  ;;  %vm1994_vm11 = vcmp.eq.s32.totalorder %v10140_v42, %v5713_v19  ;;  %v10206_v42 = vld [vmem:[#allocation138_spill] sm:$0xff] }
 0x4b3   : > { %v10135_v46 = vsel %vm7794_vm7, 4294967295, %v10134_v46  ;;  %vm2969_vm10 = vmor %vm2777_vm13, %vm2937_vm1  ;;  %vm637_vm1 = vcmp.eq.s32.totalorder %v10141_v59, %v5713_v19  ;;  %vm2570_vm7 = vcmp.eq.s32.totalorder %v5961_v37, %v5713_v19  ;;  %v10161_v37 = vld [vmem:[#allocation136_spill] sm:$0xff]  ;;  %v10207_v59 = vld [vmem:[#allocation223_spill] sm:$0xff] }
 0x4b4   : > { %vm7808_vm9 = vmor %vm7697_vm6, %vm843_vm4  ;;  %vm10145_vm6 = vnez %v10112_v29  ;;  %v10171_v29 = vld [vmem:[#allocation85_spill] sm:$0xff] }
 0x4b5   : > { %v10139_v60 = vsel %vm7808_vm9, 4294967295, %v10138_v60  ;;  %vm3161_vm3 = vmor %vm2969_vm10, %vm3129_vm0  ;;  %vm2186_vm0 = vcmp.eq.s32.totalorder %v10146_v10, %v5713_v19  ;;  %vm654_vm10 = vcmp.eq.s32.totalorder %v10147_v23, %v5713_v19  ;;  %v10209_v10 = vmov 0 }
 0x4b6   : > { %vm7821_vm13 = vmor %vm10142_vm14, %vm1019_vm5  ;;  %v3688_v17 = vsel %vm3161_vm3, 1.0, %v4085_v16  ;;  %vm10148_vm5 = vnez %v10117_v52  ;;  %vm10153_vm3 = vnez %v10121_v44  ;;  %v10179_v52 = vld [vmem:[#allocation367_spill] sm:$0xff]  ;;  %v10180_v44 = vld [vmem:[#allocation101_spill] sm:$0xff]  ;;  %v10214_v23 = vmov 0 }
 0x4b7   : > { %v10144_v0 = vsel %vm7821_vm13, 4294967295, %v10143_v0  ;;  %vm1834_vm4 = vmor %vm10145_vm6, %vm1802_vm12  ;;  %vm2378_vm12 = vcmp.eq.s32.totalorder %v10151_v61, %v5713_v19  ;;  %vm10152_vm6 = vcmask 785408   ;;  %v3011_v61 = vadd.s32 87, %v4058_v53 }
 0x4b8   : > { %vm7840_vm14 = vmor %vm10148_vm5, %vm1978_vm15  ;;  %3824 = vmatprep.mubr.msk.f32.mxu0 %vm10152_vm6, %v3688_v17  ;;  %vm2762_vm6 = vcmp.eq.s32.totalorder %v7736_v32, %v5713_v19  ;;  %v2819_v32 = vadd.s32 84, %v4058_v53  ;;  %v10211_v17 = vld [vmem:[#allocation236_spill] sm:$0xff]  ;;  %v10234_v53 = vmov 0 }
 0x4b9   : > { %vm7849_vm13 = vmor %vm10153_vm3, %vm638_vm8  ;;  %vm10158_vm8 = vnez %v10129_v24  ;;  %v10194_v24 = vld [vmem:[#allocation175_spill] sm:$0xff] }
 0x4ba   : > { %vm2026_vm9 = vmor %vm1834_vm4, %vm1994_vm11  ;;  %vm1036_vm11 = vcmp.eq.s32.totalorder %v10161_v37, %v5713_v19  ;;  %2880 = vperm.xlu1 %3976, %v2819_v32   ;;  %v10236_v32 = vld [vmem:[#allocation282_spill] sm:$0xff] }
 0x4bb   : > { %vm7857_vm15 = vmor %vm7770_vm2, %vm637_vm1  ;;  %vm1035_vm2 = vcmp.eq.s32.totalorder %v10162_v39, %v5713_v19  ;;  %v4060_v39 = vld [vmem:[%s4117_s15 + $0x78] sm:$0xff] }
 0x4bc   : > { %v10157_v41 = vsel %vm7857_vm15, 4294967295, %v10156_v41  ;;  %vm2218_vm5 = vmor %vm2026_vm9, %vm2186_vm0  ;;  %vm2170_vm9 = vcmp.eq.s32.totalorder %v10163_v2, %v5713_v19  ;;  %vm2954_vm0 = vcmp.eq.s32.totalorder %v2902_v56, %v5713_v19  ;;  %v10226_v56 = vld [vmem:[#allocation364_spill] sm:$0xff]  ;;  %v3012_v2 = vadd.s32 87, %v4060_v39  ;;  %v10306_v39 = vld [vmem:[#allocation11_spill] sm:$0xff] }
 0x4bd   : > { %vm7866_vm3 = vmor %vm10158_vm8, %vm654_vm10  ;;  %vm1211_vm10 = vcmp.eq.s32.totalorder %v10164_v4, %v5713_v19  ;;  %vm2362_vm8 = vcmp.eq.s32.totalorder %v10165_v5, %v5713_v19  ;;  %v10227_v4 = vld [vmem:[#allocation147_spill] sm:$0xff]  ;;  %v10228_v5 = vld [vmem:[#allocation9_spill] sm:$0xff] }
 0x4be   : > { %v10160_v12 = vsel %vm7866_vm3, 4294967295, %v10159_v12  ;;  %vm2410_vm4 = vmor %vm2218_vm5, %vm2378_vm12  ;;  %vm10166_vm12 = vnez %v10135_v46  ;;  %2928 = vperm.xlu1 %3976, %v2835_v13   ;;  %v10199_v46 = vld [vmem:[#allocation122_spill] sm:$0xff] }
 0x4bf   : > { %vm2602_vm1 = vmor %vm2410_vm4, %vm2570_vm7  ;;  %vm3146_vm7 = vcmp.eq.s32.totalorder %v3094_v18, %v5713_v19  ;;  %vm830_vm4 = vcmp.eq.s32.totalorder %v10171_v29, %v5713_v19  ;;  %v3097_v18 = vpop.permute.xlu0 %3096  ;;  %v10231_v29 = vld [vmem:[#allocation163_spill] sm:$0xff] }
 0x4c0   : > { %vm2794_vm3 = vmor %vm2602_vm1, %vm2762_vm6  ;;  %vm10172_vm6 = vnez %v10139_v60  ;;  %v2713_v60 = vpop.permute.xlu1 %2712 }
 0x4c1   : > { %vm7884_vm5 = vmor %vm10166_vm12, %vm1036_vm11 }
 0x4c2   : > { %v10168_v54 = vsel %vm7884_vm5, 4294967295, %v10167_v54  ;;  %vm7888_vm15 = vmor %vm2794_vm3, %vm2954_vm0  ;;  %vm829_vm3 = vcmp.eq.s32.totalorder %v10175_v26, %v5713_v19  ;;  %vm10176_vm0 = vnez %v10144_v0  ;;  %v10208_v0 = vld [vmem:[#allocation233_spill] sm:$0xff]  ;;  %2931 = vperm.xlu1 %3976, %v2836_v50   ;;  %v3028_v26 = vadd.s32 87, %v4059_v31  ;;  %v10262_v31 = vld [vmem:[#allocation204_spill] sm:$0xff] }
 0x4c3   : > { %vm7897_vm1 = vmor %vm10172_vm6, %vm1035_vm2  ;;  %vm2554_vm2 = vcmp.eq.s32.totalorder %v10179_v52, %v5713_v19  ;;  %vm846_vm6 = vcmp.eq.s32.totalorder %v10180_v44, %v5713_v19  ;;  %v10240_v52 = vld [vmem:[#allocation296_spill] sm:$0xff]  ;;  %v10245_v44 = vmov 0  ;;  %v10263_v50 = vld [vmem:[#allocation331_spill] sm:$0xff] }
 0x4c4   : > { %v10174_v47 = vsel %vm7897_vm1, 4294967295, %v10173_v47  ;;  %vm2202_vm11 = vmor %vm7840_vm14, %vm2170_vm9  ;;  %vm2746_vm14 = vcmp.eq.s32.totalorder %v5796_v45, %v5713_v19  ;;  %vm3145_vm1 = vcmp.eq.s32.totalorder %v3091_v30, %v5713_v19  ;;  %v10185_v45 = vmov 0  ;;  %v2857_v37 = vpop.permute.xlu1 %2856 }
 0x4c5   : > { %vm7908_vm12 = vmor %vm10176_vm0, %vm1211_vm10  ;;  %v10242_v30 = vmov 0 }
 0x4c6   : > { %v10178_v48 = vsel %vm7908_vm12, 4294967295, %v10177_v48  ;;  %vm2394_vm5 = vmor %vm2202_vm11, %vm2362_vm8  ;;  %vm2938_vm8 = vcmp.eq.s32.totalorder %v2854_v38, %v5713_v19  ;;  %vm10183_vm11 = vnez %v9838_v6  ;;  %vm10184_vm12 = vnez %v10157_v41  ;;  %v10190_v6 = vld [vmem:[#allocation161_spill] sm:$0xff]  ;;  %v10212_v38 = vld [vmem:[#allocation251_spill] sm:$0xff]  ;;  %3978 = vset.pattern.permute.xlu1 %v9417_v11 }
 0x4c7   : > { %vm3178_vm9 = vmor %vm7888_vm15, %vm3146_vm7  ;;  %v10220_v41 = vmov 0  ;;  %3072 = vperm.xlu1 %3978, %v3011_v61   ;;  %v10230_v11 = vld [vmem:[#allocation31_spill] sm:$0xff]  ;;  %v10292_v61 = vld [vmem:[#allocation225_spill] sm:$0xff] }
 0x4c8   : > { %vm7923_vm10 = vmor %vm7849_vm13, %vm830_vm4  ;;  %vm10187_vm13 = vnez %v10160_v12  ;;  %v3705_v62 = vsel %vm3178_vm9, 1.0, %v4085_v16  ;;  %v10225_v12 = vld [vmem:[#allocation359_spill] sm:$0xff]  ;;  %v2905_v35 = vpop.permute.xlu1 %2904 }
 0x4c9   : > { %vm3177_vm0 = vmor %vm10183_vm11, %vm3145_vm1  ;;  %vm1228_vm1 = vcmp.eq.s32.totalorder %v10190_v6, %v5713_v19  ;;  %v10254_v6 = vld [vmem:[#allocation19_spill] sm:$0xff] }
 0x4ca   : > { %vm7933_vm7 = vmor %vm10184_vm12, %vm829_vm3  ;;  %v3704_v20 = vsel %vm3177_vm0, 1.0, %v4085_v16  ;;  %vm10191_vm3 = vcmask 785408   ;;  %vm1403_vm0 = vcmp.eq.s32.totalorder %v10194_v24, %v5713_v19  ;;  %v10258_v24 = vld [vmem:[#allocation41_spill] sm:$0xff] }
 0x4cb   : > { %v10186_v45 = vsel %vm7933_vm7, 4294967295, %v10185_v45  ;;  %vm2586_vm15 = vmor %vm2394_vm5, %vm2554_vm2  ;;  %3848 = vmatprep.mubr.msk.f32.mxu1 %vm10191_vm3, %v3704_v20  ;;  %vm1227_vm5 = vcmp.eq.s32.totalorder %v10192_v21, %v5713_v19  ;;  %vm3130_vm2 = vcmp.eq.s32.totalorder %v3046_v57, %v5713_v19  ;;  %3075 = vperm.xlu1 %3978, %v3012_v2   ;;  %v10256_v57 = vld [vmem:[#allocation188_spill] sm:$0xff] }
 0x4cc   : > { %vm7940_vm4 = vmor %vm10187_vm13, %vm846_vm6  ;;  %v2908_v13 = vpop.permute.xlu1 %2907  ;;  %v10257_v21 = vld [vmem:[#allocation20_spill] sm:$0xff] }
 0x4cd   : > { %v10189_v22 = vsel %vm7940_vm4, 4294967295, %v10188_v22  ;;  %vm2778_vm11 = vmor %vm2586_vm15, %vm2746_vm14  ;;  %vm10195_vm14 = vnez %v10168_v54  ;;  %vm1419_vm15 = vcmp.eq.s32.totalorder %v10198_v63, %v5713_v19  ;;  %vm1038_vm4 = vcmp.eq.s32.totalorder %v10206_v42, %v5713_v19  ;;  %v10229_v54 = vld [vmem:[#allocation154_spill] sm:$0xff]  ;;  %v10307_v2 = vld [vmem:[#allocation32_spill] sm:$0xff] }
 0x4ce   : > { %vm2970_vm12 = vmor %vm2778_vm11, %vm2938_vm8  ;;  %vm1022_vm8 = vcmp.eq.s32.totalorder %v10199_v46, %v5713_v19  ;;  %vm10200_vm11 = vnez %v10174_v47  ;;  %v10232_v47 = vld [vmem:[#allocation266_spill] sm:$0xff]  ;;  %v10265_v46 = vmov 0 }
 0x4cf   : > { %vm10193_vm6 = vmmov %vm10191_vm3  ;;  %3123 = vperm.xlu1 %3978, %v3028_v26   ;;  %v10324_v26 = vld [vmem:[#allocation357_spill] sm:$0xff] }
 0x4d0   : > { %3849 = vmatmul.mubr.msk.f32.gmra.mrb[4].mxu1 %vm10193_vm6, %v3705_v62  ;;  %vm3162_vm13 = vmor %vm2970_vm12, %vm3130_vm2  ;;  %vm1021_vm2 = vcmp.eq.s32.totalorder %v10203_v43, %v5713_v19  ;;  %v10255_v62 = vld [vmem:[#allocation42_spill] sm:$0xff]  ;;  %v3049_v63 = vpop.permute.xlu1 %3048  ;;  %v10270_v43 = vld [vmem:[#allocation344_spill] sm:$0xff] }
 0x4d1   : > { %vm7958_vm9 = vmor %vm10195_vm14, %vm1228_vm1  ;;  %v3689_v49 = vsel %vm3162_vm13, 1.0, %v4085_v16  ;;  %vm1420_vm1 = vcmp.eq.s32.totalorder %v10201_v28, %v5713_v19  ;;  %vm1595_vm14 = vcmp.eq.s32.totalorder %v10205_v51, %v5713_v19  ;;  %v10268_v28 = vmov 0 }
 0x4d2   : > { %vm1259_vm3 = vmor %vm10200_vm11, %vm1227_vm5  ;;  %vm1612_vm5 = vcmp.eq.s32.totalorder %v10207_v59, %v5713_v19  ;;  %vm1611_vm11 = vcmp.eq.s32.totalorder %v10208_v0, %v5713_v19  ;;  %v10279_v59 = vmov 0  ;;  %v10282_v0 = vmov 0 }
 0x4d3   : > { %vm10202_vm12 = vmmov %vm10193_vm6  ;;  %vm10204_vm6 = vnez %v10178_v48  ;;  %v10238_v48 = vmov 0  ;;  %v10362_v51 = vmov 0 }
 0x4d4   : > { %3825 = vmatmul.mubr.msk.f32.gmra.mrb[4].mxu0 %vm10202_vm12, %v3689_v49  ;;  %vm1435_vm13 = vmor %vm10204_vm6, %vm1403_vm0  ;;  %vm1787_vm6 = vcmp.eq.s32.totalorder %v10211_v17, %v5713_v19  ;;  %v10261_v49 = vld [vmem:[#allocation55_spill] sm:$0xff] }
 0x4d5   : > { %vm1451_vm7 = vmor %vm1259_vm3, %vm1419_vm15  ;;  %vm1803_vm15 = vcmp.eq.s32.totalorder %v10212_v38, %v5713_v19  ;;  %vm10213_vm3 = vnez %v10186_v45  ;;  %v10250_v45 = vld [vmem:[#allocation347_spill] sm:$0xff]  ;;  %v10286_v38 = vld [vmem:[#allocation74_spill] sm:$0xff] }
 0x4d6   : > { %vm7987_vm12 = vmor %vm7923_vm10, %vm1022_vm8 }
 0x4d7   : > { %v10210_v10 = vsel %vm7987_vm12, 4294967295, %v10209_v10  ;;  %vm1452_vm0 = vmor %vm7958_vm9, %vm1420_vm1  ;;  %vm1995_vm12 = vcmp.eq.s32.totalorder %v10216_v3, %v5713_v19  ;;  %vm10217_vm9 = vnez %v10189_v22  ;;  %v10252_v22 = vld [vmem:[#allocation356_spill] sm:$0xff] }
 0x4d8   : > { %vm7999_vm8 = vmor %vm10213_vm3, %vm1021_vm2  ;;  %v10290_v3 = vld [vmem:[#allocation220_spill] sm:$0xff] }
 0x4d9   : > { %v10215_v23 = vsel %vm7999_vm8, 4294967295, %v10214_v23  ;;  %vm1627_vm10 = vmor %vm1435_vm13, %vm1595_vm14  ;;  %vm2187_vm8 = vcmp.eq.s32.totalorder %v10222_v27, %v5713_v19  ;;  %v10385_v27 = vld [vmem:[#allocation105_spill] sm:$0xff] }
 0x4da   : > { %vm8007_vm1 = vmor %vm10217_vm9, %vm1038_vm4  ;;  %vm2379_vm4 = vcmp.eq.s32.totalorder %v10225_v12, %v5713_v19 }
 0x4db   : > { %v10219_v1 = vsel %vm8007_vm1, 4294967295, %v10218_v1  ;;  %vm8011_vm2 = vmor %vm1452_vm0, %vm1612_vm5  ;;  %vm2571_vm5 = vcmp.eq.s32.totalorder %v10226_v56, %v5713_v19  ;;  %vm1214_vm0 = vcmp.eq.s32.totalorder %v10227_v4, %v5713_v19  ;;  %v10302_v56 = vmov 0 }
 0x4dc   : > { %v10221_v41 = vsel %vm8011_vm2, 4294967295, %v10220_v41  ;;  %vm1643_vm3 = vmor %vm1451_vm7, %vm1611_vm11  ;;  %vm2763_vm11 = vcmp.eq.s32.totalorder %v2713_v60, %v5713_v19  ;;  %vm10237_vm2 = vnez %v10215_v23  ;;  %v10310_v4 = vmov 0 }
 0x4dd   : > { %vm8017_vm13 = vmor %vm1627_vm10, %vm1787_vm6  ;;  %v10365_v60 = vmov 0 }
 0x4de   : > { %v10224_v8 = vsel %vm8017_vm13, 4294967295, %v10223_v8  ;;  %vm1835_vm14 = vmor %vm1643_vm3, %vm1803_vm15  ;;  %vm3147_vm3 = vcmp.eq.s32.totalorder %v3097_v18, %v5713_v19  ;;  %vm10233_vm15 = vnez %v10210_v10  ;;  %v3052_v10 = vpop.permute.xlu1 %3051  ;;  %v10304_v18 = vld [vmem:[#allocation284_spill] sm:$0xff] }
 0x4df   : > { %vm2027_vm9 = vmor %vm1835_vm14, %vm1995_vm12  ;;  %vm1213_vm12 = vcmp.eq.s32.totalorder %v10229_v54, %v5713_v19  ;;  %vm1230_vm14 = vcmp.eq.s32.totalorder %v10231_v29, %v5713_v19  ;;  %v10315_v54 = vld [vmem:[#allocation298_spill] sm:$0xff]  ;;  %v10317_v29 = vld [vmem:[#allocation43_spill] sm:$0xff] }
 0x4e0   : > { %vm2219_vm7 = vmor %vm2027_vm9, %vm2187_vm8  ;;  %vm447_vm8 = vcmp.eq.s32.totalorder %v10230_v11, %v5713_v19  ;;  %vm1804_vm9 = vcmp.eq.s32.totalorder %v10232_v47, %v5713_v19  ;;  %v10316_v11 = vld [vmem:[#allocation10_spill] sm:$0xff]  ;;  %v10318_v47 = vmov 0 }
 0x4e1   : > { %vm2411_vm6 = vmor %vm2219_vm7, %vm2379_vm4  ;;  %vm2955_vm7 = vcmp.eq.s32.totalorder %v2905_v35, %v5713_v19 }
 0x4e2   : > { %vm2603_vm10 = vmor %vm2411_vm6, %vm2571_vm5  ;;  %vm1979_vm5 = vcmp.eq.s32.totalorder %v10236_v32, %v5713_v19  ;;  %v3100_v23 = vpop.permute.xlu1 %3099  ;;  %v10322_v32 = vmov 0 }
 0x4e3   : > { %vm2795_vm4 = vmor %vm2603_vm10, %vm2763_vm11  ;;  %vm2171_vm11 = vcmp.eq.s32.totalorder %v10240_v52, %v5713_v19  ;;  %v10325_v52 = vld [vmem:[#allocation21_spill] sm:$0xff] }
 0x4e4   : > { %vm8044_vm13 = vmor %vm10233_vm15, %vm1214_vm0  ;;  %vm10241_vm0 = vcmp.eq.s32.totalorder %v10228_v5, %v5713_v19  ;;  %v10313_v5 = vmov 0 }
 0x4e5   : > { %v10235_v53 = vsel %vm8044_vm13, 4294967295, %v10234_v53  ;;  %vm2987_vm6 = vmor %vm2795_vm4, %vm2955_vm7  ;;  %vm10244_vm4 = vnez %v10219_v1  ;;  %v10293_v1 = vld [vmem:[#allocation238_spill] sm:$0xff] }
 0x4e6   : > { %vm8052_vm1 = vmor %vm10237_vm2, %vm1213_vm12  ;;  %vm10247_vm2 = vnez %v10221_v41  ;;  %v10295_v41 = vmov 0  ;;  %v2722_v35 = vpop.permute.xlu1 %2721 }
 0x4e7   : > { %v10239_v48 = vsel %vm8052_vm1, 4294967295, %v10238_v48  ;;  %vm3179_vm10 = vmor %vm2987_vm6, %vm3147_vm3  ;;  %vm2363_vm3 = vcmp.eq.s32.totalorder %v10250_v45, %v5713_v19  ;;  %vm10264_vm1 = vcmp.eq.s32.totalorder %v10254_v6, %v5713_v19  ;;  %v10333_v45 = vld [vmem:[#allocation106_spill] sm:$0xff]  ;;  %v10339_v6 = vld [vmem:[#allocation269_spill] sm:$0xff] }
 0x4e8   : > { %vm8061_vm15 = vmor %vm10241_vm0, %vm447_vm8  ;;  %v3706_v20 = vsel %vm3179_vm10, 1.0, %v4085_v16  ;;  %vm10251_vm8 = vnez %v10224_v8  ;;  %vm10253_vm0 = vcmask 785408   ;;  %vm639_vm10 = vcmp.eq.s32.totalorder %v10261_v49, %v5713_v19  ;;  %v10300_v8 = vld [vmem:[#allocation252_spill] sm:$0xff] }
 0x4e9   : > { %v10243_v30 = vsel %vm8061_vm15, 4294967295, %v10242_v30  ;;  %vm8067_vm7 = vmor %vm10244_vm4, %vm1230_vm14  ;;  %vm2555_vm14 = vcmp.eq.s32.totalorder %v10252_v22, %v5713_v19  ;;  %3851 = vmatprep.mubr.msk.f32.mxu1 %vm10253_vm0, %v3706_v20  ;;  %vm464_vm15 = vcmp.eq.s32.totalorder %v10255_v62, %v5713_v19  ;;  %vm1996_vm0 = vcmp.eq.s32.totalorder %v10260_v55, %v5713_v19  ;;  %v10340_v62 = vld [vmem:[#allocation60_spill] sm:$0xff]  ;;  %v10350_v55 = vld [vmem:[#allocation333_spill] sm:$0xff] }
 0x4ea   : > { %v10246_v44 = vsel %vm8067_vm7, 4294967295, %v10245_v44  ;;  %vm8073_vm12 = vmor %vm10247_vm2, %vm1804_vm9  ;;  %vm2747_vm9 = vcmp.eq.s32.totalorder %v6589_v9, %v5713_v19  ;;  %vm2939_vm7 = vcmp.eq.s32.totalorder %v2857_v37, %v5713_v19  ;;  %v10259_v9 = vld [vmem:[#allocation177_spill] sm:$0xff]  ;;  %v2863_v20 = vpop.permute.xlu1 %2862  ;;  %v10337_v22 = vmov 0 }
 0x4eb   : > { %v10249_v34 = vsel %vm8073_vm12, 4294967295, %v10248_v34  ;;  %vm2011_vm6 = vmor %vm10251_vm8, %vm1979_vm5  ;;  %vm1406_vm5 = vcmp.eq.s32.totalorder %v10256_v57, %v5713_v19  ;;  %vm3131_vm12 = vcmp.eq.s32.totalorder %v3049_v63, %v5713_v19  ;;  %v10301_v37 = vld [vmem:[#allocation33_spill] sm:$0xff]  ;;  %v10342_v57 = vmov 0 }
 0x4ec   : > { %vm2203_vm4 = vmor %vm2011_vm6, %vm2171_vm11  ;;  %vm463_vm6 = vcmp.eq.s32.totalorder %v10258_v24, %v5713_v19  ;;  %v10345_v24 = vld [vmem:[#allocation57_spill] sm:$0xff] }
 0x4ed   : > { %vm2395_vm2 = vmor %vm2203_vm4, %vm2363_vm3  ;;  %vm1405_vm3 = vcmp.eq.s32.totalorder %v10259_v9, %v5713_v19  ;;  %v10347_v9 = vmov 0 }
 0x4ee   : > { %vm2587_vm8 = vmor %vm2395_vm2, %vm2555_vm14  ;;  %vm1422_vm14 = vcmp.eq.s32.totalorder %v10262_v31, %v5713_v19  ;;  %vm2188_vm2 = vcmp.eq.s32.totalorder %v10263_v50, %v5713_v19  ;;  %v2866_v49 = vpop.permute.xlu1 %2865  ;;  %v10351_v31 = vld [vmem:[#allocation76_spill] sm:$0xff]  ;;  %v10353_v50 = vmov 0 }
 0x4ef   : > { %vm2779_vm4 = vmor %vm2587_vm8, %vm2747_vm9  ;;  %vm10267_vm9 = vnez %v10235_v53  ;;  %v10320_v53 = vld [vmem:[#allocation349_spill] sm:$0xff] }
 0x4f0   : > { %vm2971_vm11 = vmor %vm2779_vm4, %vm2939_vm7  ;;  %vm2380_vm4 = vcmp.eq.s32.totalorder %v10270_v43, %v5713_v19  ;;  %v10360_v43 = vld [vmem:[#allocation54_spill] sm:$0xff] }
 0x4f1   : > { %vm8112_vm13 = vmor %vm10264_vm1, %vm464_vm15  ;;  %vm10271_vm1 = vcmp.eq.s32.totalorder %v10257_v21, %v5713_v19  ;;  %v10344_v21 = vld [vmem:[#allocation285_spill] sm:$0xff] }
 0x4f2   : > { %v10266_v46 = vsel %vm8112_vm13, 4294967295, %v10265_v46  ;;  %vm8118_vm8 = vmor %vm10267_vm9, %vm1406_vm5  ;;  %vm10274_vm13 = vnez %v10239_v48  ;;  %vm10277_vm9 = vnez %v10249_v34  ;;  %v3055_v48 = vpop.permute.xlu0 %3054  ;;  %v10332_v34 = vld [vmem:[#allocation103_spill] sm:$0xff] }
 0x4f3   : > { %v10269_v28 = vsel %vm8118_vm8, 4294967295, %v10268_v28  ;;  %vm3163_vm7 = vmor %vm2971_vm11, %vm3131_vm12  ;;  %vm10278_vm12 = vnez %v10243_v30  ;;  %v10328_v30 = vmov 0 }
 0x4f4   : > { %vm8127_vm15 = vmor %vm10271_vm1, %vm463_vm6  ;;  %v3690_v42 = vsel %vm3163_vm7, 1.0, %v4085_v16  ;;  %vm10281_vm6 = vnez %v10246_v44  ;;  %v10330_v44 = vmov 0 }
 0x4f5   : > { %vm8133_vm5 = vmor %vm10274_vm13, %vm1405_vm3  ;;  %vm2572_vm3 = vcmp.eq.s32.totalorder %v6011_v58, %v5713_v19  ;;  %v10287_v58 = vld [vmem:[#allocation209_spill] sm:$0xff] }
 0x4f6   : > { %vm2028_vm8 = vmor %vm10277_vm9, %vm1996_vm0  ;;  %vm10284_vm0 = vcmask 785408   ;;  %vm3132_vm9 = vcmp.eq.s32.totalorder %v3052_v10, %v5713_v19  ;;  %v10368_v10 = vld [vmem:[#allocation133_spill] sm:$0xff] }
 0x4f7   : > { %vm8142_vm11 = vmor %vm10278_vm12, %vm639_vm10  ;;  %3827 = vmatprep.mubr.msk.f32.mxu0 %vm10284_vm0, %v3690_v42  ;;  %vm2764_vm10 = vcmp.eq.s32.totalorder %v6307_v33, %v5713_v19  ;;  %vm2956_vm12 = vcmp.eq.s32.totalorder %v2908_v13, %v5713_v19  ;;  %v10289_v33 = vld [vmem:[#allocation71_spill] sm:$0xff]  ;;  %v10334_v13 = vld [vmem:[#allocation117_spill] sm:$0xff] }
 0x4f8   : > { %v10280_v59 = vsel %vm8142_vm11, 4294967295, %v10279_v59  ;;  %vm8148_vm1 = vmor %vm10281_vm6, %vm1422_vm14  ;;  %vm10285_vm14 = vnez %v9877_v7  ;;  %v10291_v7 = vld [vmem:[#allocation90_spill] sm:$0xff]  ;;  %v10367_v42 = vld [vmem:[#allocation140_spill] sm:$0xff] }
 0x4f9   : > { %v10283_v0 = vsel %vm8148_vm1, 4294967295, %v10282_v0  ;;  %vm2220_vm13 = vmor %vm2028_vm8, %vm2188_vm2  ;;  %vm656_vm2 = vcmp.eq.s32.totalorder %v10286_v38, %v5713_v19  ;;  %vm1598_vm8 = vcmp.eq.s32.totalorder %v10287_v58, %v5713_v19  ;;  %vm1597_vm1 = vcmp.eq.s32.totalorder %v10290_v3, %v5713_v19  ;;  %v10370_v38 = vld [vmem:[#allocation156_spill] sm:$0xff]  ;;  %v10371_v58 = vld [vmem:[#allocation330_spill] sm:$0xff] }
 0x4fa   : > { %vm2412_vm7 = vmor %vm2220_vm13, %vm2380_vm4  ;;  %v10377_v3 = vmov 0 }
 0x4fb   : > { %vm3164_vm6 = vmor %vm10285_vm14, %vm3132_vm9  ;;  %vm1614_vm14 = vcmp.eq.s32.totalorder %v10292_v61, %v5713_v19  ;;  %v10382_v61 = vmov 0 }
 0x4fc   : > { %vm2604_vm11 = vmor %vm2412_vm7, %vm2572_vm3  ;;  %v3691_v17 = vsel %vm3164_vm6, 1.0, %v4085_v16  ;;  %vm3148_vm3 = vcmp.eq.s32.totalorder %v3100_v23, %v5713_v19  ;;  %vm10294_vm6 = vnez %v10266_v46  ;;  %vm1790_vm7 = vcmp.eq.s32.totalorder %v10300_v8, %v5713_v19  ;;  %v10355_v46 = vld [vmem:[#allocation346_spill] sm:$0xff] }
 0x4fd   : > { %vm2796_vm4 = vmor %vm2604_vm11, %vm2764_vm10  ;;  %vm1789_vm11 = vcmp.eq.s32.totalorder %v10293_v1, %v5713_v19  ;;  %v10373_v23 = vmov 0  ;;  %v10384_v1 = vld [vmem:[#allocation369_spill] sm:$0xff]  ;;  %v10386_v8 = vld [vmem:[#allocation46_spill] sm:$0xff] }
 0x4fe   : > { %vm10288_vm13 = vmmov %vm10284_vm0  ;;  %vm655_vm0 = vcmp.eq.s32.totalorder %v10289_v33, %v5713_v19  ;;  %v10375_v33 = vld [vmem:[#allocation89_spill] sm:$0xff] }
 0x4ff   : > { %3828 = vmatmul.mubr.msk.f32.gmra.mrb[6].mxu0 %vm10288_vm13, %v3691_v17  ;;  %vm2988_vm9 = vmor %vm2796_vm4, %vm2956_vm12  ;;  %vm10297_vm12 = vnez %v10269_v28  ;;  %v10358_v28 = vmov 0  ;;  %v10369_v17 = vld [vmem:[#allocation317_spill] sm:$0xff] }
 0x500   : > { %vm3180_vm10 = vmor %vm2988_vm9, %vm3148_vm3  ;;  %vm1981_vm3 = vcmp.eq.s32.totalorder %v10304_v18, %v5713_v19  ;;  %v10395_v18 = vmov 0 }
 0x501   : > { %vm8180_vm13 = vmor %vm10294_vm6, %vm656_vm2  ;;  %v3707_v12 = vsel %vm3180_vm10, 1.0, %v4085_v16  ;;  %vm10305_vm6 = vcmask 785408   ;;  %vm2173_vm10 = vcmp.eq.s32.totalorder %v10315_v54, %v5713_v19 }
 0x502   : > { %v10296_v41 = vsel %vm8180_vm13, 4294967295, %v10295_v41  ;;  %vm8186_vm4 = vmor %vm10297_vm12, %vm1598_vm8  ;;  %3852 = vmatmul.mubr.msk.f32.gmra.mrb[6].mxu1 %vm10305_vm6, %v3707_v12  ;;  %v10388_v12 = vmov 0 }
 0x503   : > { %vm8197_vm2 = vmor %vm8127_vm15, %vm655_vm0  ;;  %vm10308_vm15 = vcmp.eq.s32.totalorder %v10291_v7, %v5713_v19  ;;  %vm10309_vm0 = vnez %v10280_v59  ;;  %v2914_v59 = vpop.permute.xlu1 %2913  ;;  %v10380_v7 = vld [vmem:[#allocation92_spill] sm:$0xff] }
 0x504   : > { %v10303_v56 = vsel %vm8197_vm2, 4294967295, %v10302_v56  ;;  %vm1629_vm8 = vmor %vm8133_vm5, %vm1597_vm1  ;;  %vm10312_vm5 = vnez %v10283_v0  ;;  %vm847_vm2 = vcmp.eq.s32.totalorder %v10333_v45, %v5713_v19  ;;  %v3106_v0 = vpop.permute.xlu0 %3105  ;;  %v10420_v45 = vld [vmem:[#allocation255_spill] sm:$0xff] }
 0x505   : > { %vm8215_vm9 = vmor %vm10309_vm0, %vm10308_vm15  ;;  %vm290_vm15 = vcmp.eq.s32.totalorder %v10316_v11, %v5713_v19  ;;  %vm466_vm0 = vcmp.eq.s32.totalorder %v10317_v29, %v5713_v19  ;;  %v10406_v29 = vld [vmem:[#allocation126_spill] sm:$0xff] }
 0x506   : > { %v10311_v4 = vsel %vm8215_vm9, 4294967295, %v10310_v4  ;;  %vm8224_vm1 = vmor %vm10312_vm5, %vm1614_vm14 }
 0x507   : > { %v10314_v5 = vsel %vm8224_vm1, 4294967295, %v10313_v5  ;;  %vm1821_vm6 = vmor %vm1629_vm8, %vm1789_vm11  ;;  %vm2365_vm11 = vcmp.eq.s32.totalorder %v10320_v53, %v5713_v19  ;;  %vm10321_vm8 = vcmp.eq.s32.totalorder %v10301_v37, %v5713_v19  ;;  %vm2557_vm1 = vcmp.eq.s32.totalorder %v10324_v26, %v5713_v19  ;;  %v10410_v53 = vld [vmem:[#allocation119_spill] sm:$0xff] }
 0x508   : > { %vm8242_vm14 = vmor %vm8186_vm4, %vm1790_vm7  ;;  %vm306_vm7 = vcmp.eq.s32.totalorder %v10325_v52, %v5713_v19  ;;  %vm10326_vm4 = vcmp.eq.s32.totalorder %v10307_v2, %v5713_v19  ;;  %v10392_v37 = vmov 0  ;;  %v10414_v52 = vld [vmem:[#allocation227_spill] sm:$0xff] }
 0x509   : > { %v10319_v47 = vsel %vm8242_vm14, 4294967295, %v10318_v47  ;;  %vm8251_vm5 = vmor %vm290_vm15, %vm10321_vm8  ;;  %vm10327_vm14 = vcmp.eq.s32.totalorder %v10306_v39, %v5713_v19  ;;  %vm848_vm8 = vcmp.eq.s32.totalorder %v10332_v34, %v5713_v19  ;;  %v10397_v39 = vld [vmem:[#allocation165_spill] sm:$0xff]  ;;  %v10419_v34 = vld [vmem:[#allocation240_spill] sm:$0xff] }
 0x50a   : > { %v10323_v32 = vsel %vm8251_vm5, 4294967295, %v10322_v32  ;;  %vm2013_vm12 = vmor %vm1821_vm6, %vm1981_vm3  ;;  %vm2749_vm3 = vcmp.eq.s32.totalorder %v6647_v40, %v5713_v19  ;;  %v10335_v40 = vld [vmem:[#allocation268_spill] sm:$0xff] }
 0x50b   : > { %vm8265_vm9 = vmor %vm10327_vm14, %vm10326_vm4  ;;  %vm3133_vm14 = vcmp.eq.s32.totalorder %v3055_v48, %v5713_v19  ;;  %vm10336_vm4 = vnez %v10296_v41  ;;  %v3103_v41 = vpop.permute.xlu1 %3102  ;;  %v10413_v48 = vld [vmem:[#allocation142_spill] sm:$0xff] }
 0x50c   : > { %v10329_v30 = vsel %vm8265_vm9, 4294967295, %v10328_v30  ;;  %vm2205_vm15 = vmor %vm2013_vm12, %vm2173_vm10  ;;  %vm1023_vm10 = vcmp.eq.s32.totalorder %v10334_v13, %v5713_v19  ;;  %vm1806_vm12 = vcmp.eq.s32.totalorder %v10335_v40, %v5713_v19  ;;  %v10424_v13 = vld [vmem:[#allocation301_spill] sm:$0xff]  ;;  %v10426_v40 = vmov 0 }
 0x50d   : > { %vm8271_vm6 = vmor %vm306_vm7, %vm466_vm0  ;;  %vm2941_vm7 = vcmp.eq.s32.totalorder %v2863_v20, %v5713_v19  ;;  %v10422_v20 = vmov 0 }
 0x50e   : > { %v10331_v44 = vsel %vm8271_vm6, 4294967295, %v10330_v44  ;;  %vm2397_vm5 = vmor %vm2205_vm15, %vm2365_vm11  ;;  %vm10341_vm15 = vnez %v10303_v56 }
 0x50f   : > { %vm2589_vm13 = vmor %vm2397_vm5, %vm2557_vm1  ;;  %vm1982_vm1 = vcmp.eq.s32.totalorder %v10339_v6, %v5713_v19  ;;  %vm642_vm5 = vcmp.eq.s32.totalorder %v10340_v62, %v5713_v19  ;;  %v3058_v2 = vpop.permute.xlu1 %3057  ;;  %v10430_v6 = vld [vmem:[#allocation316_spill] sm:$0xff]  ;;  %v10431_v62 = vmov 0 }
 0x510   : > { %vm2781_vm0 = vmor %vm2589_vm13, %vm2749_vm3  ;;  %vm1998_vm13 = vcmp.eq.s32.totalorder %v10344_v21, %v5713_v19 }
 0x511   : > { %vm8287_vm6 = vmor %vm10336_vm4, %vm848_vm8  ;;  %vm641_vm8 = vcmp.eq.s32.totalorder %v10345_v24, %v5713_v19  ;;  %vm10346_vm4 = vnez %v10311_v4  ;;  %v10399_v4 = vld [vmem:[#allocation172_spill] sm:$0xff]  ;;  %v10434_v24 = vld [vmem:[#allocation366_spill] sm:$0xff] }
 0x512   : > { %v10338_v22 = vsel %vm8287_vm6, 4294967295, %v10337_v22  ;;  %vm2973_vm11 = vmor %vm2781_vm0, %vm2941_vm7  ;;  %vm10349_vm0 = vnez %v10314_v5  ;;  %v10401_v5 = vld [vmem:[#allocation179_spill] sm:$0xff] }
 0x513   : > { %vm8297_vm9 = vmor %vm10341_vm15, %vm847_vm2  ;;  %vm2190_vm2 = vcmp.eq.s32.totalorder %v10350_v55, %v5713_v19  ;;  %v2725_v26 = vpop.permute.xlu1 %2724  ;;  %v10435_v55 = vld [vmem:[#allocation151_spill] sm:$0xff] }
 0x514   : > { %v10343_v57 = vsel %vm8297_vm9, 4294967295, %v10342_v57  ;;  %vm3165_vm3 = vmor %vm2973_vm11, %vm3133_vm14  ;;  %vm658_vm14 = vcmp.eq.s32.totalorder %v10351_v31, %v5713_v19  ;;  %vm10352_vm11 = vnez %v10319_v47  ;;  %vm2766_vm9 = vcmp.eq.s32.totalorder %v2722_v35, %v5713_v19  ;;  %v10405_v35 = vld [vmem:[#allocation195_spill] sm:$0xff]  ;;  %v10408_v47 = vld [vmem:[#allocation206_spill] sm:$0xff] }
 0x515   : > { %vm8307_vm6 = vmor %vm10346_vm4, %vm1023_vm10  ;;  %v3692_v63 = vsel %vm3165_vm3, 1.0, %v4085_v16  ;;  %vm2382_vm10 = vcmp.eq.s32.totalorder %v10355_v46, %v5713_v19  ;;  %vm10356_vm4 = vcmask 785408   ;;  %v10439_v46 = vld [vmem:[#allocation167_spill] sm:$0xff] }
 0x516   : > { %v10348_v9 = vsel %vm8307_vm6, 4294967295, %v10347_v9  ;;  %vm1838_vm7 = vmor %vm10349_vm0, %vm1806_vm12  ;;  %3830 = vmatprep.mubr.msk.f32.mxu0 %vm10356_vm4, %v3692_v63  ;;  %vm10357_vm12 = vnez %v10323_v32  ;;  %vm2574_vm6 = vcmp.eq.s32.totalorder %v10360_v43, %v5713_v19  ;;  %vm10364_vm4 = vnez %v10331_v44  ;;  %v10412_v32 = vld [vmem:[#allocation222_spill] sm:$0xff]  ;;  %v10436_v63 = vld [vmem:[#allocation12_spill] sm:$0xff] }
 0x517   : > { %vm8320_vm15 = vmor %vm10352_vm11, %vm1982_vm1  ;;  %vm10361_vm1 = vnez %v10329_v30  ;;  %v10415_v30 = vld [vmem:[#allocation237_spill] sm:$0xff]  ;;  %v10417_v44 = vmov 0  ;;  %v2869_v21 = vpop.permute.xlu1 %2868  ;;  %v10442_v43 = vmov 0 }
 0x518   : > { %v10354_v50 = vsel %vm8320_vm15, 4294967295, %v10353_v50  ;;  %vm8329_vm0 = vmor %vm10357_vm12, %vm642_vm5 }
 0x519   : > { %v10359_v28 = vsel %vm8329_vm0, 4294967295, %v10358_v28  ;;  %vm2030_vm3 = vmor %vm1838_vm7, %vm1998_vm13  ;;  %vm1040_vm13 = vcmp.eq.s32.totalorder %v10367_v42, %v5713_v19  ;;  %v10448_v42 = vld [vmem:[#allocation300_spill] sm:$0xff] }
 0x51a   : > { %vm8337_vm11 = vmor %vm10361_vm1, %vm641_vm8  ;;  %vm1039_vm8 = vcmp.eq.s32.totalorder %v10368_v10, %v5713_v19  ;;  %vm2366_vm1 = vcmp.eq.s32.totalorder %v10371_v58, %v5713_v19  ;;  %v10456_v10 = vmov 0 }
 0x51b   : > { %v10363_v51 = vsel %vm8337_vm11, 4294967295, %v10362_v51  ;;  %vm2222_vm15 = vmor %vm2030_vm3, %vm2190_vm2  ;;  %vm2174_vm2 = vcmp.eq.s32.totalorder %v10369_v17, %v5713_v19  ;;  %vm2958_vm3 = vcmp.eq.s32.totalorder %v2914_v59, %v5713_v19  ;;  %vm3150_vm11 = vcmp.eq.s32.totalorder %v3106_v0, %v5713_v19  ;;  %v2917_v31 = vpop.permute.xlu1 %2916  ;;  %v10458_v17 = vld [vmem:[#allocation351_spill] sm:$0xff] }
 0x51c   : > { %vm8344_vm5 = vmor %vm10364_vm4, %vm658_vm14  ;;  %vm1215_vm14 = vcmp.eq.s32.totalorder %v10370_v38, %v5713_v19  ;;  %v10450_v59 = vmov 0  ;;  %v10453_v0 = vmov 0 }
 0x51d   : > { %v10366_v60 = vsel %vm8344_vm5, 4294967295, %v10365_v60  ;;  %vm2414_vm7 = vmor %vm2222_vm15, %vm2382_vm10  ;;  %vm10372_vm15 = vnez %v10338_v22  ;;  %v10428_v22 = vmov 0 }
 0x51e   : > { %vm2606_vm12 = vmor %vm2414_vm7, %vm2574_vm6  ;;  %vm834_vm6 = vcmp.eq.s32.totalorder %v10375_v33, %v5713_v19  ;;  %vm10376_vm7 = vnez %v10343_v57  ;;  %v10433_v57 = vld [vmem:[#allocation362_spill] sm:$0xff]  ;;  %v10462_v33 = vld [vmem:[#allocation69_spill] sm:$0xff] }
 0x51f   : > { %vm2798_vm4 = vmor %vm2606_vm12, %vm2766_vm9  ;;  %vm10379_vm9 = vnez %v10354_v50  ;;  %v10438_v50 = vld [vmem:[#allocation34_spill] sm:$0xff]  ;;  %v2920_v58 = vpop.permute.xlu1 %2919 }
 0x520   : > { %vm8361_vm10 = vmor %vm10372_vm15, %vm1040_vm13  ;;  %vm833_vm13 = vcmp.eq.s32.totalorder %v10380_v7, %v5713_v19  ;;  %vm10381_vm15 = vnez %v10348_v9  ;;  %v3109_v9 = vpop.permute.xlu0 %3108  ;;  %v10464_v7 = vld [vmem:[#allocation45_spill] sm:$0xff] }
 0x521   : > { %v10374_v23 = vsel %vm8361_vm10, 4294967295, %v10373_v23  ;;  %vm2990_vm5 = vmor %vm2798_vm4, %vm2958_vm3  ;;  %vm2558_vm10 = vcmp.eq.s32.totalorder %v10384_v1, %v5713_v19  ;;  %v10466_v1 = vld [vmem:[#allocation23_spill] sm:$0xff] }
 0x522   : > { %vm8370_vm0 = vmor %vm10376_vm7, %vm1039_vm8  ;;  %vm850_vm8 = vcmp.eq.s32.totalorder %v10385_v27, %v5713_v19  ;;  %v10468_v27 = vld [vmem:[#allocation181_spill] sm:$0xff] }
 0x523   : > { %v10378_v3 = vsel %vm8370_vm0, 4294967295, %v10377_v3  ;;  %vm2206_vm12 = vmor %vm10379_vm9, %vm2174_vm2  ;;  %vm2750_vm2 = vcmp.eq.s32.totalorder %v10386_v8, %v5713_v19  ;;  %vm3149_vm9 = vcmp.eq.s32.totalorder %v3103_v41, %v5713_v19  ;;  %vm10387_vm0 = vnez %v10359_v28  ;;  %v10440_v28 = vld [vmem:[#allocation270_spill] sm:$0xff]  ;;  %v10467_v41 = vld [vmem:[#allocation44_spill] sm:$0xff] }
 0x524   : > { %vm8380_vm3 = vmor %vm10381_vm15, %vm1215_vm14  ;;  %v10469_v8 = vld [vmem:[#allocation287_spill] sm:$0xff] }
 0x525   : > { %v10383_v61 = vsel %vm8380_vm3, 4294967295, %v10382_v61  ;;  %vm2398_vm4 = vmor %vm2206_vm12, %vm2366_vm1  ;;  %vm2942_vm1 = vcmp.eq.s32.totalorder %v2866_v49, %v5713_v19  ;;  %vm10390_vm12 = vnez %v9891_v25  ;;  %vm10391_vm3 = vnez %v10363_v51  ;;  %v10437_v49 = vld [vmem:[#allocation158_spill] sm:$0xff] }
 0x526   : > { %vm3182_vm7 = vmor %vm2990_vm5, %vm3150_vm11  ;;  %v10444_v51 = vld [vmem:[#allocation286_spill] sm:$0xff] }
 0x527   : > { %vm8393_vm14 = vmor %vm10387_vm0, %vm834_vm6  ;;  %vm10394_vm0 = vnez %v10366_v60  ;;  %v3709_v25 = vsel %vm3182_vm7, 1.0, %v4085_v16  ;;  %vm1423_vm7 = vcmp.eq.s32.totalorder %v10405_v35, %v5713_v19  ;;  %v10446_v60 = vmov 0 }
 0x528   : > { %v10389_v12 = vsel %vm8393_vm14, 4294967295, %v10388_v12  ;;  %vm3181_vm15 = vmor %vm10390_vm12, %vm3149_vm9  ;;  %vm1232_vm14 = vcmp.eq.s32.totalorder %v10397_v39, %v5713_v19  ;;  %v10474_v39 = vmov 0  ;;  %v10488_v35 = vmov 0 }
 0x529   : > { %vm8402_vm5 = vmor %vm10391_vm3, %vm833_vm13  ;;  %v3708_v56 = vsel %vm3181_vm15, 1.0, %v4085_v16  ;;  %vm10398_vm13 = vcmask 785408  }
 0x52a   : > { %v10393_v37 = vsel %vm8402_vm5, 4294967295, %v10392_v37  ;;  %vm2590_vm11 = vmor %vm2398_vm4, %vm2558_vm10  ;;  %3854 = vmatprep.mubr.msk.f32.mxu1 %vm10398_vm13, %v3708_v56  ;;  %vm1231_vm10 = vcmp.eq.s32.totalorder %v10399_v4, %v5713_v19  ;;  %vm3134_vm4 = vcmp.eq.s32.totalorder %v3058_v2, %v5713_v19  ;;  %v10471_v56 = vld [vmem:[#allocation208_spill] sm:$0xff] }
 0x52b   : > { %vm8409_vm6 = vmor %vm10394_vm0, %vm850_vm8  ;;  %vm1407_vm8 = vcmp.eq.s32.totalorder %v10401_v5, %v5713_v19  ;;  %vm10402_vm0 = vnez %v10374_v23  ;;  %v10460_v23 = vld [vmem:[#allocation358_spill] sm:$0xff]  ;;  %v10479_v2 = vld [vmem:[#allocation348_spill] sm:$0xff]  ;;  %v10484_v5 = vmov 0 }
 0x52c   : > { %v10396_v18 = vsel %vm8409_vm6, 4294967295, %v10395_v18  ;;  %vm2782_vm9 = vmor %vm2590_vm11, %vm2750_vm2  ;;  %vm10407_vm11 = vnez %v10378_v3  ;;  %v10463_v3 = vld [vmem:[#allocation22_spill] sm:$0xff] }
 0x52d   : > { %vm2974_vm3 = vmor %vm2782_vm9, %vm2942_vm1  ;;  %vm1026_vm1 = vcmp.eq.s32.totalorder %v10406_v29, %v5713_v19  ;;  %v10493_v29 = vld [vmem:[#allocation58_spill] sm:$0xff] }
 0x52e   : > { %vm10400_vm12 = vmmov %vm10398_vm13  ;;  %vm1424_vm13 = vcmp.eq.s32.totalorder %v10408_v47, %v5713_v19 }
 0x52f   : > { %3855 = vmatmul.mubr.msk.f32.gmra.mrb[8].mxu1 %vm10400_vm12, %v3709_v25  ;;  %vm3166_vm15 = vmor %vm2974_vm3, %vm3134_vm4  ;;  %vm10411_vm4 = vnez %v10383_v61  ;;  %v10465_v61 = vld [vmem:[#allocation192_spill] sm:$0xff]  ;;  %v10477_v25 = vmov 0 }
 0x530   : > { %vm8425_vm2 = vmor %vm10402_vm0, %vm1232_vm14  ;;  %v3693_v11 = vsel %vm3166_vm15, 1.0, %v4085_v16  ;;  %vm1025_vm14 = vcmp.eq.s32.totalorder %v10410_v53, %v5713_v19  ;;  %vm1599_vm15 = vcmp.eq.s32.totalorder %v10412_v32, %v5713_v19  ;;  %vm1042_vm0 = vcmp.eq.s32.totalorder %v10413_v48, %v5713_v19  ;;  %v10495_v53 = vld [vmem:[#allocation64_spill] sm:$0xff]  ;;  %v10498_v48 = vld [vmem:[#allocation213_spill] sm:$0xff] }
 0x531   : > { %vm1263_vm9 = vmor %vm10407_vm11, %vm1231_vm10  ;;  %vm1616_vm10 = vcmp.eq.s32.totalorder %v10414_v52, %v5713_v19  ;;  %vm1615_vm11 = vcmp.eq.s32.totalorder %v10415_v30, %v5713_v19  ;;  %v10500_v30 = vld [vmem:[#allocation75_spill] sm:$0xff] }
 0x532   : > { %vm10409_vm3 = vmmov %vm10400_vm12 }
 0x533   : > { %3831 = vmatmul.mubr.msk.f32.gmra.mrb[8].mxu0 %vm10409_vm3, %v3693_v11  ;;  %vm1439_vm12 = vmor %vm10411_vm4, %vm1407_vm8  ;;  %vm10416_vm3 = vnez %v10389_v12  ;;  %vm1791_vm4 = vcmp.eq.s32.totalorder %v10419_v34, %v5713_v19  ;;  %v3061_v12 = vpop.permute.xlu1 %3060  ;;  %v10491_v11 = vmov 0  ;;  %v10503_v34 = vld [vmem:[#allocation229_spill] sm:$0xff] }
 0x534   : > { %vm1455_vm6 = vmor %vm1263_vm9, %vm1423_vm7  ;;  %vm1807_vm7 = vcmp.eq.s32.totalorder %v10420_v45, %v5713_v19  ;;  %vm10421_vm9 = vnez %v10393_v37  ;;  %v10470_v37 = vld [vmem:[#allocation59_spill] sm:$0xff]  ;;  %v10504_v45 = vld [vmem:[#allocation242_spill] sm:$0xff] }
 0x535   : > { %vm8453_vm5 = vmor %vm10416_vm3, %vm1026_vm1 }
 0x536   : > { %v10418_v44 = vsel %vm8453_vm5, 4294967295, %v10417_v44  ;;  %vm1456_vm8 = vmor %vm8425_vm2, %vm1424_vm13  ;;  %vm1999_vm5 = vcmp.eq.s32.totalorder %v10424_v13, %v5713_v19  ;;  %vm10425_vm2 = vnez %v10396_v18  ;;  %v10472_v18 = vld [vmem:[#allocation335_spill] sm:$0xff]  ;;  %v10509_v13 = vld [vmem:[#allocation256_spill] sm:$0xff] }
 0x537   : > { %vm8465_vm1 = vmor %vm10421_vm9, %vm1025_vm14  ;;  %v3064_v47 = vpop.permute.xlu1 %3063 }
 0x538   : > { %v10423_v20 = vsel %vm8465_vm1, 4294967295, %v10422_v20  ;;  %vm1631_vm3 = vmor %vm1439_vm12, %vm1599_vm15  ;;  %vm2191_vm1 = vcmp.eq.s32.totalorder %v10430_v6, %v5713_v19  ;;  %v10513_v6 = vld [vmem:[#allocation288_spill] sm:$0xff] }
 0x539   : > { %vm8473_vm13 = vmor %vm10425_vm2, %vm1042_vm0  ;;  %vm2383_vm0 = vcmp.eq.s32.totalorder %v10433_v57, %v5713_v19  ;;  %v10519_v57 = vmov 0 }
 0x53a   : > { %v10427_v40 = vsel %vm8473_vm13, 4294967295, %v10426_v40  ;;  %vm8477_vm9 = vmor %vm1456_vm8, %vm1616_vm10  ;;  %vm2575_vm10 = vcmp.eq.s32.totalorder %v10434_v24, %v5713_v19 }
 0x53b   : > { %v10429_v22 = vsel %vm8477_vm9, 4294967295, %v10428_v22  ;;  %vm1647_vm14 = vmor %vm1455_vm6, %vm1615_vm11  ;;  %vm2767_vm6 = vcmp.eq.s32.totalorder %v2725_v26, %v5713_v19  ;;  %vm1218_vm11 = vcmp.eq.s32.totalorder %v10435_v55, %v5713_v19  ;;  %vm10445_vm9 = vnez %v10423_v20  ;;  %v10497_v26 = vld [vmem:[#allocation78_spill] sm:$0xff]  ;;  %v3112_v52 = vpop.permute.xlu1 %3111  ;;  %v10524_v55 = vld [vmem:[#allocation353_spill] sm:$0xff] }
 0x53c   : > { %vm8483_vm12 = vmor %vm1631_vm3, %vm1791_vm4  ;;  %vm10441_vm3 = vnez %v10418_v44  ;;  %v10501_v44 = vld [vmem:[#allocation224_spill] sm:$0xff]  ;;  %v10506_v20 = vmov 0 }
 0x53d   : > { %v10432_v62 = vsel %vm8483_vm12, 4294967295, %v10431_v62  ;;  %vm1839_vm15 = vmor %vm1647_vm14, %vm1807_vm7  ;;  %vm1217_vm7 = vcmp.eq.s32.totalorder %v10437_v49, %v5713_v19  ;;  %v10526_v49 = vld [vmem:[#allocation73_spill] sm:$0xff] }
 0x53e   : > { %vm2031_vm2 = vmor %vm1839_vm15, %vm1999_vm5  ;;  %vm3151_vm5 = vcmp.eq.s32.totalorder %v3109_v9, %v5713_v19  ;;  %vm451_vm15 = vcmp.eq.s32.totalorder %v10438_v50, %v5713_v19  ;;  %v10522_v9 = vmov 0  ;;  %v3067_v50 = vpop.permute.xlu0 %3066 }
 0x53f   : > { %vm2223_vm8 = vmor %vm2031_vm2, %vm2191_vm1  ;;  %vm1234_vm1 = vcmp.eq.s32.totalorder %v10439_v46, %v5713_v19  ;;  %vm1808_vm2 = vcmp.eq.s32.totalorder %v10440_v28, %v5713_v19  ;;  %v2734_v24 = vpop.permute.xlu1 %2733  ;;  %v10528_v46 = vld [vmem:[#allocation110_spill] sm:$0xff] }
 0x540   : > { %vm2415_vm4 = vmor %vm2223_vm8, %vm2383_vm0  ;;  %vm2959_vm8 = vcmp.eq.s32.totalorder %v2917_v31, %v5713_v19  ;;  %v10527_v31 = vld [vmem:[#allocation107_spill] sm:$0xff] }
 0x541   : > { %vm2607_vm14 = vmor %vm2415_vm4, %vm2575_vm10  ;;  %vm1983_vm10 = vcmp.eq.s32.totalorder %v10444_v51, %v5713_v19  ;;  %v10530_v51 = vld [vmem:[#allocation272_spill] sm:$0xff] }
 0x542   : > { %vm2799_vm0 = vmor %vm2607_vm14, %vm2767_vm6  ;;  %vm2175_vm6 = vcmp.eq.s32.totalorder %v10448_v42, %v5713_v19  ;;  %v10534_v42 = vld [vmem:[#allocation273_spill] sm:$0xff] }
 0x543   : > { %vm8508_vm12 = vmor %vm10441_vm3, %vm1218_vm11  ;;  %vm10449_vm11 = vcmp.eq.s32.totalorder %v10436_v63, %v5713_v19  ;;  %v10525_v63 = vld [vmem:[#allocation360_spill] sm:$0xff]  ;;  %v2875_v28 = vpop.permute.xlu1 %2874 }
 0x544   : > { %v10443_v43 = vsel %vm8508_vm12, 4294967295, %v10442_v43  ;;  %vm2991_vm4 = vmor %vm2799_vm0, %vm2959_vm8  ;;  %vm10452_vm12 = vnez %v10427_v40 }
 0x545   : > { %vm8516_vm13 = vmor %vm10445_vm9, %vm1217_vm7  ;;  %vm10455_vm9 = vnez %v10429_v22  ;;  %v10588_v22 = vld [vmem:[#allocation368_spill] sm:$0xff] }
 0x546   : > { %v10447_v60 = vsel %vm8516_vm13, 4294967295, %v10446_v60  ;;  %vm3183_vm14 = vmor %vm2991_vm4, %vm3151_vm5  ;;  %vm2367_vm5 = vcmp.eq.s32.totalorder %v10458_v17, %v5713_v19  ;;  %v10541_v17 = vld [vmem:[#allocation337_spill] sm:$0xff] }
 0x547   : > { %vm8525_vm3 = vmor %vm10449_vm11, %vm451_vm15  ;;  %v3710_v38 = vsel %vm3183_vm14, 1.0, %v4085_v16  ;;  %vm10459_vm15 = vnez %v10432_v62  ;;  %vm468_vm14 = vcmp.eq.s32.totalorder %v10464_v7, %v5713_v19  ;;  %v10548_v7 = vld [vmem:[#allocation144_spill] sm:$0xff] }
 0x548   : > { %v10451_v59 = vsel %vm8525_vm3, 4294967295, %v10450_v59  ;;  %vm8531_vm0 = vmor %vm10452_vm12, %vm1234_vm1  ;;  %vm2559_vm12 = vcmp.eq.s32.totalorder %v10460_v23, %v5713_v19  ;;  %vm10461_vm1 = vcmask 785408   ;;  %vm3135_vm3 = vcmp.eq.s32.totalorder %v3061_v12, %v5713_v19 }
 0x549   : > { %v10454_v0 = vsel %vm8531_vm0, 4294967295, %v10453_v0  ;;  %vm8537_vm7 = vmor %vm10455_vm9, %vm1808_vm2  ;;  %3857 = vmatprep.mubr.msk.f32.mxu1 %vm10461_vm1, %v3710_v38  ;;  %vm2751_vm2 = vcmp.eq.s32.totalorder %v10462_v33, %v5713_v19  ;;  %vm2943_vm9 = vcmp.eq.s32.totalorder %v2869_v21, %v5713_v19  ;;  %vm643_vm0 = vcmp.eq.s32.totalorder %v10470_v37, %v5713_v19  ;;  %v10521_v21 = vld [vmem:[#allocation302_spill] sm:$0xff]  ;;  %v2878_v38 = vpop.permute.xlu1 %2877 }
 0x54a   : > { %v10457_v10 = vsel %vm8537_vm7, 4294967295, %v10456_v10  ;;  %vm2015_vm8 = vmor %vm10459_vm15, %vm1983_vm10  ;;  %vm1410_vm10 = vcmp.eq.s32.totalorder %v10465_v61, %v5713_v19  ;;  %vm10473_vm7 = vcmp.eq.s32.totalorder %v10463_v3, %v5713_v19  ;;  %v10543_v23 = vmov 0  ;;  %v10545_v33 = vld [vmem:[#allocation350_spill] sm:$0xff] }
 0x54b   : > { %vm2207_vm4 = vmor %vm2015_vm8, %vm2175_vm6  ;;  %vm467_vm6 = vcmp.eq.s32.totalorder %v10467_v41, %v5713_v19  ;;  %vm2000_vm8 = vcmp.eq.s32.totalorder %v10469_v8, %v5713_v19  ;;  %v10547_v3 = vld [vmem:[#allocation62_spill] sm:$0xff]  ;;  %v10550_v41 = vld [vmem:[#allocation321_spill] sm:$0xff]  ;;  %v10554_v12 = vmov 0  ;;  %v10556_v37 = vmov 0 }
 0x54c   : > { %vm2399_vm11 = vmor %vm2207_vm4, %vm2367_vm5  ;;  %vm1409_vm5 = vcmp.eq.s32.totalorder %v10468_v27, %v5713_v19  ;;  %v10551_v27 = vld [vmem:[#allocation160_spill] sm:$0xff]  ;;  %v10552_v8 = vld [vmem:[#allocation334_spill] sm:$0xff] }
 0x54d   : > { %vm2591_vm15 = vmor %vm2399_vm11, %vm2559_vm12  ;;  %vm1426_vm12 = vcmp.eq.s32.totalorder %v10471_v56, %v5713_v19  ;;  %vm2192_vm11 = vcmp.eq.s32.totalorder %v10472_v18, %v5713_v19  ;;  %v2926_v61 = vpop.permute.xlu1 %2925  ;;  %v3118_v56 = vpop.permute.xlu0 %3117  ;;  %v10560_v18 = vmov 0 }
 0x54e   : > { %vm2783_vm4 = vmor %vm2591_vm15, %vm2751_vm2  ;;  %vm10476_vm2 = vnez %v10443_v43  ;;  %v10529_v43 = vld [vmem:[#allocation121_spill] sm:$0xff] }
 0x54f   : > { %vm2975_vm1 = vmor %vm2783_vm4, %vm2943_vm9  ;;  %vm2384_vm4 = vcmp.eq.s32.totalorder %v10479_v2, %v5713_v19  ;;  %v10563_v2 = vld [vmem:[#allocation47_spill] sm:$0xff] }
 0x550   : > { %vm8576_vm13 = vmor %vm10473_vm7, %vm468_vm14  ;;  %vm10480_vm7 = vcmp.eq.s32.totalorder %v10466_v1, %v5713_v19  ;;  %v10549_v1 = vld [vmem:[#allocation137_spill] sm:$0xff] }
 0x551   : > { %v10475_v39 = vsel %vm8576_vm13, 4294967295, %v10474_v39  ;;  %vm8582_vm15 = vmor %vm10476_vm2, %vm1410_vm10  ;;  %vm10483_vm13 = vnez %v10447_v60  ;;  %vm10486_vm10 = vnez %v10457_v10  ;;  %v10532_v60 = vmov 0 }
 0x552   : > { %v10478_v25 = vsel %vm8582_vm15, 4294967295, %v10477_v25  ;;  %vm3167_vm9 = vmor %vm2975_vm1, %vm3135_vm3  ;;  %vm10487_vm3 = vnez %v10451_v59  ;;  %v10538_v10 = vmov 0 }
 0x553   : > { %vm8591_vm14 = vmor %vm10480_vm7, %vm467_vm6  ;;  %v3694_v54 = vsel %vm3167_vm9, 1.0, %v4085_v16  ;;  %vm10490_vm6 = vnez %v10454_v0  ;;  %v10537_v0 = vld [vmem:[#allocation289_spill] sm:$0xff] }
 0x554   : > { %vm8597_vm2 = vmor %vm10483_vm13, %vm1409_vm5  ;;  %vm2576_vm5 = vcmp.eq.s32.totalorder %v10493_v29, %v5713_v19  ;;  %v10571_v29 = vld [vmem:[#allocation199_spill] sm:$0xff] }
 0x555   : > { %v10485_v5 = vsel %vm8597_vm2, 4294967295, %v10484_v5  ;;  %vm2032_vm15 = vmor %vm10486_vm10, %vm2000_vm8  ;;  %vm10494_vm8 = vcmask 785408   ;;  %vm3136_vm10 = vcmp.eq.s32.totalorder %v3064_v47, %v5713_v19  ;;  %vm1794_vm2 = vcmp.eq.s32.totalorder %v10509_v13, %v5713_v19  ;;  %v10587_v13 = vld [vmem:[#allocation363_spill] sm:$0xff] }
 0x556   : > { %vm8606_vm1 = vmor %vm10487_vm3, %vm643_vm0  ;;  %3833 = vmatprep.mubr.msk.f32.mxu0 %vm10494_vm8, %v3694_v54  ;;  %vm2768_vm0 = vcmp.eq.s32.totalorder %v10495_v53, %v5713_v19  ;;  %vm2960_vm3 = vcmp.eq.s32.totalorder %v2920_v58, %v5713_v19  ;;  %v10573_v53 = vld [vmem:[#allocation210_spill] sm:$0xff] }
 0x557   : > { %v10489_v35 = vsel %vm8606_vm1, 4294967295, %v10488_v35  ;;  %vm8612_vm7 = vmor %vm10490_vm6, %vm1426_vm12  ;;  %vm10496_vm12 = vnez %v9924_v14  ;;  %v10502_v14 = vld [vmem:[#allocation94_spill] sm:$0xff] }
 0x558   : > { %v10492_v11 = vsel %vm8612_vm7, 4294967295, %v10491_v11  ;;  %vm2224_vm13 = vmor %vm2032_vm15, %vm2192_vm11  ;;  %vm660_vm11 = vcmp.eq.s32.totalorder %v10497_v26, %v5713_v19  ;;  %vm1602_vm15 = vcmp.eq.s32.totalorder %v10498_v48, %v5713_v19  ;;  %vm1601_vm7 = vcmp.eq.s32.totalorder %v10501_v44, %v5713_v19  ;;  %v10577_v48 = vld [vmem:[#allocation231_spill] sm:$0xff] }
 0x559   : > { %vm2416_vm9 = vmor %vm2224_vm13, %vm2384_vm4  ;;  %v10580_v44 = vld [vmem:[#allocation259_spill] sm:$0xff] }
 0x55a   : > { %vm3168_vm6 = vmor %vm10496_vm12, %vm3136_vm10  ;;  %vm1618_vm12 = vcmp.eq.s32.totalorder %v10503_v34, %v5713_v19 }
 0x55b   : > { %vm2608_vm1 = vmor %vm2416_vm9, %vm2576_vm5  ;;  %v3695_v32 = vsel %vm3168_vm6, 1.0, %v4085_v16  ;;  %vm3152_vm5 = vcmp.eq.s32.totalorder %v3112_v52, %v5713_v19  ;;  %vm835_vm9 = vcmp.eq.s32.totalorder %v10502_v14, %v5713_v19  ;;  %vm10505_vm6 = vnez %v10475_v39  ;;  %v10562_v39 = vld [vmem:[#allocation370_spill] sm:$0xff]  ;;  %v10578_v52 = vld [vmem:[#allocation241_spill] sm:$0xff] }
 0x55c   : > { %vm2800_vm4 = vmor %vm2608_vm1, %vm2768_vm0  ;;  %vm1793_vm1 = vcmp.eq.s32.totalorder %v10504_v45, %v5713_v19  ;;  %v10581_v14 = vld [vmem:[#allocation305_spill] sm:$0xff]  ;;  %v10584_v45 = vld [vmem:[#allocation320_spill] sm:$0xff] }
 0x55d   : > { %vm10499_vm13 = vmmov %vm10494_vm8  ;;  %vm659_vm8 = vcmp.eq.s32.totalorder %v10500_v30, %v5713_v19  ;;  %v10579_v30 = vld [vmem:[#allocation244_spill] sm:$0xff] }
 0x55e   : > { %3834 = vmatmul.mubr.msk.f32.gmra.mrb[10].mxu0 %vm10499_vm13, %v3695_v32  ;;  %vm2992_vm10 = vmor %vm2800_vm4, %vm2960_vm3  ;;  %vm10508_vm3 = vnez %v10478_v25  ;;  %v3115_v25 = vpop.permute.xlu1 %3114  ;;  %v10576_v32 = vld [vmem:[#allocation226_spill] sm:$0xff] }
 0x55f   : > { %vm3184_vm0 = vmor %vm2992_vm10, %vm3152_vm5  ;;  %vm10512_vm10 = vnez %v10485_v5  ;;  %v10565_v5 = vld [vmem:[#allocation169_spill] sm:$0xff] }
 0x560   : > { %vm8644_vm13 = vmor %vm10505_vm6, %vm660_vm11  ;;  %v3711_v40 = vsel %vm3184_vm0, 1.0, %v4085_v16  ;;  %vm1985_vm6 = vcmp.eq.s32.totalorder %v10513_v6, %v5713_v19  ;;  %vm10518_vm0 = vnez %v10492_v11  ;;  %v10567_v11 = vld [vmem:[#allocation176_spill] sm:$0xff]  ;;  %v3121_v6 = vpop.permute.xlu0 %3120 }
 0x561   : > { %v10507_v20 = vsel %vm8644_vm13, 4294967295, %v10506_v20  ;;  %vm1634_vm4 = vmor %vm10508_vm3, %vm1602_vm15  ;;  %vm10514_vm13 = vcmask 785408   ;;  %vm10515_vm15 = vnez %v10489_v35 }
 0x562   : > { %vm8655_vm5 = vmor %vm8591_vm14, %vm659_vm8  ;;  %3858 = vmatmul.mubr.msk.f32.gmra.mrb[10].mxu1 %vm10514_vm13, %v3711_v40  ;;  %v3070_v54 = vpop.permute.xlu1 %3069 }
 0x563   : > { %vm1633_vm11 = vmor %vm10512_vm10, %vm1601_vm7  ;;  %vm2177_vm7 = vcmp.eq.s32.totalorder %v10521_v21, %v5713_v19  ;;  %v10590_v21 = vld [vmem:[#allocation290_spill] sm:$0xff] }
 0x564   : > { %vm8666_vm3 = vmor %vm10515_vm15, %vm835_vm9  ;;  %vm2369_vm9 = vcmp.eq.s32.totalorder %v10524_v55, %v5713_v19  ;;  %vm2561_vm15 = vcmp.eq.s32.totalorder %v10525_v63, %v5713_v19  ;;  %v10594_v55 = vld [vmem:[#allocation354_spill] sm:$0xff] }
 0x565   : > { %vm8672_vm14 = vmor %vm10518_vm0, %vm1618_vm12  ;;  %vm2753_vm0 = vcmp.eq.s32.totalorder %v10526_v49, %v5713_v19 }
 0x566   : > { %v10520_v57 = vsel %vm8672_vm14, 4294967295, %v10519_v57  ;;  %vm1825_vm8 = vmor %vm1633_vm11, %vm1793_vm1  ;;  %vm852_vm1 = vcmp.eq.s32.totalorder %v10527_v31, %v5713_v19  ;;  %vm10531_vm14 = vnez %v10507_v20  ;;  %v2737_v26 = vpop.permute.xlu1 %2736  ;;  %v10595_v31 = vld [vmem:[#allocation361_spill] sm:$0xff] }
 0x567   : > { %vm8678_vm10 = vmor %vm1634_vm4, %vm1794_vm2  ;;  %vm851_vm2 = vcmp.eq.s32.totalorder %v10528_v46, %v5713_v19  ;;  %v10598_v46 = vld [vmem:[#allocation291_spill] sm:$0xff] }
 0x568   : > { %v10523_v9 = vsel %vm8678_vm10, 4294967295, %v10522_v9  ;;  %vm2017_vm13 = vmor %vm1825_vm8, %vm1985_vm6  ;;  %vm3137_vm10 = vcmp.eq.s32.totalorder %v3067_v50, %v5713_v19  ;;  %vm1027_vm6 = vcmp.eq.s32.totalorder %v10529_v43, %v5713_v19  ;;  %vm1810_vm8 = vcmp.eq.s32.totalorder %v10530_v51, %v5713_v19  ;;  %v10597_v50 = vld [vmem:[#allocation77_spill] sm:$0xff]  ;;  %v10599_v43 = vld [vmem:[#allocation339_spill] sm:$0xff] }
 0x569   : > { %vm2209_vm12 = vmor %vm2017_vm13, %vm2177_vm7  ;;  %vm2945_vm13 = vcmp.eq.s32.totalorder %v2875_v28, %v5713_v19  ;;  %v10600_v51 = vld [vmem:[#allocation352_spill] sm:$0xff] }
 0x56a   : > { %vm2401_vm11 = vmor %vm2209_vm12, %vm2369_vm9  ;;  %v2881_v40 = vpop.permute.xlu1 %2880 }
 0x56b   : > { %vm2593_vm4 = vmor %vm2401_vm11, %vm2561_vm15  ;;  %vm1986_vm15 = vcmp.eq.s32.totalorder %v10534_v42, %v5713_v19  ;;  %v10601_v42 = vld [vmem:[#allocation61_spill] sm:$0xff] }
 0x56c   : > { %vm2785_vm7 = vmor %vm2593_vm4, %vm2753_vm0  ;;  %vm2002_vm0 = vcmp.eq.s32.totalorder %v10537_v0, %v5713_v19  ;;  %v10603_v0 = vld [vmem:[#allocation65_spill] sm:$0xff] }
 0x56d   : > { %vm8700_vm9 = vmor %vm10531_vm14, %vm852_vm1  ;;  %vm10540_vm1 = vnez %v10520_v57  ;;  %v10589_v57 = vld [vmem:[#allocation274_spill] sm:$0xff] }
 0x56e   : > { %v10533_v60 = vsel %vm8700_vm9, 4294967295, %v10532_v60  ;;  %vm2977_vm12 = vmor %vm2785_vm7, %vm2945_vm13  ;;  %vm2194_vm7 = vcmp.eq.s32.totalorder %v10541_v17, %v5713_v19  ;;  %v2929_v62 = vpop.permute.xlu1 %2928 }
 0x56f   : > { %vm8708_vm11 = vmor %vm8655_vm5, %vm851_vm2  ;;  %vm10542_vm5 = vnez %v10523_v9 }
 0x570   : > { %vm3169_vm4 = vmor %vm2977_vm12, %vm3137_vm10  ;;  %vm10546_vm10 = vcmask 785408   ;;  %vm2770_vm12 = vcmp.eq.s32.totalorder %v2734_v24, %v5713_v19  ;;  %v10591_v24 = vld [vmem:[#allocation304_spill] sm:$0xff] }
 0x571   : > { %vm8716_vm14 = vmor %vm8666_vm3, %vm1027_vm6  ;;  %v3696_v58 = vsel %vm3169_vm4, 1.0, %v4085_v16  ;;  %vm2386_vm3 = vcmp.eq.s32.totalorder %v10545_v33, %v5713_v19  ;;  %vm1044_vm4 = vcmp.eq.s32.totalorder %v10548_v7, %v5713_v19 }
 0x572   : > { %v10539_v10 = vsel %vm8716_vm14, 4294967295, %v10538_v10  ;;  %vm1842_vm9 = vmor %vm10540_vm1, %vm1810_vm8  ;;  %3836 = vmatprep.mubr.msk.f32.mxu0 %vm10546_vm10, %v3696_v58  ;;  %vm2578_vm8 = vcmp.eq.s32.totalorder %v10547_v3, %v5713_v19  ;;  %v2932_v63 = vpop.permute.xlu1 %2931 }
 0x573   : > { %vm8727_vm2 = vmor %vm10542_vm5, %vm1986_vm15  ;;  %vm1043_vm15 = vcmp.eq.s32.totalorder %v10549_v1, %v5713_v19  ;;  %vm2178_vm5 = vcmp.eq.s32.totalorder %v10550_v41, %v5713_v19 }
 0x574   : > { %v10544_v23 = vsel %vm8727_vm2, 4294967295, %v10543_v23  ;;  %vm2034_vm6 = vmor %vm1842_vm9, %vm2002_vm0  ;;  %vm2962_vm9 = vcmp.eq.s32.totalorder %v2926_v61, %v5713_v19  ;;  %vm1219_vm0 = vcmp.eq.s32.totalorder %v10551_v27, %v5713_v19 }
 0x575   : > { %vm2226_vm13 = vmor %vm2034_vm6, %vm2194_vm7  ;;  %vm2370_vm7 = vcmp.eq.s32.totalorder %v10552_v8, %v5713_v19  ;;  %vm10553_vm6 = vnez %v10533_v60 }
 0x576   : > { %vm2418_vm1 = vmor %vm2226_vm13, %vm2386_vm3  ;;  %v3073_v28 = vpop.permute.xlu1 %3072 }
 0x577   : > { %vm2610_vm14 = vmor %vm2418_vm1, %vm2578_vm8  ;;  %vm10558_vm8 = vnez %v10544_v23 }
 0x578   : > { %vm2802_vm10 = vmor %vm2610_vm14, %vm2770_vm12  ;;  %vm10559_vm12 = vnez %v10539_v10 }
 0x579   : > { %vm8750_vm3 = vmor %vm10553_vm6, %vm1044_vm4  ;;  %vm2946_vm6 = vcmp.eq.s32.totalorder %v2878_v38, %v5713_v19 }
 0x57a   : > { %v10555_v12 = vsel %vm8750_vm3, 4294967295, %v10554_v12  ;;  %vm2994_vm13 = vmor %vm2802_vm10, %vm2962_vm9  ;;  %vm2562_vm9 = vcmp.eq.s32.totalorder %v10562_v39, %v5713_v19  ;;  %vm3154_vm10 = vcmp.eq.s32.totalorder %v3118_v56, %v5713_v19  ;;  %v3076_v59 = vpop.permute.xlu1 %3075 }
 0x57b   : > { %vm8756_vm2 = vmor %vm8708_vm11, %vm1043_vm15  ;;  %vm2754_vm11 = vcmp.eq.s32.totalorder %v10563_v2, %v5713_v19 }
 0x57c   : > { %v10557_v37 = vsel %vm8756_vm2, 4294967295, %v10556_v37  ;;  %vm2210_vm1 = vmor %vm10558_vm8, %vm2178_vm5  ;;  %vm3153_vm5 = vcmp.eq.s32.totalorder %v3115_v25, %v5713_v19  ;;  %vm3138_vm2 = vcmp.eq.s32.totalorder %v3070_v54, %v5713_v19 }
 0x57d   : > { %vm8764_vm14 = vmor %vm10559_vm12, %vm1219_vm0  ;;  %vm10564_vm0 = vnez %v9951_v36  ;;  %v10569_v36 = vld [vmem:[#allocation183_spill] sm:$0xff] }
 0x57e   : > { %v10561_v18 = vsel %vm8764_vm14, 4294967295, %v10560_v18  ;;  %vm2402_vm4 = vmor %vm2210_vm1, %vm2370_vm7  ;;  %vm1236_vm7 = vcmp.eq.s32.totalorder %v10565_v5, %v5713_v19  ;;  %vm10566_vm14 = vcmask 785408   ;;  %v3124_v17 = vpop.permute.xlu1 %3123 }
 0x57f   : > { %vm3186_vm15 = vmor %vm2994_vm13, %vm3154_vm10  ;;  %vm1235_vm13 = vcmp.eq.s32.totalorder %v10567_v11, %v5713_v19 }
 0x580   : > { %vm3185_vm8 = vmor %vm10564_vm0, %vm3153_vm5  ;;  %v3713_v35 = vsel %vm3186_vm15, 1.0, %v4085_v16  ;;  %vm10570_vm5 = vnez %v10555_v12  ;;  %vm10572_vm15 = vnez %v10557_v37 }
 0x581   : > { %vm2594_vm12 = vmor %vm2402_vm4, %vm2562_vm9  ;;  %v3712_v4 = vsel %vm3185_vm8, 1.0, %v4085_v16  ;;  %vm1411_vm4 = vcmp.eq.s32.totalorder %v10569_v36, %v5713_v19 }
 0x582   : > { %vm2786_vm1 = vmor %vm2594_vm12, %vm2754_vm11  ;;  %3860 = vmatprep.mubr.msk.f32.mxu1 %vm10566_vm14, %v3712_v4 }
 0x583   : > { %vm2978_vm10 = vmor %vm2786_vm1, %vm2946_vm6  ;;  %vm1428_vm6 = vcmp.eq.s32.totalorder %v10573_v53, %v5713_v19  ;;  %vm1620_vm1 = vcmp.eq.s32.totalorder %v10577_v48, %v5713_v19 }
 0x584   : > { %vm10568_vm3 = vmmov %vm10566_vm14  ;;  %vm1427_vm14 = vcmp.eq.s32.totalorder %v10571_v29, %v5713_v19 }
 0x585   : > { %3861 = vmatmul.mubr.msk.f32.gmra.mrb[12].mxu1 %vm10568_vm3, %v3713_v35  ;;  %vm3170_vm9 = vmor %vm2978_vm10, %vm3138_vm2  ;;  %vm1603_vm2 = vcmp.eq.s32.totalorder %v10576_v32, %v5713_v19  ;;  %vm1619_vm10 = vcmp.eq.s32.totalorder %v10578_v52, %v5713_v19 }
 0x586   : > { %vm1268_vm11 = vmor %vm10570_vm5, %vm1236_vm7  ;;  %v3697_v47 = vsel %vm3170_vm9, 1.0, %v4085_v16  ;;  %vm1795_vm9 = vcmp.eq.s32.totalorder %v10579_v30, %v5713_v19  ;;  %vm1811_vm5 = vcmp.eq.s32.totalorder %v10580_v44, %v5713_v19 }
 0x587   : > { %vm1267_vm0 = vmor %vm10572_vm15, %vm1235_vm13 }
 0x588   : > { %vm10574_vm8 = vmmov %vm10568_vm3  ;;  %vm10575_vm3 = vnez %v10561_v18 }
 0x589   : > { %3837 = vmatmul.mubr.msk.f32.gmra.mrb[12].mxu0 %vm10574_vm8, %v3697_v47  ;;  %vm1443_vm12 = vmor %vm10575_vm3, %vm1411_vm4  ;;  %vm2003_vm4 = vcmp.eq.s32.totalorder %v10581_v14, %v5713_v19 }
 0x58a   : > { %vm1459_vm7 = vmor %vm1267_vm0, %vm1427_vm14  ;;  %vm2195_vm0 = vcmp.eq.s32.totalorder %v10584_v45, %v5713_v19 }
 0x58b   : > { %vm1460_vm13 = vmor %vm1268_vm11, %vm1428_vm6  ;;  %vm2387_vm6 = vcmp.eq.s32.totalorder %v10587_v13, %v5713_v19 }
 0x58c   : > { %vm1635_vm15 = vmor %vm1443_vm12, %vm1603_vm2  ;;  %vm2579_vm2 = vcmp.eq.s32.totalorder %v10588_v22, %v5713_v19 }
 0x58d   : > { %vm8812_vm8 = vmor %vm1460_vm13, %vm1620_vm1  ;;  %vm2771_vm13 = vcmp.eq.s32.totalorder %v2737_v26, %v5713_v19 }
 0x58e   : > { %vm1651_vm14 = vmor %vm1459_vm7, %vm1619_vm10 }
 0x58f   : > { %vm8818_vm3 = vmor %vm1635_vm15, %vm1795_vm9  ;;  %vm1812_vm9 = vcmp.eq.s32.totalorder %v10589_v57, %v5713_v19 }
 0x590   : > { %vm1843_vm11 = vmor %vm1651_vm14, %vm1811_vm5  ;;  %vm2963_vm5 = vcmp.eq.s32.totalorder %v2929_v62, %v5713_v19  ;;  %vm1987_vm14 = vcmp.eq.s32.totalorder %v10590_v21, %v5713_v19 }
 0x591   : > { %vm2035_vm12 = vmor %vm1843_vm11, %vm2003_vm4  ;;  %vm3155_vm4 = vcmp.eq.s32.totalorder %v3121_v6, %v5713_v19 }
 0x592   : > { %vm2227_vm1 = vmor %vm2035_vm12, %vm2195_vm0  ;;  %vm2179_vm0 = vcmp.eq.s32.totalorder %v10591_v24, %v5713_v19 }
 0x593   : > { %vm2419_vm7 = vmor %vm2227_vm1, %vm2387_vm6 }
 0x594   : > { %vm2611_vm10 = vmor %vm2419_vm7, %vm2579_vm2  ;;  %vm2371_vm2 = vcmp.eq.s32.totalorder %v10594_v55, %v5713_v19  ;;  %vm10596_vm7 = vcmask 785408  }
 0x595   : > { %vm2803_vm15 = vmor %vm2611_vm10, %vm2771_vm13  ;;  %vm2563_vm13 = vcmp.eq.s32.totalorder %v10595_v31, %v5713_v19 }
 0x596   : > { %vm2995_vm11 = vmor %vm2803_vm15, %vm2963_vm5  ;;  %vm2947_vm15 = vcmp.eq.s32.totalorder %v2881_v40, %v5713_v19 }
 0x597   : > { %vm3187_vm12 = vmor %vm2995_vm11, %vm3155_vm4  ;;  %vm2004_vm4 = vcmp.eq.s32.totalorder %v10598_v46, %v5713_v19 }
 0x598   : > { %vm8837_vm6 = vmor %vm8812_vm8, %vm1812_vm9  ;;  %v3714_v49 = vsel %vm3187_vm12, 1.0, %v4085_v16  ;;  %vm2755_vm8 = vcmp.eq.s32.totalorder %v10597_v50, %v5713_v19  ;;  %vm3139_vm12 = vcmp.eq.s32.totalorder %v3073_v28, %v5713_v19 }
 0x599   : > { %vm2019_vm1 = vmor %vm8818_vm3, %vm1987_vm14  ;;  %3863 = vmatprep.mubr.msk.f32.mxu1 %vm10596_vm7, %v3714_v49  ;;  %vm2196_vm3 = vcmp.eq.s32.totalorder %v10599_v43, %v5713_v19  ;;  %vm2580_vm7 = vcmp.eq.s32.totalorder %v10601_v42, %v5713_v19 }
 0x59a   : > { %vm2211_vm10 = vmor %vm2019_vm1, %vm2179_vm0  ;;  %vm2388_vm0 = vcmp.eq.s32.totalorder %v10600_v51, %v5713_v19 }
 0x59b   : > { %vm2403_vm9 = vmor %vm2211_vm10, %vm2371_vm2  ;;  %vm10602_vm10 = vcmask 785408  }
 0x59c   : > { %vm2595_vm5 = vmor %vm2403_vm9, %vm2563_vm13  ;;  %vm2772_vm9 = vcmp.eq.s32.totalorder %v10603_v0, %v5713_v19 }
 0x59d   : > { %vm2787_vm11 = vmor %vm2595_vm5, %vm2755_vm8  ;;  %vm2964_vm5 = vcmp.eq.s32.totalorder %v2932_v63, %v5713_v19 }
 0x59e   : > { %vm2979_vm14 = vmor %vm2787_vm11, %vm2947_vm15  ;;  %vm3140_vm15 = vcmp.eq.s32.totalorder %v3076_v59, %v5713_v19 }
 0x59f   : > { %vm3171_vm1 = vmor %vm2979_vm14, %vm3139_vm12 }
 0x5a0   : > { %vm2036_vm2 = vmor %vm8837_vm6, %vm2004_vm4  ;;  %v3698_v60 = vsel %vm3171_vm1, 1.0, %v4085_v16  ;;  %vm10604_vm6 = vnez %v9973_v15 }
 0x5a1   : > { %vm2228_vm13 = vmor %vm2036_vm2, %vm2196_vm3  ;;  %3839 = vmatprep.mubr.msk.f32.mxu0 %vm10602_vm10, %v3698_v60 }
 0x5a2   : > { %vm2420_vm8 = vmor %vm2228_vm13, %vm2388_vm0  ;;  %vm3156_vm0 = vcmp.eq.s32.totalorder %v3124_v17, %v5713_v19  ;;  %v3820_v19 = vpop.f32.mrb[0].mxu0 }
 0x5a3   : > { %vm3172_vm4 = vmor %vm10604_vm6, %vm3140_vm15  ;;  %3588 = vst [vmem:[%s8881_s17 + $0x8] sm:$0xff] %v3820_v19  ;;  %v3428_v15 = vpop.f32.mrb[1].mxu0 }
 0x5a4   : > { %vm2612_vm11 = vmor %vm2420_vm8, %vm2580_vm7  ;;  %v3699_v10 = vsel %vm3172_vm4, 1.0, %v4085_v16  ;;  %3587 = vst [vmem:[%s8881_s17] sm:$0xff] %v3428_v15  ;;  %v3823_v23 = vpop.f32.mrb[2].mxu0 }
 0x5a5   : > { %vm2804_vm3 = vmor %vm2612_vm11, %vm2772_vm9  ;;  %3590 = vst [vmem:[%s8881_s17 + $0x18] sm:$0xff] %v3823_v23  ;;  %v3438_v33 = vpop.f32.mrb[3].mxu0 }
 0x5a6   : > { %vm10605_vm14 = vmmov %vm10602_vm10  ;;  %3589 = vst [vmem:[%s8881_s17 + $0x10] sm:$0xff] %v3438_v33 }
 0x5a7   : > { %3840 = vmatmul.mubr.msk.f32.gmra.mrb[14].mxu0 %vm10605_vm14, %v3699_v10  ;;  %vm2996_vm12 = vmor %vm2804_vm3, %vm2964_vm5  ;;  %v3826_v41 = vpop.f32.mrb[4].mxu0 }
 0x5a8   : > { %vm3188_vm1 = vmor %vm2996_vm12, %vm3156_vm0  ;;  %3592 = vst [vmem:[%s8881_s17 + $0x28] sm:$0xff] %v3826_v41  ;;  %v3448_v27 = vpop.f32.mrb[5].mxu0 }
 0x5a9   : > { %v3715_v38 = vsel %vm3188_vm1, 1.0, %v4085_v16  ;;  %vm10606_vm2 = vmmov %vm10602_vm10  ;;  %v3844_v16 = vpop.f32.mrb[0].mxu1  ;;  %3591 = vst [vmem:[%s8881_s17 + $0x20] sm:$0xff] %v3448_v27 }
 0x5aa   : > { %3864 = vmatmul.mubr.msk.f32.gmra.mrb[14].mxu1 %vm10606_vm2, %v3715_v38  ;;  %3604 = vst [vmem:[%s8881_s17 + $0x88] sm:$0xff] %v3844_v16  ;;  %v3508_v58 = vpop.f32.mrb[1].mxu1 }
 0x5ab   : > { %3603 = vst [vmem:[%s8881_s17 + $0x80] sm:$0xff] %v3508_v58  ;;  %v3847_v3 = vpop.f32.mrb[2].mxu1 }
 0x5ac   : > { %3606 = vst [vmem:[%s8881_s17 + $0x98] sm:$0xff] %v3847_v3  ;;  %v3518_v7 = vpop.f32.mrb[3].mxu1 }
 0x5ad   : > { %3605 = vst [vmem:[%s8881_s17 + $0x90] sm:$0xff] %v3518_v7  ;;  %v3850_v61 = vpop.f32.mrb[4].mxu1 }
 0x5ae   : > { %3608 = vst [vmem:[%s8881_s17 + $0xa8] sm:$0xff] %v3850_v61  ;;  %v3528_v1 = vpop.f32.mrb[5].mxu1 }
 0x5af   : > { %3607 = vst [vmem:[%s8881_s17 + $0xa0] sm:$0xff] %v3528_v1 }
 0x5d2   : > { %v3829_v8 = vpop.f32.mrb[6].mxu0 }
 0x5d3   : > { %3594 = vst [vmem:[%s8881_s17 + $0x38] sm:$0xff] %v3829_v8  ;;  %v3458_v12 = vpop.f32.mrb[7].mxu0 }
 0x5d4   : > { %3593 = vst [vmem:[%s8881_s17 + $0x30] sm:$0xff] %v3458_v12 }
 0x5d5   : > { %v3853_v37 = vpop.f32.mrb[6].mxu1 }
 0x5d6   : > { %3610 = vst [vmem:[%s8881_s17 + $0xb8] sm:$0xff] %v3853_v37  ;;  %v3538_v56 = vpop.f32.mrb[7].mxu1 }
 0x5d7   : > { %3609 = vst [vmem:[%s8881_s17 + $0xb0] sm:$0xff] %v3538_v56 }
 0x602   : > { %v3856_v18 = vpop.f32.mrb[8].mxu1 }
 0x603   : > { %3612 = vst [vmem:[%s8881_s17 + $0xc8] sm:$0xff] %v3856_v18  ;;  %v3548_v39 = vpop.f32.mrb[9].mxu1 }
 0x604   : > { %3611 = vst [vmem:[%s8881_s17 + $0xc0] sm:$0xff] %v3548_v39 }
 0x606   : > { %v3832_v25 = vpop.f32.mrb[8].mxu0 }
 0x607   : > { %3596 = vst [vmem:[%s8881_s17 + $0x48] sm:$0xff] %v3832_v25  ;;  %v3468_v2 = vpop.f32.mrb[9].mxu0 }
 0x608   : > { %3595 = vst [vmem:[%s8881_s17 + $0x40] sm:$0xff] %v3468_v2 }
 0x631   : > { %v3835_v4 = vpop.f32.mrb[10].mxu0 }
 0x632   : > { %3598 = vst [vmem:[%s8881_s17 + $0x58] sm:$0xff] %v3835_v4  ;;  %v3478_v5 = vpop.f32.mrb[11].mxu0 }
 0x633   : > { %3597 = vst [vmem:[%s8881_s17 + $0x50] sm:$0xff] %v3478_v5 }
 0x635   : > { %v3859_v54 = vpop.f32.mrb[10].mxu1 }
 0x636   : > { %3614 = vst [vmem:[%s8881_s17 + $0xd8] sm:$0xff] %v3859_v54  ;;  %v3558_v35 = vpop.f32.mrb[11].mxu1 }
 0x637   : > { %3613 = vst [vmem:[%s8881_s17 + $0xd0] sm:$0xff] %v3558_v35 }
 0x658   : > { %v3862_v11 = vpop.f32.mrb[12].mxu1 }
 0x659   : > { %3616 = vst [vmem:[%s8881_s17 + $0xe8] sm:$0xff] %v3862_v11  ;;  %v3568_v36 = vpop.f32.mrb[13].mxu1 }
 0x65a   : > { %3615 = vst [vmem:[%s8881_s17 + $0xe0] sm:$0xff] %v3568_v36 }
 0x65c   : > { %v3838_v29 = vpop.f32.mrb[12].mxu0 }
 0x65d   : > { %3600 = vst [vmem:[%s8881_s17 + $0x68] sm:$0xff] %v3838_v29  ;;  %v3488_v47 = vpop.f32.mrb[13].mxu0 }
 0x65e   : > { %3599 = vst [vmem:[%s8881_s17 + $0x60] sm:$0xff] %v3488_v47 }
 0x67a   : > { %v3841_v53 = vpop.f32.mrb[14].mxu0 }
 0x67b   : > { %3602 = vst [vmem:[%s8881_s17 + $0x78] sm:$0xff] %v3841_v53  ;;  %v3498_v32 = vpop.f32.mrb[15].mxu0 }
 0x67c   : > { %3601 = vst [vmem:[%s8881_s17 + $0x70] sm:$0xff] %v3498_v32 }
 0x67d   : > { %v3865_v26 = vpop.f32.mrb[14].mxu1 }
 0x67e   : > { %3618 = vst [vmem:[%s8881_s17 + $0xf8] sm:$0xff] %v3865_v26  ;;  %v3578_v48 = vpop.f32.mrb[15].mxu1 }
 0x67f   : > { %3617 = vst [vmem:[%s8881_s17 + $0xf0] sm:$0xff] %v3578_v48 }
 0x680 PF: > { %s12_s9 = sadd.s32 1, %s4067_s9  }
 0x681   : > { %p9_p4 = scmp.ge.s32.totalorder %s12_s9, 4  }
 0x683   :  { %11 = sbr.rel (!%p9_p4) target bundleno = 1 (0x1), region = 58 }

</bundles_post_ra>
